<compile_context>
chip_gen: v6e
topology: v6e:2x2x1
jax: 0.10.0
libtpu: 0.0.40
codegen_flags: <defaults>
</compile_context>

<pallas_src>
import functools
import math

import numpy as np
import jax
import jax.numpy as jnp
from jax import lax
from jax.experimental import pallas as pl
from jax.experimental.pallas import tpu as pltpu

# Full-precision matmuls for the pure-JAX reference and the f32-operand kernel mode.
jax.config.update("jax_default_matmul_precision", "highest")

VMEM = pltpu.MemorySpace.VMEM


def _vmem_specs(n):
    return [pl.BlockSpec(memory_space=VMEM) for _ in range(n)]


# ---------------------------------------------------------------------------
# Activation (shared by kernel and reference)
# ---------------------------------------------------------------------------
def _erf(x):
    # fp32-accurate erf (Abramowitz & Stegun 7.1.26, |err| <= 1.5e-7) for torch.nn.GELU().
    a1, a2, a3, a4, a5 = 0.254829592, -0.284496736, 1.421413741, -1.453152027, 1.061405429
    p = 0.3275911
    s = jnp.sign(x)
    ax = jnp.abs(x)
    t = 1.0 / (1.0 + p * ax)
    poly = ((((a5 * t + a4) * t + a3) * t + a2) * t + a1) * t
    return s * (1.0 - poly * jnp.exp(-ax * ax))


def _activation(x, act):
    if act == "relu":
        return jnp.maximum(x, 0.0)
    if act == "gelu":
        return 0.5 * x * (1.0 + _erf(x * 0.7071067811865476))
    if act is None:
        return x
    raise ValueError(act)


# ---------------------------------------------------------------------------
# Static per-tap roll plans for the reflect-'same' dilated conv
# ---------------------------------------------------------------------------
def _conv_tap_plans(L, ksize, dilation):
    """For tap k, the source (within-utterance) column of output column t is
    reflect(t + k*dilation - pad).  Each plan is a tuple of runs (roll_shift, t0, t1):
    for within-utterance time t in [t0, t1) the shifted input is
    pltpu.roll(inp, roll_shift, axis=lanes).  Runs partition [0, L); the first run is the
    widest (interior) one, the remaining <= pad runs are the reflect boundary fix-ups."""
    pad = dilation * (ksize - 1) // 2
    assert pad < L, "reflect padding requires pad < L"
    plans = []
    for k in range(ksize):
        s = k * dilation - pad
        deltas = []
        for t in range(L):
            m = t + s
            if m < 0:
                m = -m
            elif m >= L:
                m = 2 * (L - 1) - m
            deltas.append(m - t)            # source - dest  ->  roll shift is -delta
        runs, t0 = [], 0
        for t in range(1, L + 1):
            if t == L or deltas[t] != deltas[t0]:
                runs.append((-deltas[t0], t0, t))
                t0 = t
        runs.sort(key=lambda r: r[2] - r[1], reverse=True)
        plans.append(tuple(runs))
    return tuple(plans)


# ---------------------------------------------------------------------------
# Fused SERes2NetBlock kernel (gridless: everything resident in VMEM)
# ---------------------------------------------------------------------------
def _seres2net_kernel(x_ref, w1_ref, wr_ref, w2b_ref, wse1_ref, wse2_ref,
                      pvec_ref, pch_ref, mavg_ref, out_ref,
                      *, scale, ksize, act, eps, L, n_utt, se_ch,
                      tap_plans, mxu_dtype):
    f32 = jnp.float32
    x = x_ref[...]                               # [C, N*L] f32 (batch folded into lanes)
    cout, nl = out_ref.shape
    cs = cout // scale

    def mm(a, b):                                # MXU: bf16 (or f32) operands, f32 accumulate
        return jnp.dot(a.astype(mxu_dtype), b.astype(mxu_dtype),
                       preferred_element_type=f32)

    def bn(h, gamma, beta):                      # training-mode BN over all (N, L) lanes,
        m1 = jnp.mean(h, axis=1, keepdims=True)  # fused scale/offset, single stats pass
        m2 = jnp.mean(h * h, axis=1, keepdims=True)
        sc = gamma * lax.rsqrt(m2 - m1 * m1 + eps)
        return h * sc + (beta - m1 * sc)

    # Packed per-channel parameter columns (one [C, 8] slab instead of 8 tiny inputs).
    b1, g1, bt1 = pvec_ref[:, 0:1], pvec_ref[:, 1:2], pvec_ref[:, 2:3]
    b2, g2, bt2 = pvec_ref[:, 3:4], pvec_ref[:, 4:5], pvec_ref[:, 5:6]
    bse2 = pvec_ref[:, 6:7]
    bse1 = pvec_ref[0:se_ch, 7:8]

    # --- tdnn1: 1x1 conv + activation + BN, one matmul over all N*L lanes ---
    h1 = bn(_activation(mm(w1_ref[...], x) + b1, act), g1, bt1)

    # Within-utterance time index of each lane (shared by conv fix-ups and SE gate bcast).
    lane = lax.broadcasted_iota(jnp.int32, (1, nl), 1)
    t_mod = (lane & (L - 1)) if (L & (L - 1)) == 0 else (lane % L)

    shift_set = sorted({sh for plan in tap_plans for (sh, _, _) in plan})

    def shifted_taps(inp):
        # Reflect-'same' dilated shifts as XLU lane rolls + masked boundary fix-ups.
        rolled = {sh: (inp if sh % nl == 0 else pltpu.roll(inp, sh % nl, axis=1))
                  for sh in shift_set}
        outs = []
        for plan in tap_plans:
            cur = rolled[plan[0][0]]             # widest (interior) run
            for sh, t0, t1 in plan[1:]:          # <= pad single-column reflect fix-ups
                msk = (t_mod == t0) if t1 - t0 == 1 else ((t_mod >= t0) & (t_mod < t1))
                cur = jnp.where(msk, rolled[sh], cur)
            outs.append(cur)
        return jnp.concatenate(outs, axis=0)     # [ksize*cs, N*L]

    # --- Res2Net: chunk 0 passthrough, branch i>=1 convs (x_i [+ y_{i-1}]).
    # One stacked-tap MXU matmul per branch (K = ksize*cs) instead of ksize tiny matmuls.
    ys = [h1[0:cs, :]]
    y_prev = None
    for i in range(1, scale):
        inp = h1[i * cs:(i + 1) * cs, :]         # cs is a multiple of 8 -> aligned slice
        if i >= 2:
            inp = inp + y_prev
        pch = pch_ref[i - 1]                     # [cs, 3] = (bias, gamma, beta)
        z = mm(wr_ref[i - 1], shifted_taps(inp)) + pch[:, 0:1]
        y_prev = bn(jnp.maximum(z, 0.0), pch[:, 1:2], pch[:, 2:3])   # Res2 blocks: ReLU
        ys.append(y_prev)

    # --- tdnn2: 1x1 conv over the concatenated chunks, accumulated blockwise (no concat) ---
    h2 = mm(w2b_ref[0], ys[0])                   # init with first term (no zeros slab)
    for i in range(1, scale):
        h2 = h2 + mm(w2b_ref[i], ys[i])
    h2 = bn(_activation(h2 + b2, act), g2, bt2)

    # --- SE block (lengths=None): batched per-utterance time mean -> bottleneck -> gate ---
    s = mm(h2, mavg_ref[...])                                    # [C, N]
    hid = jnp.maximum(mm(wse1_ref[...], s) + bse1, 0.0)          # [SE, N]
    gate = jax.nn.sigmoid(mm(wse2_ref[...], hid) + bse2)         # [C, N]

    # Broadcast gates back over time on the VPU (no mexp constant, no K=N matmul).
    gate_full = jnp.broadcast_to(gate[:, 0:1], (cout, nl))
    for u in range(1, n_utt):
        gate_full = jnp.where(lane >= u * L, gate[:, u:u + 1], gate_full)

    # --- SE scaling + residual add (in_channels == out_channels -> identity shortcut) ---
    out_ref[...] = gate_full * h2 + x


# ---------------------------------------------------------------------------
# Wrapper: host-side layout plumbing + single pallas_call
# ---------------------------------------------------------------------------
def se_res2net_block(params, x, *, scale, dilation, act="relu", eps=1e-5,
                     mxu_dtype=jnp.bfloat16):
    """Forward of SERes2NetBlock(in_c==out_c, res2net_scale, se_channels, k, dilation, act),
    lengths=None, training-mode BatchNorm.  x: [N, C, L] torch-native layout."""
    n, cin, L = x.shape
    cout = params["w1"].shape[0]
    se_ch = params["wse1"].shape[0]
    assert cin == cout, "demo config uses in_channels == out_channels (shortcut is None)"
    assert cout % scale == 0 and se_ch <= cout
    cs = cout // scale
    # TODO(synk): for cs not a multiple of 8, zero-pad the chunk rows host-side (pad w1/wr/
    # w2 blocks and zero the pad-row BN gamma/beta) so chunk slices stay (8,128)-aligned.
    assert cs % 8 == 0, "chunk rows must be sublane-aligned at this test shape"
    ksize = params["wr"].shape[1]
    nl = n * L

    tap_plans = _conv_tap_plans(L, ksize, dilation)

    # Host-side layout plumbing (runs once at trace time): fold batch into lanes, cast
    # MXU operands to bf16, stack per-tap conv weights, split tdnn2 weights per chunk.
    xt = jnp.transpose(x, (1, 0, 2)).reshape(cin, nl)
    w1 = params["w1"].astype(mxu_dtype)
    wr = jnp.transpose(params["wr"], (0, 2, 1, 3)).reshape(
        scale - 1, cs, ksize * cs).astype(mxu_dtype)
    w2b = params["w2"].reshape(cout, scale, cs).transpose(1, 0, 2).astype(mxu_dtype)
    wse1 = params["wse1"].astype(mxu_dtype)
    wse2 = params["wse2"].astype(mxu_dtype)

    # Pack the tiny per-channel vectors into two slabs (fewer DMA descriptors).
    bse1_pad = jnp.pad(params["bse1"], ((0, cout - se_ch), (0, 0)))
    pvec = jnp.concatenate([params["b1"], params["g1"], params["bt1"],
                            params["b2"], params["g2"], params["bt2"],
                            params["bse2"], bse1_pad], axis=1)                 # [C, 8]
    pch = jnp.concatenate([params["br"], params["gr"], params["btr"]], axis=2)  # [S-1,cs,3]

    # Per-utterance time-mean operator for the SE squeeze (all N means in one matmul).
    mavg_np = np.zeros((nl, n), np.float32)
    for b in range(n):
        mavg_np[b * L:(b + 1) * L, b] = 1.0 / L
    mavg = jnp.asarray(mavg_np).astype(mxu_dtype)

    kernel = functools.partial(_seres2net_kernel, scale=scale, ksize=ksize, act=act,
                               eps=eps, L=L, n_utt=n, se_ch=se_ch,
                               tap_plans=tap_plans, mxu_dtype=mxu_dtype)
    # TODO(synk): at production ECAPA sizes (C=512..1536, long L), switch to a grid with a
    # "parallel" batch/time axis (v7x has 2 TensorCores), a two-pass structure for the
    # global BatchNorm/SE statistics (stats kernel + apply kernel), and
    # pltpu.CompilerParams(vmem_limit_bytes=...) sized for v7x's 64 MiB VMEM (16 MiB scoped
    # default on v5e).  The gridless whole-in-VMEM form is only optimal at small shapes.
    out_t = pl.pallas_call(
        kernel,
        out_shape=jax.ShapeDtypeStruct((cout, nl), jnp.float32),
        in_specs=_vmem_specs(9),
        out_specs=pl.BlockSpec(memory_space=VMEM),
    )(xt, w1, wr, w2b, wse1, wse2, pvec, pch, mavg)
    return out_t.reshape(cout, n, L).transpose(1, 0, 2)


# ---------------------------------------------------------------------------
# Pure-JAX reference (same semantics, torch [N, C, L] layout) for validation
# ---------------------------------------------------------------------------
def ref_forward(params, x, *, scale, dilation, act="relu", eps=1e-5):
    def bn(h, gamma, beta):
        mean = jnp.mean(h, axis=(0, 2), keepdims=True)
        var = jnp.mean((h - mean) ** 2, axis=(0, 2), keepdims=True)
        return (h - mean) * jax.lax.rsqrt(var + eps) * gamma[None] + beta[None]

    def conv1x1(h, w, b):
        return jnp.einsum("oc,ncl->nol", w, h) + b[None]

    def dconv(h, w, b, dil):
        ks, co, _ = w.shape
        pad = dil * (ks - 1) // 2
        L = h.shape[2]
        hp = jnp.pad(h, ((0, 0), (0, 0), (pad, pad)), mode="reflect")
        out = jnp.zeros((h.shape[0], co, L), jnp.float32) + b[None]
        for k in range(ks):
            out = out + jnp.einsum("oc,ncl->nol", w[k], hp[:, :, k * dil:k * dil + L])
        return out

    residual = x
    h = bn(_activation(conv1x1(x, params["w1"], params["b1"]), act), params["g1"], params["bt1"])
    cs = h.shape[1] // scale
    ys = [h[:, :cs]]
    for i in range(1, scale):
        inp = h[:, i * cs:(i + 1) * cs]
        if i >= 2:
            inp = inp + ys[-1]
        y = bn(jnp.maximum(dconv(inp, params["wr"][i - 1], params["br"][i - 1], dilation), 0.0),
               params["gr"][i - 1], params["btr"][i - 1])
        ys.append(y)
    h = jnp.concatenate(ys, axis=1)
    h = bn(_activation(conv1x1(h, params["w2"], params["b2"]), act), params["g2"], params["bt2"])
    s = jnp.mean(h, axis=2, keepdims=True)
    hid = jnp.maximum(jnp.einsum("sc,ncl->nsl", params["wse1"], s) + params["bse1"][None], 0.0)
    gate = jax.nn.sigmoid(jnp.einsum("cs,nsl->ncl", params["wse2"], hid) + params["bse2"][None])
    return gate * h + residual


# ---------------------------------------------------------------------------
# Deterministic synthetic parameters (shapes follow the module __init__)
# ---------------------------------------------------------------------------
def init_params(key, cin, cout, scale, se_ch, ksize):
    cs = cout // scale
    keys = jax.random.split(key, 16)

    def w(k, shape, fan_in):
        return jax.random.normal(k, shape, jnp.float32) / math.sqrt(fan_in)

    def vec(k, c, s=0.05):
        return s * jax.random.normal(k, (c, 1), jnp.float32)

    return {
        "w1": w(keys[0], (cout, cin), cin), "b1": vec(keys[1], cout),
        "g1": 1.0 + 0.1 * jax.random.normal(keys[2], (cout, 1), jnp.float32),
        "bt1": vec(keys[3], cout),
        "wr": w(keys[4], (scale - 1, ksize, cs, cs), cs * ksize),
        "br": 0.05 * jax.random.normal(keys[5], (scale - 1, cs, 1), jnp.float32),
        "gr": 1.0 + 0.1 * jax.random.normal(keys[6], (scale - 1, cs, 1), jnp.float32),
        "btr": 0.05 * jax.random.normal(keys[7], (scale - 1, cs, 1), jnp.float32),
        "w2": w(keys[8], (cout, cout), cout), "b2": vec(keys[9], cout),
        "g2": 1.0 + 0.1 * jax.random.normal(keys[10], (cout, 1), jnp.float32),
        "bt2": vec(keys[11], cout),
        "wse1": w(keys[12], (se_ch, cout), cout), "bse1": vec(keys[13], se_ch),
        "wse2": w(keys[14], (cout, se_ch), se_ch), "bse2": vec(keys[15], cout),
    }


# ---------------------------------------------------------------------------
if __name__ == "__main__":
    # SERes2NetBlock(in_channels=32, out_channels=32, res2net_scale=4, se_channels=8,
    #                kernel_size=3, dilation=2, activation=torch.nn.ReLU)
    N, C, L = 2, 32, 64            # N*L == 128 lanes; C/scale == 8 -> sublane-aligned chunks
    SCALE, SE_CH, KSIZE, DIL = 4, 8, 3, 2
    ACT = "relu"

    key = jax.random.PRNGKey(0)
    k_par, k_x = jax.random.split(key)
    params = init_params(k_par, C, C, SCALE, SE_CH, KSIZE)
    x = jax.random.normal(k_x, (N, C, L), jnp.float32)

    ref = ref_forward(params, x, scale=SCALE, dilation=DIL, act=ACT)

    # Exact-precision mode (f32 MXU operands): tight check of the fused kernel semantics.
    fwd_f32 = jax.jit(functools.partial(se_res2net_block, scale=SCALE, dilation=DIL,
                                        act=ACT, mxu_dtype=jnp.float32))
    out_f32 = jax.block_until_ready(fwd_f32(params, x))
    assert out_f32.shape == (N, C, L) and out_f32.dtype == jnp.float32
    assert bool(jnp.all(jnp.isfinite(out_f32)))
    np.testing.assert_allclose(np.asarray(out_f32), np.asarray(ref), rtol=5e-3, atol=5e-3)

    # Fast mode (bf16 MXU operands, f32 accumulation / elementwise): bf16-level tolerance.
    fwd_bf16 = jax.jit(functools.partial(se_res2net_block, scale=SCALE, dilation=DIL,
                                         act=ACT, mxu_dtype=jnp.bfloat16))
    out_bf16 = jax.block_until_ready(fwd_bf16(params, x))
    assert out_bf16.shape == (N, C, L) and out_bf16.dtype == jnp.float32
    assert bool(jnp.all(jnp.isfinite(out_bf16)))
    np.testing.assert_allclose(np.asarray(out_bf16), np.asarray(ref), rtol=3e-2, atol=3e-2)

    print("KERNEL_OK")
</pallas_src>

<mosaic_0001>
module attributes {stable_mosaic.version = 11 : i64} {
  func.func @_seres2net_kernel(%arg0: memref<32x128xf32, #tpu.memory_space<vmem>>, %arg1: memref<32x32xf32, #tpu.memory_space<vmem>>, %arg2: memref<3x8x24xf32, #tpu.memory_space<vmem>>, %arg3: memref<4x32x8xf32, #tpu.memory_space<vmem>>, %arg4: memref<8x32xf32, #tpu.memory_space<vmem>>, %arg5: memref<32x8xf32, #tpu.memory_space<vmem>>, %arg6: memref<32x8xf32, #tpu.memory_space<vmem>>, %arg7: memref<3x8x3xf32, #tpu.memory_space<vmem>>, %arg8: memref<128x2xf32, #tpu.memory_space<vmem>>, %arg9: memref<32x128xf32, #tpu.memory_space<vmem>>) attributes {dimension_semantics = [], scalar_prefetch = 0 : i64, scratch_operands = 0 : i64, tpu.core_type = #tpu.core_type<tc>} {
    %c0 = arith.constant 0 : index
    %c0_0 = arith.constant 0 : index
    %0 = vector.load %arg0[%c0, %c0_0] : memref<32x128xf32, #tpu.memory_space<vmem>>, vector<32x128xf32>
    %c0_1 = arith.constant 0 : index
    %c0_2 = arith.constant 0 : index
    %1 = vector.load %arg6[%c0_1, %c0_2] : memref<32x8xf32, #tpu.memory_space<vmem>>, vector<32x1xf32>
    %c0_3 = arith.constant 0 : index
    %c1 = arith.constant 1 : index
    %2 = vector.load %arg6[%c0_3, %c1] : memref<32x8xf32, #tpu.memory_space<vmem>>, vector<32x1xf32>
    %c0_4 = arith.constant 0 : index
    %c2 = arith.constant 2 : index
    %3 = vector.load %arg6[%c0_4, %c2] : memref<32x8xf32, #tpu.memory_space<vmem>>, vector<32x1xf32>
    %c0_5 = arith.constant 0 : index
    %c3 = arith.constant 3 : index
    %4 = vector.load %arg6[%c0_5, %c3] : memref<32x8xf32, #tpu.memory_space<vmem>>, vector<32x1xf32>
    %c0_6 = arith.constant 0 : index
    %c4 = arith.constant 4 : index
    %5 = vector.load %arg6[%c0_6, %c4] : memref<32x8xf32, #tpu.memory_space<vmem>>, vector<32x1xf32>
    %c0_7 = arith.constant 0 : index
    %c5 = arith.constant 5 : index
    %6 = vector.load %arg6[%c0_7, %c5] : memref<32x8xf32, #tpu.memory_space<vmem>>, vector<32x1xf32>
    %c0_8 = arith.constant 0 : index
    %c6 = arith.constant 6 : index
    %7 = vector.load %arg6[%c0_8, %c6] : memref<32x8xf32, #tpu.memory_space<vmem>>, vector<32x1xf32>
    %c0_9 = arith.constant 0 : index
    %c7 = arith.constant 7 : index
    %8 = vector.load %arg6[%c0_9, %c7] : memref<32x8xf32, #tpu.memory_space<vmem>>, vector<8x1xf32>
    %c0_10 = arith.constant 0 : index
    %c0_11 = arith.constant 0 : index
    %9 = vector.load %arg1[%c0_10, %c0_11] : memref<32x32xf32, #tpu.memory_space<vmem>>, vector<32x32xf32>
    %cst = arith.constant dense<0.000000e+00> : vector<32x128xf32>
    %10 = tpu.matmul %9, %0, %cst {dimension_numbers = #tpu.dot_dimension_numbers<[1], [0], [0], [1], [0, 0, 1, 1], [], []>, precision = #tpu.contract_precision<fp32>} : vector<32x32xf32>, vector<32x128xf32>, vector<32x128xf32> -> vector<32x128xf32>
    %11 = vector.broadcast %1 : vector<32x1xf32> to vector<32x128xf32>
    %12 = arith.addf %10, %11 : vector<32x128xf32>
    %cst_12 = arith.constant 0.000000e+00 : f32
    %13 = vector.broadcast %cst_12 : f32 to vector<32x128xf32>
    %14 = arith.maximumf %12, %13 : vector<32x128xf32>
    %cst_13 = arith.constant dense<0.000000e+00> : vector<32xf32>
    %15 = vector.multi_reduction <add>, %14, %cst_13 [1] : vector<32x128xf32> to vector<32xf32>
    %16 = vector.shape_cast %15 : vector<32xf32> to vector<32x1xf32>
    %cst_14 = arith.constant 1.280000e+02 : f32
    %17 = vector.broadcast %cst_14 : f32 to vector<32x1xf32>
    %18 = arith.divf %16, %17 : vector<32x1xf32>
    %19 = arith.mulf %14, %14 : vector<32x128xf32>
    %cst_15 = arith.constant dense<0.000000e+00> : vector<32xf32>
    %20 = vector.multi_reduction <add>, %19, %cst_15 [1] : vector<32x128xf32> to vector<32xf32>
    %21 = vector.shape_cast %20 : vector<32xf32> to vector<32x1xf32>
    %cst_16 = arith.constant 1.280000e+02 : f32
    %22 = vector.broadcast %cst_16 : f32 to vector<32x1xf32>
    %23 = arith.divf %21, %22 : vector<32x1xf32>
    %24 = arith.mulf %18, %18 : vector<32x1xf32>
    %25 = arith.subf %23, %24 : vector<32x1xf32>
    %cst_17 = arith.constant 9.99999974E-6 : f32
    %26 = vector.broadcast %cst_17 : f32 to vector<32x1xf32>
    %27 = arith.addf %25, %26 : vector<32x1xf32>
    %28 = math.rsqrt %27 : vector<32x1xf32>
    %29 = arith.mulf %2, %28 : vector<32x1xf32>
    %30 = vector.broadcast %29 : vector<32x1xf32> to vector<32x128xf32>
    %31 = arith.mulf %14, %30 : vector<32x128xf32>
    %32 = arith.mulf %18, %29 : vector<32x1xf32>
    %33 = arith.subf %3, %32 : vector<32x1xf32>
    %34 = vector.broadcast %33 : vector<32x1xf32> to vector<32x128xf32>
    %35 = arith.addf %31, %34 : vector<32x128xf32>
    %36 = tpu.iota {dimensions = array<i32: 1>} : vector<1x128xi32>
    %c63_i32 = arith.constant 63 : i32
    %37 = vector.broadcast %c63_i32 : i32 to vector<1x128xi32>
    %38 = arith.andi %36, %37 : vector<1x128xi32>
    %39 = vector.extract_strided_slice %35 {offsets = [0, 0], sizes = [8, 128], strides = [1, 1]} : vector<32x128xf32> to vector<8x128xf32>
    %40 = vector.extract_strided_slice %35 {offsets = [8, 0], sizes = [8, 128], strides = [1, 1]} : vector<32x128xf32> to vector<8x128xf32>
    %c0_18 = arith.constant 0 : index
    %c0_19 = arith.constant 0 : index
    %c0_20 = arith.constant 0 : index
    %41 = vector.load %arg7[%c0_18, %c0_19, %c0_20] : memref<3x8x3xf32, #tpu.memory_space<vmem>>, vector<1x8x3xf32>
    %42 = vector.shape_cast %41 : vector<1x8x3xf32> to vector<8x3xf32>
    %c0_21 = arith.constant 0 : index
    %c0_22 = arith.constant 0 : index
    %c0_23 = arith.constant 0 : index
    %43 = vector.load %arg2[%c0_21, %c0_22, %c0_23] : memref<3x8x24xf32, #tpu.memory_space<vmem>>, vector<1x8x24xf32>
    %44 = vector.shape_cast %43 : vector<1x8x24xf32> to vector<8x24xf32>
    %c126_i32 = arith.constant 126 : i32
    %45 = tpu.dynamic_rotate %40 by %c126_i32 dim 1 : vector<8x128xf32>, i32 -> vector<8x128xf32>
    %c2_i32 = arith.constant 2 : i32
    %46 = tpu.dynamic_rotate %40 by %c2_i32 dim 1 : vector<8x128xf32>, i32 -> vector<8x128xf32>
    %c0_i32 = arith.constant 0 : i32
    %47 = vector.broadcast %c0_i32 : i32 to vector<1x128xi32>
    %48 = arith.cmpi eq, %38, %47 : vector<1x128xi32>
    %49 = vector.shape_cast %48 : vector<1x128xi1> to vector<1x128xi1>
    %50 = vector.broadcast %49 : vector<1x128xi1> to vector<8x128xi1>
    %51 = arith.select %50, %45, %46 : vector<8x128xi1>, vector<8x128xf32>
    %c1_i32 = arith.constant 1 : i32
    %52 = vector.broadcast %c1_i32 : i32 to vector<1x128xi32>
    %53 = arith.cmpi eq, %38, %52 : vector<1x128xi32>
    %54 = vector.shape_cast %53 : vector<1x128xi1> to vector<1x128xi1>
    %55 = vector.broadcast %54 : vector<1x128xi1> to vector<8x128xi1>
    %56 = arith.select %55, %40, %51 : vector<8x128xi1>, vector<8x128xf32>
    %c62_i32 = arith.constant 62 : i32
    %57 = vector.broadcast %c62_i32 : i32 to vector<1x128xi32>
    %58 = arith.cmpi eq, %38, %57 : vector<1x128xi32>
    %59 = vector.shape_cast %58 : vector<1x128xi1> to vector<1x128xi1>
    %60 = vector.broadcast %59 : vector<1x128xi1> to vector<8x128xi1>
    %61 = arith.select %60, %40, %45 : vector<8x128xi1>, vector<8x128xf32>
    %c63_i32_24 = arith.constant 63 : i32
    %62 = vector.broadcast %c63_i32_24 : i32 to vector<1x128xi32>
    %63 = arith.cmpi eq, %38, %62 : vector<1x128xi32>
    %64 = vector.shape_cast %63 : vector<1x128xi1> to vector<1x128xi1>
    %65 = vector.broadcast %64 : vector<1x128xi1> to vector<8x128xi1>
    %66 = arith.select %65, %46, %61 : vector<8x128xi1>, vector<8x128xf32>
    %67 = tpu.concatenate %56, %40, %66 in 0 : vector<8x128xf32>, vector<8x128xf32>, vector<8x128xf32> -> vector<24x128xf32>
    %cst_25 = arith.constant dense<0.000000e+00> : vector<8x128xf32>
    %68 = tpu.matmul %44, %67, %cst_25 {dimension_numbers = #tpu.dot_dimension_numbers<[1], [0], [0], [1], [0, 0, 1, 1], [], []>, precision = #tpu.contract_precision<fp32>} : vector<8x24xf32>, vector<24x128xf32>, vector<8x128xf32> -> vector<8x128xf32>
    %69 = vector.extract_strided_slice %42 {offsets = [0, 0], sizes = [8, 1], strides = [1, 1]} : vector<8x3xf32> to vector<8x1xf32>
    %70 = vector.broadcast %69 : vector<8x1xf32> to vector<8x128xf32>
    %71 = arith.addf %68, %70 : vector<8x128xf32>
    %cst_26 = arith.constant 0.000000e+00 : f32
    %72 = vector.broadcast %cst_26 : f32 to vector<8x128xf32>
    %73 = arith.maximumf %71, %72 : vector<8x128xf32>
    %74 = vector.extract_strided_slice %42 {offsets = [0, 1], sizes = [8, 1], strides = [1, 1]} : vector<8x3xf32> to vector<8x1xf32>
    %75 = vector.extract_strided_slice %42 {offsets = [0, 2], sizes = [8, 1], strides = [1, 1]} : vector<8x3xf32> to vector<8x1xf32>
    %cst_27 = arith.constant dense<0.000000e+00> : vector<8xf32>
    %76 = vector.multi_reduction <add>, %73, %cst_27 [1] : vector<8x128xf32> to vector<8xf32>
    %77 = vector.shape_cast %76 : vector<8xf32> to vector<8x1xf32>
    %cst_28 = arith.constant 1.280000e+02 : f32
    %78 = vector.broadcast %cst_28 : f32 to vector<8x1xf32>
    %79 = arith.divf %77, %78 : vector<8x1xf32>
    %80 = arith.mulf %73, %73 : vector<8x128xf32>
    %cst_29 = arith.constant dense<0.000000e+00> : vector<8xf32>
    %81 = vector.multi_reduction <add>, %80, %cst_29 [1] : vector<8x128xf32> to vector<8xf32>
    %82 = vector.shape_cast %81 : vector<8xf32> to vector<8x1xf32>
    %cst_30 = arith.constant 1.280000e+02 : f32
    %83 = vector.broadcast %cst_30 : f32 to vector<8x1xf32>
    %84 = arith.divf %82, %83 : vector<8x1xf32>
    %85 = arith.mulf %79, %79 : vector<8x1xf32>
    %86 = arith.subf %84, %85 : vector<8x1xf32>
    %cst_31 = arith.constant 9.99999974E-6 : f32
    %87 = vector.broadcast %cst_31 : f32 to vector<8x1xf32>
    %88 = arith.addf %86, %87 : vector<8x1xf32>
    %89 = math.rsqrt %88 : vector<8x1xf32>
    %90 = arith.mulf %74, %89 : vector<8x1xf32>
    %91 = vector.broadcast %90 : vector<8x1xf32> to vector<8x128xf32>
    %92 = arith.mulf %73, %91 : vector<8x128xf32>
    %93 = arith.mulf %79, %90 : vector<8x1xf32>
    %94 = arith.subf %75, %93 : vector<8x1xf32>
    %95 = vector.broadcast %94 : vector<8x1xf32> to vector<8x128xf32>
    %96 = arith.addf %92, %95 : vector<8x128xf32>
    %97 = vector.extract_strided_slice %35 {offsets = [16, 0], sizes = [8, 128], strides = [1, 1]} : vector<32x128xf32> to vector<8x128xf32>
    %98 = arith.addf %97, %96 : vector<8x128xf32>
    %c1_32 = arith.constant 1 : index
    %c0_33 = arith.constant 0 : index
    %c0_34 = arith.constant 0 : index
    %99 = vector.load %arg7[%c1_32, %c0_33, %c0_34] : memref<3x8x3xf32, #tpu.memory_space<vmem>>, vector<1x8x3xf32>
    %100 = vector.shape_cast %99 : vector<1x8x3xf32> to vector<8x3xf32>
    %c1_35 = arith.constant 1 : index
    %c0_36 = arith.constant 0 : index
    %c0_37 = arith.constant 0 : index
    %101 = vector.load %arg2[%c1_35, %c0_36, %c0_37] : memref<3x8x24xf32, #tpu.memory_space<vmem>>, vector<1x8x24xf32>
    %102 = vector.shape_cast %101 : vector<1x8x24xf32> to vector<8x24xf32>
    %c126_i32_38 = arith.constant 126 : i32
    %103 = tpu.dynamic_rotate %98 by %c126_i32_38 dim 1 : vector<8x128xf32>, i32 -> vector<8x128xf32>
    %c2_i32_39 = arith.constant 2 : i32
    %104 = tpu.dynamic_rotate %98 by %c2_i32_39 dim 1 : vector<8x128xf32>, i32 -> vector<8x128xf32>
    %c0_i32_40 = arith.constant 0 : i32
    %105 = vector.broadcast %c0_i32_40 : i32 to vector<1x128xi32>
    %106 = arith.cmpi eq, %38, %105 : vector<1x128xi32>
    %107 = vector.shape_cast %106 : vector<1x128xi1> to vector<1x128xi1>
    %108 = vector.broadcast %107 : vector<1x128xi1> to vector<8x128xi1>
    %109 = arith.select %108, %103, %104 : vector<8x128xi1>, vector<8x128xf32>
    %c1_i32_41 = arith.constant 1 : i32
    %110 = vector.broadcast %c1_i32_41 : i32 to vector<1x128xi32>
    %111 = arith.cmpi eq, %38, %110 : vector<1x128xi32>
    %112 = vector.shape_cast %111 : vector<1x128xi1> to vector<1x128xi1>
    %113 = vector.broadcast %112 : vector<1x128xi1> to vector<8x128xi1>
    %114 = arith.select %113, %98, %109 : vector<8x128xi1>, vector<8x128xf32>
    %c62_i32_42 = arith.constant 62 : i32
    %115 = vector.broadcast %c62_i32_42 : i32 to vector<1x128xi32>
    %116 = arith.cmpi eq, %38, %115 : vector<1x128xi32>
    %117 = vector.shape_cast %116 : vector<1x128xi1> to vector<1x128xi1>
    %118 = vector.broadcast %117 : vector<1x128xi1> to vector<8x128xi1>
    %119 = arith.select %118, %98, %103 : vector<8x128xi1>, vector<8x128xf32>
    %c63_i32_43 = arith.constant 63 : i32
    %120 = vector.broadcast %c63_i32_43 : i32 to vector<1x128xi32>
    %121 = arith.cmpi eq, %38, %120 : vector<1x128xi32>
    %122 = vector.shape_cast %121 : vector<1x128xi1> to vector<1x128xi1>
    %123 = vector.broadcast %122 : vector<1x128xi1> to vector<8x128xi1>
    %124 = arith.select %123, %104, %119 : vector<8x128xi1>, vector<8x128xf32>
    %125 = tpu.concatenate %114, %98, %124 in 0 : vector<8x128xf32>, vector<8x128xf32>, vector<8x128xf32> -> vector<24x128xf32>
    %cst_44 = arith.constant dense<0.000000e+00> : vector<8x128xf32>
    %126 = tpu.matmul %102, %125, %cst_44 {dimension_numbers = #tpu.dot_dimension_numbers<[1], [0], [0], [1], [0, 0, 1, 1], [], []>, precision = #tpu.contract_precision<fp32>} : vector<8x24xf32>, vector<24x128xf32>, vector<8x128xf32> -> vector<8x128xf32>
    %127 = vector.extract_strided_slice %100 {offsets = [0, 0], sizes = [8, 1], strides = [1, 1]} : vector<8x3xf32> to vector<8x1xf32>
    %128 = vector.broadcast %127 : vector<8x1xf32> to vector<8x128xf32>
    %129 = arith.addf %126, %128 : vector<8x128xf32>
    %cst_45 = arith.constant 0.000000e+00 : f32
    %130 = vector.broadcast %cst_45 : f32 to vector<8x128xf32>
    %131 = arith.maximumf %129, %130 : vector<8x128xf32>
    %132 = vector.extract_strided_slice %100 {offsets = [0, 1], sizes = [8, 1], strides = [1, 1]} : vector<8x3xf32> to vector<8x1xf32>
    %133 = vector.extract_strided_slice %100 {offsets = [0, 2], sizes = [8, 1], strides = [1, 1]} : vector<8x3xf32> to vector<8x1xf32>
    %cst_46 = arith.constant dense<0.000000e+00> : vector<8xf32>
    %134 = vector.multi_reduction <add>, %131, %cst_46 [1] : vector<8x128xf32> to vector<8xf32>
    %135 = vector.shape_cast %134 : vector<8xf32> to vector<8x1xf32>
    %cst_47 = arith.constant 1.280000e+02 : f32
    %136 = vector.broadcast %cst_47 : f32 to vector<8x1xf32>
    %137 = arith.divf %135, %136 : vector<8x1xf32>
    %138 = arith.mulf %131, %131 : vector<8x128xf32>
    %cst_48 = arith.constant dense<0.000000e+00> : vector<8xf32>
    %139 = vector.multi_reduction <add>, %138, %cst_48 [1] : vector<8x128xf32> to vector<8xf32>
    %140 = vector.shape_cast %139 : vector<8xf32> to vector<8x1xf32>
    %cst_49 = arith.constant 1.280000e+02 : f32
    %141 = vector.broadcast %cst_49 : f32 to vector<8x1xf32>
    %142 = arith.divf %140, %141 : vector<8x1xf32>
    %143 = arith.mulf %137, %137 : vector<8x1xf32>
    %144 = arith.subf %142, %143 : vector<8x1xf32>
    %cst_50 = arith.constant 9.99999974E-6 : f32
    %145 = vector.broadcast %cst_50 : f32 to vector<8x1xf32>
    %146 = arith.addf %144, %145 : vector<8x1xf32>
    %147 = math.rsqrt %146 : vector<8x1xf32>
    %148 = arith.mulf %132, %147 : vector<8x1xf32>
    %149 = vector.broadcast %148 : vector<8x1xf32> to vector<8x128xf32>
    %150 = arith.mulf %131, %149 : vector<8x128xf32>
    %151 = arith.mulf %137, %148 : vector<8x1xf32>
    %152 = arith.subf %133, %151 : vector<8x1xf32>
    %153 = vector.broadcast %152 : vector<8x1xf32> to vector<8x128xf32>
    %154 = arith.addf %150, %153 : vector<8x128xf32>
    %155 = vector.extract_strided_slice %35 {offsets = [24, 0], sizes = [8, 128], strides = [1, 1]} : vector<32x128xf32> to vector<8x128xf32>
    %156 = arith.addf %155, %154 : vector<8x128xf32>
    %c2_51 = arith.constant 2 : index
    %c0_52 = arith.constant 0 : index
    %c0_53 = arith.constant 0 : index
    %157 = vector.load %arg7[%c2_51, %c0_52, %c0_53] : memref<3x8x3xf32, #tpu.memory_space<vmem>>, vector<1x8x3xf32>
    %158 = vector.shape_cast %157 : vector<1x8x3xf32> to vector<8x3xf32>
    %c2_54 = arith.constant 2 : index
    %c0_55 = arith.constant 0 : index
    %c0_56 = arith.constant 0 : index
    %159 = vector.load %arg2[%c2_54, %c0_55, %c0_56] : memref<3x8x24xf32, #tpu.memory_space<vmem>>, vector<1x8x24xf32>
    %160 = vector.shape_cast %159 : vector<1x8x24xf32> to vector<8x24xf32>
    %c126_i32_57 = arith.constant 126 : i32
    %161 = tpu.dynamic_rotate %156 by %c126_i32_57 dim 1 : vector<8x128xf32>, i32 -> vector<8x128xf32>
    %c2_i32_58 = arith.constant 2 : i32
    %162 = tpu.dynamic_rotate %156 by %c2_i32_58 dim 1 : vector<8x128xf32>, i32 -> vector<8x128xf32>
    %c0_i32_59 = arith.constant 0 : i32
    %163 = vector.broadcast %c0_i32_59 : i32 to vector<1x128xi32>
    %164 = arith.cmpi eq, %38, %163 : vector<1x128xi32>
    %165 = vector.shape_cast %164 : vector<1x128xi1> to vector<1x128xi1>
    %166 = vector.broadcast %165 : vector<1x128xi1> to vector<8x128xi1>
    %167 = arith.select %166, %161, %162 : vector<8x128xi1>, vector<8x128xf32>
    %c1_i32_60 = arith.constant 1 : i32
    %168 = vector.broadcast %c1_i32_60 : i32 to vector<1x128xi32>
    %169 = arith.cmpi eq, %38, %168 : vector<1x128xi32>
    %170 = vector.shape_cast %169 : vector<1x128xi1> to vector<1x128xi1>
    %171 = vector.broadcast %170 : vector<1x128xi1> to vector<8x128xi1>
    %172 = arith.select %171, %156, %167 : vector<8x128xi1>, vector<8x128xf32>
    %c62_i32_61 = arith.constant 62 : i32
    %173 = vector.broadcast %c62_i32_61 : i32 to vector<1x128xi32>
    %174 = arith.cmpi eq, %38, %173 : vector<1x128xi32>
    %175 = vector.shape_cast %174 : vector<1x128xi1> to vector<1x128xi1>
    %176 = vector.broadcast %175 : vector<1x128xi1> to vector<8x128xi1>
    %177 = arith.select %176, %156, %161 : vector<8x128xi1>, vector<8x128xf32>
    %c63_i32_62 = arith.constant 63 : i32
    %178 = vector.broadcast %c63_i32_62 : i32 to vector<1x128xi32>
    %179 = arith.cmpi eq, %38, %178 : vector<1x128xi32>
    %180 = vector.shape_cast %179 : vector<1x128xi1> to vector<1x128xi1>
    %181 = vector.broadcast %180 : vector<1x128xi1> to vector<8x128xi1>
    %182 = arith.select %181, %162, %177 : vector<8x128xi1>, vector<8x128xf32>
    %183 = tpu.concatenate %172, %156, %182 in 0 : vector<8x128xf32>, vector<8x128xf32>, vector<8x128xf32> -> vector<24x128xf32>
    %cst_63 = arith.constant dense<0.000000e+00> : vector<8x128xf32>
    %184 = tpu.matmul %160, %183, %cst_63 {dimension_numbers = #tpu.dot_dimension_numbers<[1], [0], [0], [1], [0, 0, 1, 1], [], []>, precision = #tpu.contract_precision<fp32>} : vector<8x24xf32>, vector<24x128xf32>, vector<8x128xf32> -> vector<8x128xf32>
    %185 = vector.extract_strided_slice %158 {offsets = [0, 0], sizes = [8, 1], strides = [1, 1]} : vector<8x3xf32> to vector<8x1xf32>
    %186 = vector.broadcast %185 : vector<8x1xf32> to vector<8x128xf32>
    %187 = arith.addf %184, %186 : vector<8x128xf32>
    %cst_64 = arith.constant 0.000000e+00 : f32
    %188 = vector.broadcast %cst_64 : f32 to vector<8x128xf32>
    %189 = arith.maximumf %187, %188 : vector<8x128xf32>
    %190 = vector.extract_strided_slice %158 {offsets = [0, 1], sizes = [8, 1], strides = [1, 1]} : vector<8x3xf32> to vector<8x1xf32>
    %191 = vector.extract_strided_slice %158 {offsets = [0, 2], sizes = [8, 1], strides = [1, 1]} : vector<8x3xf32> to vector<8x1xf32>
    %cst_65 = arith.constant dense<0.000000e+00> : vector<8xf32>
    %192 = vector.multi_reduction <add>, %189, %cst_65 [1] : vector<8x128xf32> to vector<8xf32>
    %193 = vector.shape_cast %192 : vector<8xf32> to vector<8x1xf32>
    %cst_66 = arith.constant 1.280000e+02 : f32
    %194 = vector.broadcast %cst_66 : f32 to vector<8x1xf32>
    %195 = arith.divf %193, %194 : vector<8x1xf32>
    %196 = arith.mulf %189, %189 : vector<8x128xf32>
    %cst_67 = arith.constant dense<0.000000e+00> : vector<8xf32>
    %197 = vector.multi_reduction <add>, %196, %cst_67 [1] : vector<8x128xf32> to vector<8xf32>
    %198 = vector.shape_cast %197 : vector<8xf32> to vector<8x1xf32>
    %cst_68 = arith.constant 1.280000e+02 : f32
    %199 = vector.broadcast %cst_68 : f32 to vector<8x1xf32>
    %200 = arith.divf %198, %199 : vector<8x1xf32>
    %201 = arith.mulf %195, %195 : vector<8x1xf32>
    %202 = arith.subf %200, %201 : vector<8x1xf32>
    %cst_69 = arith.constant 9.99999974E-6 : f32
    %203 = vector.broadcast %cst_69 : f32 to vector<8x1xf32>
    %204 = arith.addf %202, %203 : vector<8x1xf32>
    %205 = math.rsqrt %204 : vector<8x1xf32>
    %206 = arith.mulf %190, %205 : vector<8x1xf32>
    %207 = vector.broadcast %206 : vector<8x1xf32> to vector<8x128xf32>
    %208 = arith.mulf %189, %207 : vector<8x128xf32>
    %209 = arith.mulf %195, %206 : vector<8x1xf32>
    %210 = arith.subf %191, %209 : vector<8x1xf32>
    %211 = vector.broadcast %210 : vector<8x1xf32> to vector<8x128xf32>
    %212 = arith.addf %208, %211 : vector<8x128xf32>
    %c0_70 = arith.constant 0 : index
    %c0_71 = arith.constant 0 : index
    %c0_72 = arith.constant 0 : index
    %213 = vector.load %arg3[%c0_70, %c0_71, %c0_72] : memref<4x32x8xf32, #tpu.memory_space<vmem>>, vector<1x32x8xf32>
    %214 = vector.shape_cast %213 : vector<1x32x8xf32> to vector<32x8xf32>
    %cst_73 = arith.constant dense<0.000000e+00> : vector<32x128xf32>
    %215 = tpu.matmul %214, %39, %cst_73 {dimension_numbers = #tpu.dot_dimension_numbers<[1], [0], [0], [1], [0, 0, 1, 1], [], []>, precision = #tpu.contract_precision<fp32>} : vector<32x8xf32>, vector<8x128xf32>, vector<32x128xf32> -> vector<32x128xf32>
    %c1_74 = arith.constant 1 : index
    %c0_75 = arith.constant 0 : index
    %c0_76 = arith.constant 0 : index
    %216 = vector.load %arg3[%c1_74, %c0_75, %c0_76] : memref<4x32x8xf32, #tpu.memory_space<vmem>>, vector<1x32x8xf32>
    %217 = vector.shape_cast %216 : vector<1x32x8xf32> to vector<32x8xf32>
    %cst_77 = arith.constant dense<0.000000e+00> : vector<32x128xf32>
    %218 = tpu.matmul %217, %96, %cst_77 {dimension_numbers = #tpu.dot_dimension_numbers<[1], [0], [0], [1], [0, 0, 1, 1], [], []>, precision = #tpu.contract_precision<fp32>} : vector<32x8xf32>, vector<8x128xf32>, vector<32x128xf32> -> vector<32x128xf32>
    %219 = arith.addf %215, %218 : vector<32x128xf32>
    %c2_78 = arith.constant 2 : index
    %c0_79 = arith.constant 0 : index
    %c0_80 = arith.constant 0 : index
    %220 = vector.load %arg3[%c2_78, %c0_79, %c0_80] : memref<4x32x8xf32, #tpu.memory_space<vmem>>, vector<1x32x8xf32>
    %221 = vector.shape_cast %220 : vector<1x32x8xf32> to vector<32x8xf32>
    %cst_81 = arith.constant dense<0.000000e+00> : vector<32x128xf32>
    %222 = tpu.matmul %221, %154, %cst_81 {dimension_numbers = #tpu.dot_dimension_numbers<[1], [0], [0], [1], [0, 0, 1, 1], [], []>, precision = #tpu.contract_precision<fp32>} : vector<32x8xf32>, vector<8x128xf32>, vector<32x128xf32> -> vector<32x128xf32>
    %223 = arith.addf %219, %222 : vector<32x128xf32>
    %c3_82 = arith.constant 3 : index
    %c0_83 = arith.constant 0 : index
    %c0_84 = arith.constant 0 : index
    %224 = vector.load %arg3[%c3_82, %c0_83, %c0_84] : memref<4x32x8xf32, #tpu.memory_space<vmem>>, vector<1x32x8xf32>
    %225 = vector.shape_cast %224 : vector<1x32x8xf32> to vector<32x8xf32>
    %cst_85 = arith.constant dense<0.000000e+00> : vector<32x128xf32>
    %226 = tpu.matmul %225, %212, %cst_85 {dimension_numbers = #tpu.dot_dimension_numbers<[1], [0], [0], [1], [0, 0, 1, 1], [], []>, precision = #tpu.contract_precision<fp32>} : vector<32x8xf32>, vector<8x128xf32>, vector<32x128xf32> -> vector<32x128xf32>
    %227 = arith.addf %223, %226 : vector<32x128xf32>
    %228 = vector.broadcast %4 : vector<32x1xf32> to vector<32x128xf32>
    %229 = arith.addf %227, %228 : vector<32x128xf32>
    %cst_86 = arith.constant 0.000000e+00 : f32
    %230 = vector.broadcast %cst_86 : f32 to vector<32x128xf32>
    %231 = arith.maximumf %229, %230 : vector<32x128xf32>
    %cst_87 = arith.constant dense<0.000000e+00> : vector<32xf32>
    %232 = vector.multi_reduction <add>, %231, %cst_87 [1] : vector<32x128xf32> to vector<32xf32>
    %233 = vector.shape_cast %232 : vector<32xf32> to vector<32x1xf32>
    %cst_88 = arith.constant 1.280000e+02 : f32
    %234 = vector.broadcast %cst_88 : f32 to vector<32x1xf32>
    %235 = arith.divf %233, %234 : vector<32x1xf32>
    %236 = arith.mulf %231, %231 : vector<32x128xf32>
    %cst_89 = arith.constant dense<0.000000e+00> : vector<32xf32>
    %237 = vector.multi_reduction <add>, %236, %cst_89 [1] : vector<32x128xf32> to vector<32xf32>
    %238 = vector.shape_cast %237 : vector<32xf32> to vector<32x1xf32>
    %cst_90 = arith.constant 1.280000e+02 : f32
    %239 = vector.broadcast %cst_90 : f32 to vector<32x1xf32>
    %240 = arith.divf %238, %239 : vector<32x1xf32>
    %241 = arith.mulf %235, %235 : vector<32x1xf32>
    %242 = arith.subf %240, %241 : vector<32x1xf32>
    %cst_91 = arith.constant 9.99999974E-6 : f32
    %243 = vector.broadcast %cst_91 : f32 to vector<32x1xf32>
    %244 = arith.addf %242, %243 : vector<32x1xf32>
    %245 = math.rsqrt %244 : vector<32x1xf32>
    %246 = arith.mulf %5, %245 : vector<32x1xf32>
    %247 = vector.broadcast %246 : vector<32x1xf32> to vector<32x128xf32>
    %248 = arith.mulf %231, %247 : vector<32x128xf32>
    %249 = arith.mulf %235, %246 : vector<32x1xf32>
    %250 = arith.subf %6, %249 : vector<32x1xf32>
    %251 = vector.broadcast %250 : vector<32x1xf32> to vector<32x128xf32>
    %252 = arith.addf %248, %251 : vector<32x128xf32>
    %c0_92 = arith.constant 0 : index
    %c0_93 = arith.constant 0 : index
    %253 = vector.load %arg8[%c0_92, %c0_93] : memref<128x2xf32, #tpu.memory_space<vmem>>, vector<128x2xf32>
    %cst_94 = arith.constant dense<0.000000e+00> : vector<32x2xf32>
    %254 = tpu.matmul %252, %253, %cst_94 {dimension_numbers = #tpu.dot_dimension_numbers<[1], [0], [0], [1], [0, 0, 1, 1], [], []>, precision = #tpu.contract_precision<fp32>} : vector<32x128xf32>, vector<128x2xf32>, vector<32x2xf32> -> vector<32x2xf32>
    %c0_95 = arith.constant 0 : index
    %c0_96 = arith.constant 0 : index
    %255 = vector.load %arg4[%c0_95, %c0_96] : memref<8x32xf32, #tpu.memory_space<vmem>>, vector<8x32xf32>
    %cst_97 = arith.constant dense<0.000000e+00> : vector<8x2xf32>
    %256 = tpu.matmul %255, %254, %cst_97 {dimension_numbers = #tpu.dot_dimension_numbers<[1], [0], [0], [1], [0, 0, 1, 1], [], []>, precision = #tpu.contract_precision<fp32>} : vector<8x32xf32>, vector<32x2xf32>, vector<8x2xf32> -> vector<8x2xf32>
    %257 = vector.broadcast %8 : vector<8x1xf32> to vector<8x2xf32>
    %258 = arith.addf %256, %257 : vector<8x2xf32>
    %cst_98 = arith.constant 0.000000e+00 : f32
    %259 = vector.broadcast %cst_98 : f32 to vector<8x2xf32>
    %260 = arith.maximumf %258, %259 : vector<8x2xf32>
    %c0_99 = arith.constant 0 : index
    %c0_100 = arith.constant 0 : index
    %261 = vector.load %arg5[%c0_99, %c0_100] : memref<32x8xf32, #tpu.memory_space<vmem>>, vector<32x8xf32>
    %cst_101 = arith.constant dense<0.000000e+00> : vector<32x2xf32>
    %262 = tpu.matmul %261, %260, %cst_101 {dimension_numbers = #tpu.dot_dimension_numbers<[1], [0], [0], [1], [0, 0, 1, 1], [], []>, precision = #tpu.contract_precision<fp32>} : vector<32x8xf32>, vector<8x2xf32>, vector<32x2xf32> -> vector<32x2xf32>
    %263 = vector.broadcast %7 : vector<32x1xf32> to vector<32x2xf32>
    %264 = arith.addf %262, %263 : vector<32x2xf32>
    %265 = arith.negf %264 : vector<32x2xf32>
    %266 = math.exp %265 : vector<32x2xf32>
    %cst_102 = arith.constant 1.000000e+00 : f32
    %267 = vector.broadcast %cst_102 : f32 to vector<32x2xf32>
    %268 = arith.addf %267, %266 : vector<32x2xf32>
    %269 = arith.divf %267, %268 : vector<32x2xf32>
    %270 = vector.extract_strided_slice %269 {offsets = [0, 0], sizes = [32, 1], strides = [1, 1]} : vector<32x2xf32> to vector<32x1xf32>
    %271 = vector.shape_cast %270 : vector<32x1xf32> to vector<32x1xf32>
    %272 = vector.broadcast %271 : vector<32x1xf32> to vector<32x128xf32>
    %c64_i32 = arith.constant 64 : i32
    %273 = vector.broadcast %c64_i32 : i32 to vector<1x128xi32>
    %274 = arith.cmpi sge, %36, %273 : vector<1x128xi32>
    %275 = vector.extract_strided_slice %269 {offsets = [0, 1], sizes = [32, 1], strides = [1, 1]} : vector<32x2xf32> to vector<32x1xf32>
    %276 = vector.shape_cast %274 : vector<1x128xi1> to vector<1x128xi1>
    %277 = vector.broadcast %276 : vector<1x128xi1> to vector<32x128xi1>
    %278 = vector.shape_cast %275 : vector<32x1xf32> to vector<32x1xf32>
    %279 = vector.broadcast %278 : vector<32x1xf32> to vector<32x128xf32>
    %280 = arith.select %277, %279, %272 : vector<32x128xi1>, vector<32x128xf32>
    %281 = arith.mulf %280, %252 : vector<32x128xf32>
    %282 = arith.addf %281, %0 : vector<32x128xf32>
    %c0_103 = arith.constant 0 : index
    %c0_104 = arith.constant 0 : index
    %283 = vector.load %arg9[%c0_103, %c0_104] : memref<32x128xf32, #tpu.memory_space<vmem>>, vector<32x128xf32>
    tpu.vector_store %arg9[%c0_103, %c0_104], %282 {strides = array<i32>} : memref<32x128xf32, #tpu.memory_space<vmem>>, vector<32x128xf32>,
    return
  }
}

</mosaic_0001>

<bundles_post_ra>
// kernel: se_res2net_block.1
= control target key start
LH: loop header
LB: loop body
LE: loop exit
PB: predicated region body
PF: predicated region fallthrough
CT: control target
= control target key end

     0   :  { %vm64_vm0 = vcmask 261120   ;;  %v9855_v3 = vmov 0   ;;  %s8210_s28 = smov 1   ;;  %vm8212_vm1 = vmmov 0   ;;  %s8213_s29 = smov 126   ;;  %vm846_vm2 = vcmask 195584   ;;  %s9843_s0 = inlined_call_operand.vmem [shape: f32[32,128], index: 0, kind: input, shape index: {}]   ;;  %s9844_s1 = inlined_call_operand.vmem [shape: f32[32,32], index: 1, kind: input, shape index: {}]   ;;  %s9845_s6 = inlined_call_operand.vmem [shape: f32[32,8], index: 6, kind: input, shape index: {}]   ;;  %s9846_s7 = inlined_call_operand.vmem [shape: f32[3,8,3], index: 7, kind: input, shape index: {}]   ;;  %s9847_s2 = inlined_call_operand.vmem [shape: f32[3,8,24], index: 2, kind: input, shape index: {}]   ;;  %s9848_s3 = inlined_call_operand.vmem [shape: f32[4,32,8], index: 3, kind: input, shape index: {}]   ;;  %s9849_s8 = inlined_call_operand.vmem [shape: f32[128,2], index: 8, kind: input, shape index: {}]   ;;  %s9850_s4 = inlined_call_operand.vmem [shape: f32[8,32], index: 4, kind: input, shape index: {}]   ;;  %s9851_s5 = inlined_call_operand.vmem [shape: f32[32,8], index: 5, kind: input, shape index: {}]   ;;  %s9852_s9 = inlined_call_operand.vmem [shape: f32[32,128], index: 9, kind: output, shape index: {}]  }
   0x1   :  { %v35_v0 = vld [vmem:[%s9843_s0 + $0x18] sm:$0xff]  ;;  %v34_v1 = vld [vmem:[%s9843_s0 + $0x10] sm:$0xff]  ;;  %v33_v2 = vld [vmem:[%s9843_s0 + $0x8] sm:$0xff]  ;;  %8124 = vset.pattern.permute.xlu0 %v9855_v3  ;;  %s8214_s30 = smov 2   ;;  %vm2410_vm7 = vcmask 64512  }
   0x2   :  { %v8280_v4 = vand.u32 4294901760, %v35_v0  ;;  %v8282_v5 = vand.u32 4294901760, %v34_v1  ;;  %v8284_v6 = vand.u32 4294901760, %v33_v2  ;;  %v32_v7 = vld [vmem:[%s9843_s0] sm:$0xff]  ;;  %v41_v9 = vld [vmem:[%s9844_s1 + $0x8] sm:$0xff]  ;;  %v42_v13 = vld [vmem:[%s9844_s1 + $0x10] sm:$0xff] }
   0x3   :  { %v40_v8 = vld [vmem:[%s9844_s1] sm:$0xff]  ;;  %v8295_v10 = vand.u32 4294901760, %v32_v7  ;;  %v69_v12 = vsel %vm64_vm0, %v41_v9, 0  ;;  %v43_v14 = vld [vmem:[%s9844_s1 + $0x18] sm:$0xff]  ;;  %v8308_v15 = vld [vmem:[%s9845_s6 + $0x8] sm:$0xff]  ;;  %v72_v21 = vsel %vm64_vm0, %v42_v13, 0 }
   0x4   :  { %v66_v11 = vsel %vm64_vm0, %v40_v8, 0  ;;  %7331 = vmatprep.subr.mxu0 %v8280_v4  ;;  %v212_v16 = vsub.f32 %v35_v0, %v8280_v4  ;;  %v8314_v18 = vand.u32 4294901760, %v69_v12  ;;  %v219_v19 = vsub.f32 %v34_v1, %v8282_v5  ;;  %51 = vperm.xlu0 %8124, %v8308_v15  }
   0x5   :  { %v8312_v17 = vand.u32 4294901760, %v66_v11  ;;  %7332 = vmatpush3.msra.mxu0 %v8280_v4  ;;  %v226_v20 = vsub.f32 %v33_v2, %v8284_v6  ;;  %v75_v22 = vsel %vm64_vm0, %v43_v14, 0  ;;  %v233_v23 = vsub.f32 %v32_v7, %v8295_v10 }
   0x6   :  { %7333 = vmatprep.subr.mxu0 %v8282_v5  ;;  %v8324_v24 = vand.u32 4294901760, %v212_v16  ;;  %v8330_v26 = vsub.f32 %v69_v12, %v8314_v18  ;;  %v8332_v27 = vand.u32 4294901760, %v219_v19  ;;  %v8338_v29 = vand.u32 4294901760, %v72_v21 }
   0x7   :  { %v8327_v25 = vsub.f32 %v66_v11, %v8312_v17  ;;  %7353 = vmatprep.mubr.f32.mxu1 %v8312_v17  ;;  %7334 = vmatpush3.msra.mxu0 %v8282_v5  ;;  %v8336_v28 = vand.u32 4294901760, %v226_v20  ;;  %v8340_v30 = vand.u32 4294901760, %v75_v22  ;;  %v8342_v31 = vand.u32 4294901760, %v233_v23 }
   0x8   :  { %7335 = vmatprep.subr.mxu0 %v8284_v6  ;;  %v214_v32 = vsub.f32 %v212_v16, %v8324_v24  ;;  %v158_v34 = vand.u32 4294901760, %v8330_v26  ;;  %v221_v35 = vsub.f32 %v219_v19, %v8332_v27  ;;  %v8352_v37 = vsub.f32 %v72_v21, %v8338_v29 }
   0x9   :  { %v148_v33 = vand.u32 4294901760, %v8327_v25  ;;  %7336 = vmatpush3.msra.mxu0 %v8284_v6  ;;  %v228_v36 = vsub.f32 %v226_v20, %v8336_v28  ;;  %v8355_v38 = vsub.f32 %v75_v22, %v8340_v30  ;;  %v235_v45 = vsub.f32 %v233_v23, %v8342_v31 }
   0xa   :  { %7337 = vmatprep.subr.mxu0 %v8295_v10  ;;  %v215_v39 = vand.u32 4294901760, %v214_v32  ;;  %v159_v41 = vsub.f32 %v8330_v26, %v158_v34  ;;  %v222_v42 = vand.u32 4294901760, %v221_v35  ;;  %v168_v43 = vand.u32 4294901760, %v8352_v37 }
   0xb   :  { %v149_v40 = vsub.f32 %v8327_v25, %v148_v33  ;;  %7338 = vmatpush3.msra.mxu0 %v8295_v10  ;;  %v178_v44 = vand.u32 4294901760, %v8355_v38  ;;  %v229_v48 = vand.u32 4294901760, %v228_v36  ;;  %v236_v53 = vand.u32 4294901760, %v235_v45 }
   0xc   :  { %7345 = vmatprep.subr.mxu1 %v215_v39  ;;  %v160_v47 = vand.u32 4294901760, %v159_v41  ;;  %7359 = vmatprep.subr.mxu0 %v212_v16  ;;  %v169_v49 = vsub.f32 %v8352_v37, %v168_v43  ;;  %v9857_v35 = vmov 0.0  }
   0xd   :  { %v150_v46 = vand.u32 4294901760, %v149_v40  ;;  %7346 = vmatpush3.msra.mxu1 %v215_v39  ;;  %v179_v50 = vsub.f32 %v8355_v38, %v178_v44 }
   0xe   :  { %7347 = vmatprep.subr.mxu1 %v222_v42  ;;  %v170_v51 = vand.u32 4294901760, %v169_v49 }
   0xf   :  { %7339 = vmatprep.mubr.f32.mxu0 %v150_v46  ;;  %7348 = vmatpush3.msra.mxu1 %v222_v42  ;;  %v180_v52 = vand.u32 4294901760, %v179_v50 }
  0x10   :  { %7340 = vmatmul.mubr.f32.vlgmr.msra.gmra.mxu0 %v160_v47  ;;  %7349 = vmatprep.subr.mxu1 %v229_v48 }
  0x11   :  { %7360 = vmatpush3.msra.mxu0 %v212_v16  ;;  %7342 = vmatprep.mubr.f32.mxu0 %v170_v51 }
  0x12   :  { %7361 = vmatprep.subr.mxu0 %v219_v19  ;;  %7350 = vmatpush3.msra.mxu1 %v229_v48 }
  0x13   :  { %7362 = vmatpush3.msra.mxu0 %v219_v19  ;;  %7351 = vmatprep.subr.mxu1 %v236_v53  ;;  %v8436_v19 = vld [vmem:[%s9845_s6 + $0x10] sm:$0xff] }
  0x14   :  { %7343 = vmatmul.mubr.f32.gmra.mxu0 %v180_v52  ;;  %7363 = vmatprep.subr.mxu0 %v226_v20 }
  0x15   :  { %7352 = vmatpush3.msra.mxu1 %v236_v53  ;;  %7364 = vmatpush3.msra.mxu0 %v226_v20  ;;  %v9853_v20 = vmov 1  }
  0x16   :  { %7354 = vmatmul.mubr.f32.vlgmr.msra.gmra.mxu1 %v8314_v18  ;;  %7365 = vmatprep.subr.mxu0 %v233_v23 }
  0x17   :  { %7373 = vmatprep.subr.mxu1 %v8280_v4  ;;  %7366 = vmatpush3.msra.mxu0 %v233_v23 }
  0x18   :  { %7367 = vmatprep.mubr.f32.mxu0 %v8327_v25  ;;  %7374 = vmatpush3.msra.mxu1 %v8280_v4 }
  0x19   :  { %7368 = vmatmul.mubr.f32.vlgmr.msra.gmra.mxu0 %v8330_v26  ;;  %7375 = vmatprep.subr.mxu1 %v8282_v5 }
  0x1a   :  { %7387 = vmatprep.subr.mxu0 %v8324_v24  ;;  %7356 = vmatprep.mubr.f32.mxu1 %v8338_v29 }
  0x1b   :  { %7376 = vmatpush3.msra.mxu1 %v8282_v5  ;;  %7388 = vmatpush3.msra.mxu0 %v8324_v24 }
  0x1c   :  { %7357 = vmatmul.mubr.f32.gmra.mxu1 %v8340_v30  ;;  %7377 = vmatprep.subr.mxu1 %v8284_v6 }
  0x1d   :  { %7389 = vmatprep.subr.mxu0 %v8332_v27  ;;  %7370 = vmatprep.mubr.f32.mxu0 %v8352_v37 }
  0x1e   :  { %7378 = vmatpush3.msra.mxu1 %v8284_v6  ;;  %7390 = vmatpush3.msra.mxu0 %v8332_v27 }
  0x1f   :  { %7379 = vmatprep.subr.mxu1 %v8295_v10  ;;  %7371 = vmatmul.mubr.f32.gmra.mxu0 %v8355_v38 }
  0x20   :  { %7391 = vmatprep.subr.mxu0 %v8336_v28  ;;  %7380 = vmatpush3.msra.mxu1 %v8295_v10 }
  0x21   :  { %7381 = vmatprep.mubr.f32.mxu1 %v148_v33  ;;  %7392 = vmatpush3.msra.mxu0 %v8336_v28  ;;  %v8209_v28 = vmov 2  }
  0x22   :  { %7382 = vmatmul.mubr.f32.vlgmr.msra.gmra.mxu1 %v158_v34  ;;  %7393 = vmatprep.subr.mxu0 %v8342_v31 }
  0x23   :  { %7401 = vmatprep.subr.mxu1 %v8280_v4  ;;  %7394 = vmatpush3.msra.mxu0 %v8342_v31 }
  0x24   :  { %7395 = vmatprep.mubr.f32.mxu0 %v8312_v17  ;;  %7402 = vmatpush3.msra.mxu1 %v8280_v4 }
  0x25   :  { %7396 = vmatmul.mubr.f32.vlgmr.msra.gmra.mxu0 %v8314_v18  ;;  %7403 = vmatprep.subr.mxu1 %v8282_v5 }
  0x26   :  { %7384 = vmatprep.mubr.f32.mxu1 %v168_v43  ;;  %7404 = vmatpush3.msra.mxu1 %v8282_v5 }
  0x27   :  { %7398 = vmatprep.mubr.f32.mxu0 %v8338_v29  ;;  %7385 = vmatmul.mubr.f32.gmra.mxu1 %v178_v44 }
  0x28   :  { %7405 = vmatprep.subr.mxu1 %v8284_v6  ;;  %7409 = vmatprep.mubr.f32.mxu1 %v8312_v17 }
  0x29   :  { %7406 = vmatpush3.msra.mxu1 %v8284_v6  ;;  %7399 = vmatmul.mubr.f32.gmra.mxu0 %v8340_v30 }
  0x2a   :  { %7407 = vmatprep.subr.mxu1 %v8295_v10  ;;  %8125 = vset.pattern.permute.xlu1 %v9853_v20 }
  0x2b   :  { %7408 = vmatpush3.msra.mxu1 %v8295_v10  ;;  %7415 = vmatprep.subr.mxu0 %v9857_v35 }
  0x2c   :  { %7410 = vmatmul.mubr.f32.vlgmr.msra.gmra.mxu1 %v8314_v18  ;;  %7424 = vmatprep.subr.mxu1 %v9857_v35 }
  0x2d   :  { %7412 = vmatprep.mubr.f32.mxu1 %v8338_v29  ;;  %7421 = vmatprep.mubr.msk.f32.mxu0 %vm8212_vm1, %v9857_v35 }
  0x30   :  { %7413 = vmatmul.mubr.f32.gmra.mxu1 %v8340_v30 }
  0x31   :  { %7430 = vmatprep.mubr.msk.f32.mxu1 %vm8212_vm1, %v9857_v35 }
  0x7f   :  { %v52_v61 = vpop.permute.xlu0 %51 }
  0xd0   :  { %v7341_v54 = vpop.f32.mrf.mxu0 }
  0xd1   :  { %v163_v0 = vadd.f32 %v7341_v54, %v52_v61  ;;  %v820_v54 = vld [vmem:[%s9847_s2] sm:$0xff] }
  0xd2   :  { %v8413_v55 = vpop.f32.mrf.mxu0 }
  0xd4   :  { %v8415_v56 = vpop.f32.mrf.mxu0 }
  0xd6   :  { %v8417_v57 = vpop.f32.mrf.mxu0  ;;  %v7355_v58 = vpop.f32.mrf.mxu1 }
  0xd7   :  { %v280_v4 = vadd.f32 %v7355_v58, %v163_v0  ;;  %v848_v58 = vsel %vm846_vm2, %v820_v54, 0 }
  0xd8   :  { %v8419_v59 = vpop.f32.mrf.mxu1  ;;  %v8482_v61 = vand.u32 4294901760, %v848_v58 }
  0xd9   :  { %v7369_v60 = vpop.f32.mrf.mxu0 }
  0xda   :  { %v379_v8 = vadd.f32 %v7369_v60, %v280_v4 }
  0xdb   :  { %v8423_v63 = vpop.f32.mrf.mxu0 }
  0xdc   :  { %v8421_v62 = vpop.f32.mrf.mxu1 }
  0xde   :  { %v8425_v1 = vpop.f32.mrf.mxu1 }
  0xdf   :  { %v8427_v2 = vpop.f32.mrf.mxu0 }
  0xe1   :  { %v385_v6 = vpop.f32.mrf.mxu0 }
  0xe2   :  { %v7383_v5 = vpop.f32.mrf.mxu1 }
  0xe3   :  { %v478_v9 = vadd.f32 %v7383_v5, %v379_v8 }
  0xe4   :  { %v8429_v7 = vpop.f32.mrf.mxu1 }
  0xe5   :  { %v7397_v10 = vpop.f32.mrf.mxu0 }
  0xe6   :  { %v583_v13 = vadd.f32 %v7397_v10, %v478_v9 }
  0xe7   :  { %v8431_v11 = vpop.f32.mrf.mxu1  ;;  %v8463_v42 = vpop.f32.mrf.mxu0 }
  0xe9   :  { %v485_v12 = vpop.f32.mrf.mxu1  ;;  %v8465_v44 = vpop.f32.mrf.mxu0 }
  0xeb   :  { %v588_v47 = vpop.f32.mrf.mxu0 }
  0xec   :  { %v7411_v14 = vpop.f32.mrf.mxu1 }
  0xed   :  { %v676_v16 = vadd.f32 %v7411_v14, %v583_v13 }
  0xee   :  { %v8467_v45 = vpop.f32.mrf.mxu1 }
  0xef   :  { %v692_v17 = vmax.f32 %v676_v16, 0.0 }
  0xf0   :  { %v8469_v48 = vpop.f32.mrf.mxu1 }
  0xf1   :  { %697 = vadd.xlane.f32.xlu0 %v692_v17  ;;  %v709_v18 = vmul.f32 %v692_v17, %v692_v17 }
  0xf2   :  { %v681_v50 = vpop.f32.mrf.mxu1 }
  0xf3   :  { %714 = vadd.xlane.f32.xlu1 %v709_v18 }
 0x107   :  { %56 = vperm.xlu0 %8124, %v8436_v19  }
 0x10b   :  { %8129 = vset.pattern.permute.xlu0 %v8209_v28 }
 0x17a   :  { %v698_v21 = vpop.xlane.xlu0 %697 }
 0x17b   :  { %v705_v22 = vmul.f32 0.0078125, %v698_v21 }
 0x17c   :  { %v715_v23 = vpop.xlane.xlu1 %714 }
 0x17d   :  { %v725_v24 = vmul.f32 %v705_v22, %v705_v22  ;;  %v721_v25 = vmul.f32 0.0078125, %v715_v23 }
 0x17f   :  { %v729_v26 = vsub.f32 %v721_v25, %v725_v24 }
 0x181   :  { %v733_v27 = vadd.f32 1e-05, %v729_v26 }
 0x182   :  { %v57_v39 = vpop.permute.xlu0 %56 }
 0x183   :  { %8157 = vrsqrt.f32 %v733_v27  ;;  %v173_v40 = vadd.f32 %v8417_v57, %v57_v39  ;;  %v816_v57 = vlaneseq }
 0x185   :  { %v286_v41 = vadd.f32 %v8425_v1, %v173_v40  ;;  %v8480_v60 = vand.u32 127, %v816_v57  ;;  %v8488_v1 = vsub.f32 %v848_v58, %v8482_v61 }
 0x187   :  { %v386_v43 = vadd.f32 %v385_v6, %v286_v41  ;;  %9880 = vst [vmem:[#allocation2_spill] sm:$0xff] %v8480_v60  ;;  %v8485_v0 = vand.u32 63, %v8480_v60  ;;  %v920_v6 = vand.u32 4294901760, %v8488_v1 }
 0x189   :  { %v486_v46 = vadd.f32 %v485_v12, %v386_v43  ;;  %vm833_vm3 = vcmp.eq.s32.totalorder %v8485_v0, 62  ;;  %vm825_vm4 = vcmp.eq.s32.totalorder %v8485_v0, 0  ;;  %vm837_vm5 = vcmp.eq.s32.totalorder %v8485_v0, 63 }
 0x18a   :  { %vm829_vm6 = vcmp.eq.s32.totalorder %v8485_v0, 1  ;;  %v921_v14 = vsub.f32 %v8488_v1, %v920_v6 }
 0x18b   :  { %v589_v49 = vadd.f32 %v588_v47, %v486_v46 }
 0x18c   :  { %v922_v24 = vand.u32 4294901760, %v921_v14 }
 0x18d   :  { %v682_v51 = vadd.f32 %v681_v50, %v589_v49 }
 0x18f   :  { %v8471_v52 = vmax.f32 %v682_v51, 0.0 }
 0x190   :  { %v8158_v29 = vpop.eup %8157 }
 0x191   :  { %v741_v30 = vmul.f32 %v8158_v29, %v8308_v15  ;;  %v710_v53 = vmul.f32 %v8471_v52, %v8471_v52 }
 0x193   :  { %v769_v31 = vmul.f32 %v741_v30, %v705_v22 }
 0x195   :  { %778 = vrot.lane.b32.xlu1 %v769_v31, %s8210_s28 }
 0x199   :  { %751 = vperm.xlu1 %8125, %v741_v30  }
 0x19d   :  { %8126 = vset.pattern.permute.xlu1 %v8209_v28 }
 0x207   :  { %v779_v32 = vpop.permute.xlu1 %778 }
 0x208   :  { %v789_v33 = vsub.f32 %v8308_v15, %v779_v32  ;;  %v8457_v15 = vld [vmem:[%s9846_s7] sm:$0xff] }
 0x20a   :  { %799 = vperm.xlu1 %8126, %v789_v33  }
 0x20e   :  { %8127 = vset.pattern.permute.xlu1 %v9855_v3 }
 0x214   :  { %v752_v34 = vpop.permute.xlu1 %751 }
 0x215   :  { %v765_v36 = vmul.f32 %v752_v34, %v692_v17 }
 0x285   :  { %v800_v37 = vpop.permute.xlu1 %799 }
 0x286   :  { %v813_v38 = vadd.f32 %v800_v37, %v765_v36 }
 0x288   :  { %821 = vrot.lane.b32.xlu1 %v813_v38, %s8213_s29  ;;  %v8490_v5 = vand.u32 4294901760, %v813_v38 }
 0x28a   :  { %v963_v10 = vsub.f32 %v813_v38, %v8490_v5 }
 0x28c   :  { %823 = vrot.lane.b32.xlu1 %v813_v38, %s8214_s30  ;;  %v964_v22 = vand.u32 4294901760, %v963_v10 }
 0x28e   :  { %v965_v29 = vsub.f32 %v963_v10, %v964_v22 }
 0x290   :  { %843 = vperm.xlu1 %8127, %v8457_v15   ;;  %v966_v32 = vand.u32 4294901760, %v965_v29 }
 0x294   :  { %8128 = vset.pattern.permute.xlu1 %v9853_v20 }
 0x2b4   :  { %699 = vadd.xlane.f32.xlu1 %v8471_v52 }
 0x2b8   :  { %716 = vadd.xlane.f32.xlu1 %v710_v53 }
 0x2fa   :  { %v822_v4 = vpop.permute.xlu1 %821 }
 0x2fb   :  { %v836_v8 = vsel %vm833_vm3, %v813_v38, %v822_v4 }
 0x2fe   :  { %v824_v9 = vpop.permute.xlu1 %823 }
 0x2ff   :  { %v828_v12 = vsel %vm825_vm4, %v822_v4, %v824_v9  ;;  %v840_v13 = vsel %vm837_vm5, %v824_v9, %v836_v8 }
 0x300   :  { %v832_v16 = vsel %vm829_vm6, %v813_v38, %v828_v12  ;;  %v877_v17 = vand.u32 4294901760, %v840_v13 }
 0x301   :  { %v883_v18 = vand.u32 4294901760, %v832_v16 }
 0x302   :  { %v956_v21 = vsub.f32 %v840_v13, %v877_v17  ;;  %7416 = vmatpush3.msra.mxu0 %v877_v17 }
 0x303   :  { %v970_v23 = vsub.f32 %v832_v16, %v883_v18  ;;  %7417 = vmatprep.subr.mxu0 %v9857_v35 }
 0x304   :  { %v957_v25 = vand.u32 4294901760, %v956_v21  ;;  %7418 = vmatpush3.msra.mxu0 %v8490_v5 }
 0x305   :  { %v971_v26 = vand.u32 4294901760, %v970_v23  ;;  %7419 = vmatprep.subr.mxu0 %v9857_v35 }
 0x306   :  { %v958_v27 = vsub.f32 %v956_v21, %v957_v25  ;;  %7420 = vmatpush3.msra.mxu0 %v883_v18 }
 0x307   :  { %7433 = vmatprep.subr.mxu0 %v9857_v35  ;;  %7422 = vmatmul.mubr.f32.vlgmr.msra.gmra.mxu0 %v922_v24  ;;  %v972_v31 = vsub.f32 %v970_v23, %v971_v26 }
 0x308   :  { %7434 = vmatpush3.msra.mxu0 %v956_v21  ;;  %v959_v30 = vand.u32 4294901760, %v958_v27  ;;  %7439 = vmatprep.mubr.msk.f32.mxu0 %vm8212_vm1, %v9857_v35 }
 0x309   :  { %7435 = vmatprep.subr.mxu0 %v9857_v35  ;;  %v973_v33 = vand.u32 4294901760, %v972_v31 }
 0x30a   :  { %7425 = vmatpush3.msra.mxu1 %v959_v30  ;;  %7436 = vmatpush3.msra.mxu0 %v963_v10 }
 0x30b   :  { %7426 = vmatprep.subr.mxu1 %v9857_v35  ;;  %7437 = vmatprep.subr.mxu0 %v9857_v35  ;;  %v844_v34 = vpop.permute.xlu1 %843 }
 0x30c   :  { %7427 = vmatpush3.msra.mxu1 %v966_v32  ;;  %7438 = vmatpush3.msra.mxu0 %v970_v23 }
 0x30d   :  { %7428 = vmatprep.subr.mxu1 %v9857_v35  ;;  %7451 = vmatprep.subr.mxu0 %v9857_v35 }
 0x30e   :  { %7429 = vmatpush3.msra.mxu1 %v973_v33  ;;  %7440 = vmatmul.mubr.f32.vlgmr.msra.gmra.mxu0 %v8488_v1 }
 0x30f   :  { %7452 = vmatpush3.msra.mxu0 %v957_v25  ;;  %7431 = vmatmul.mubr.f32.vlgmr.msra.gmra.mxu1 %v8482_v61 }
 0x310   :  { %7442 = vmatprep.subr.mxu1 %v9857_v35  ;;  %7453 = vmatprep.subr.mxu0 %v9857_v35 }
 0x311   :  { %7443 = vmatpush3.msra.mxu1 %v877_v17  ;;  %7454 = vmatpush3.msra.mxu0 %v964_v22 }
 0x312   :  { %7444 = vmatprep.subr.mxu1 %v9857_v35  ;;  %7455 = vmatprep.subr.mxu0 %v9857_v35 }
 0x313   :  { %7445 = vmatpush3.msra.mxu1 %v8490_v5  ;;  %7456 = vmatpush3.msra.mxu0 %v971_v26 }
 0x314   :  { %7446 = vmatprep.subr.mxu1 %v9857_v35  ;;  %7448 = vmatprep.mubr.msk.f32.mxu1 %vm8212_vm1, %v9857_v35 }
 0x315   :  { %7447 = vmatpush3.msra.mxu1 %v883_v18  ;;  %7457 = vmatprep.mubr.msk.f32.mxu0 %vm8212_vm1, %v9857_v35 }
 0x316   :  { %7449 = vmatmul.mubr.f32.vlgmr.msra.gmra.mxu1 %v920_v6  ;;  %7460 = vmatprep.subr.mxu1 %v9857_v35 }
 0x317   :  { %7461 = vmatpush3.msra.mxu1 %v877_v17  ;;  %7458 = vmatmul.mubr.f32.vlgmr.msra.gmra.mxu0 %v8482_v61 }
 0x318   :  { %7462 = vmatprep.subr.mxu1 %v9857_v35  ;;  %7466 = vmatprep.mubr.msk.f32.mxu1 %vm8212_vm1, %v9857_v35 }
 0x319   :  { %7463 = vmatpush3.msra.mxu1 %v8490_v5  ;;  %7469 = vmatprep.subr.mxu0 %v9857_v35 }
 0x31a   :  { %7464 = vmatprep.subr.mxu1 %v9857_v35  ;;  %7475 = vmatprep.mubr.msk.f32.mxu0 %vm8212_vm1, %v9857_v35 }
 0x31b   :  { %7465 = vmatpush3.msra.mxu1 %v883_v18 }
 0x31c   :  { %7467 = vmatmul.mubr.f32.vlgmr.msra.gmra.mxu1 %v8482_v61  ;;  %7478 = vmatprep.subr.mxu1 %v9857_v35 }
 0x31d   :  { %7484 = vmatprep.mubr.msk.f32.mxu1 %vm8212_vm1, %v9857_v35 }
 0x33d   :  { %v700_v37 = vpop.xlane.xlu1 %699 }
 0x33e   :  { %v706_v46 = vmul.f32 0.0078125, %v700_v37 }
 0x340   :  { %v726_v54 = vmul.f32 %v706_v46, %v706_v46 }
 0x341   :  { %v717_v41 = vpop.xlane.xlu1 %716 }
 0x342   :  { %v722_v51 = vmul.f32 0.0078125, %v717_v41 }
 0x344   :  { %v730_v57 = vsub.f32 %v722_v51, %v726_v54 }
 0x346   :  { %v734_v6 = vadd.f32 1e-05, %v730_v57 }
 0x348   :  { %8159 = vrsqrt.f32 %v734_v6 }
 0x355   :  { %v8160_v16 = vpop.eup %8159 }
 0x356   :  { %v742_v17 = vmul.f32 %v8160_v16, %v8436_v19 }
 0x358   :  { %v770_v18 = vmul.f32 %v742_v17, %v706_v46 }
 0x3c7   :  { %v924_v36 = vpop.f32.mrf.mxu0 }
 0x3c8   :  { %v925_v39 = vadd.f32 %v924_v36, %v844_v34 }
 0x3c9   :  { %v7423_v38 = vpop.f32.mrf.mxu0 }
 0x3ce   :  { %v1088_v40 = vpop.f32.mrf.mxu0 }
 0x3cf   :  { %v1010_v43 = vpop.f32.mrf.mxu1 }
 0x3d0   :  { %v1011_v47 = vadd.f32 %v1010_v43, %v925_v39  ;;  %v7441_v49 = vpop.f32.mrf.mxu0 }
 0x3d1   :  { %v7432_v50 = vpop.f32.mrf.mxu1  ;;  %v6892_v49 = vld [vmem:[%s9847_s2 + $0x8] sm:$0xff] }
 0x3d2   :  { %v1089_v53 = vadd.f32 %v1088_v40, %v1011_v47  ;;  %v1372_v50 = vsel %vm846_vm2, %v6892_v49, 0 }
 0x3d3   :  { %v8577_v51 = vand.u32 4294901760, %v1372_v50 }
 0x3d6   :  { %v1164_v58 = vpop.f32.mrf.mxu1 }
 0x3d7   :  { %v1165_v61 = vadd.f32 %v1164_v58, %v1089_v53  ;;  %v1244_v1 = vpop.f32.mrf.mxu0  ;;  %v8580_v53 = vsub.f32 %v1372_v50, %v8577_v51 }
 0x3d8   :  { %v7450_v4 = vpop.f32.mrf.mxu1 }
 0x3d9   :  { %v7459_v5 = vpop.f32.mrf.mxu0  ;;  %v1245_v8 = vadd.f32 %v1244_v1, %v1165_v61  ;;  %v1444_v57 = vand.u32 4294901760, %v8580_v53 }
 0x3dc   :  { %v1318_v9 = vpop.f32.mrf.mxu1 }
 0x3dd   :  { %v1319_v10 = vadd.f32 %v1318_v9, %v1245_v8  ;;  %v1445_v9 = vsub.f32 %v8580_v53, %v1444_v57 }
 0x3de   :  { %v7468_v12 = vpop.f32.mrf.mxu1 }
 0x3df   :  { %v1322_v13 = vmax.f32 %v1319_v10, 0.0 }
 0x3e1   :  { %1323 = vadd.xlane.f32.xlu0 %v1322_v13  ;;  %v1326_v14 = vmul.f32 %v1322_v13, %v1322_v13 }
 0x3e3   :  { %1327 = vadd.xlane.f32.xlu1 %v1326_v14 }
 0x3f4   :  { %780 = vrot.lane.b32.xlu1 %v770_v18, %s8210_s28 }
 0x3f8   :  { %756 = vperm.xlu1 %8128, %v742_v17   ;;  %v1446_v17 = vand.u32 4294901760, %v1445_v9 }
 0x46a   :  { %v1324_v21 = vpop.xlane.xlu0 %1323 }
 0x46b   :  { %v1325_v22 = vmul.f32 0.0078125, %v1324_v21 }
 0x46c   :  { %v1328_v23 = vpop.xlane.xlu1 %1327 }
 0x46d   :  { %v1330_v24 = vmul.f32 %v1325_v22, %v1325_v22  ;;  %v1329_v25 = vmul.f32 0.0078125, %v1328_v23 }
 0x46f   :  { %v1331_v26 = vsub.f32 %v1329_v25, %v1330_v24 }
 0x470   :  { %v781_v32 = vpop.permute.xlu1 %780 }
 0x471   :  { %v1332_v27 = vadd.f32 1e-05, %v1331_v26  ;;  %v790_v33 = vsub.f32 %v8436_v19, %v781_v32 }
 0x473   :  { %8161 = vrsqrt.f32 %v1332_v27 }
 0x474   :  { %v757_v37 = vpop.permute.xlu1 %756 }
 0x475   :  { %v766_v40 = vmul.f32 %v757_v37, %v8471_v52  ;;  %v8569_v52 = vld [vmem:[%s9846_s7 + $0x8] sm:$0xff] }
 0x480   :  { %v8162_v29 = vpop.eup %8161 }
 0x481   :  { %v1334_v30 = vmul.f32 %v8162_v29, %v8457_v15 }
 0x483   :  { %1337 = vperm.xlu1 %8128, %v1334_v30   ;;  %v1341_v31 = vmul.f32 %v1334_v30, %v1325_v22 }
 0x485   :  { %1343 = vrot.lane.b32.xlu0 %v1341_v31, %s8210_s28 }
 0x487   :  { %8130 = vset.pattern.permute.xlu1 %v8209_v28 }
 0x489   :  { %804 = vperm.xlu0 %8129, %v790_v33  }
 0x48d   :  { %8132 = vset.pattern.permute.xlu0 %v9855_v3 }
 0x4f7   :  { %v1344_v34 = vpop.permute.xlu0 %1343 }
 0x4f8   :  { %v1346_v36 = vsub.f32 %v8457_v15, %v1344_v34  ;;  %v8562_v15 = vld [vmem:[%s9845_s6 + $0x18] sm:$0xff] }
 0x4fa   :  { %1349 = vperm.xlu1 %8130, %v1346_v36  }
 0x4fe   :  { %8131 = vset.pattern.permute.xlu1 %v9855_v3  ;;  %v1338_v38 = vpop.permute.xlu1 %1337 }
 0x4ff   :  { %v1340_v41 = vmul.f32 %v1338_v38, %v1322_v13 }
 0x504   :  { %v805_v39 = vpop.permute.xlu0 %804 }
 0x505   :  { %v814_v46 = vadd.f32 %v805_v39, %v766_v40 }
 0x575   :  { %v1350_v43 = vpop.permute.xlu1 %1349 }
 0x576   :  { %v8554_v19 = vadd.f32 %v1350_v43, %v1340_v41 }
 0x578   :  { %v1353_v47 = vadd.f32 %v8554_v19, %v814_v46 }
 0x57a   :  { %1360 = vrot.lane.b32.xlu0 %v1353_v47, %s8214_s30  ;;  %1358 = vrot.lane.b32.xlu1 %v1353_v47, %s8213_s29  ;;  %v8582_v54 = vand.u32 4294901760, %v1353_v47 }
 0x57c   :  { %v1487_v5 = vsub.f32 %v1353_v47, %v8582_v54 }
 0x57e   :  { %61 = vperm.xlu1 %8131, %v8562_v15   ;;  %1368 = vperm.xlu0 %8132, %v8569_v52   ;;  %v1488_v16 = vand.u32 4294901760, %v1487_v5 }
 0x580   :  { %v1489_v23 = vsub.f32 %v1487_v5, %v1488_v16 }
 0x582   :  { %8133 = vset.pattern.permute.xlu1 %v9853_v20  ;;  %8134 = vset.pattern.permute.xlu0 %v8209_v28  ;;  %v1490_v27 = vand.u32 4294901760, %v1489_v23 }
 0x5ec   :  { %v1361_v58 = vpop.permute.xlu0 %1360  ;;  %v1359_v61 = vpop.permute.xlu1 %1358 }
 0x5ed   :  { %v1362_v1 = vsel %vm825_vm4, %v1359_v61, %v1361_v58  ;;  %v1364_v4 = vsel %vm833_vm3, %v1353_v47, %v1359_v61 }
 0x5ee   :  { %v1363_v6 = vsel %vm829_vm6, %v1353_v47, %v1362_v1  ;;  %v1365_v8 = vsel %vm837_vm5, %v1361_v58, %v1364_v4 }
 0x5ef   :  { %v1401_v10 = vand.u32 4294901760, %v1365_v8  ;;  %v8597_v12 = vand.u32 4294901760, %v1363_v6 }
 0x5f1   :  { %v1480_v13 = vsub.f32 %v1365_v8, %v1401_v10  ;;  %v1494_v14 = vsub.f32 %v1363_v6, %v8597_v12  ;;  %7470 = vmatpush3.msra.mxu0 %v1401_v10 }
 0x5f2   :  { %7471 = vmatprep.subr.mxu0 %v9857_v35 }
 0x5f3   :  { %v1481_v18 = vand.u32 4294901760, %v1480_v13  ;;  %v1495_v21 = vand.u32 4294901760, %v1494_v14  ;;  %7472 = vmatpush3.msra.mxu0 %v8582_v54 }
 0x5f4   :  { %7473 = vmatprep.subr.mxu0 %v9857_v35 }
 0x5f5   :  { %7474 = vmatpush3.msra.mxu0 %v8597_v12  ;;  %v1482_v22 = vsub.f32 %v1480_v13, %v1481_v18  ;;  %v1496_v25 = vsub.f32 %v1494_v14, %v1495_v21 }
 0x5f6   :  { %7487 = vmatprep.subr.mxu0 %v9857_v35  ;;  %7476 = vmatmul.mubr.f32.vlgmr.msra.gmra.mxu0 %v1446_v17 }
 0x5f7   :  { %7488 = vmatpush3.msra.mxu0 %v1480_v13  ;;  %v1483_v24 = vand.u32 4294901760, %v1482_v22  ;;  %7493 = vmatprep.mubr.msk.f32.mxu0 %vm8212_vm1, %v9857_v35  ;;  %v1497_v30 = vand.u32 4294901760, %v1496_v25 }
 0x5f8   :  { %7489 = vmatprep.subr.mxu0 %v9857_v35 }
 0x5f9   :  { %7479 = vmatpush3.msra.mxu1 %v1483_v24  ;;  %v62_v26 = vpop.permute.xlu1 %61  ;;  %7490 = vmatpush3.msra.mxu0 %v1487_v5  ;;  %v1369_v47 = vpop.permute.xlu0 %1368 }
 0x5fa   :  { %v183_v29 = vadd.f32 %v8415_v56, %v62_v26  ;;  %7480 = vmatprep.subr.mxu1 %v9857_v35  ;;  %7491 = vmatprep.subr.mxu0 %v9857_v35 }
 0x5fb   :  { %7481 = vmatpush3.msra.mxu1 %v1490_v27  ;;  %7492 = vmatpush3.msra.mxu0 %v1494_v14 }
 0x5fc   :  { %v292_v31 = vadd.f32 %v8421_v62, %v183_v29  ;;  %7482 = vmatprep.subr.mxu1 %v9857_v35  ;;  %7505 = vmatprep.subr.mxu0 %v9857_v35 }
 0x5fd   :  { %7483 = vmatpush3.msra.mxu1 %v1497_v30  ;;  %7494 = vmatmul.mubr.f32.vlgmr.msra.gmra.mxu0 %v8580_v53 }
 0x5fe   :  { %v393_v32 = vadd.f32 %v8427_v2, %v292_v31  ;;  %7506 = vmatpush3.msra.mxu0 %v1481_v18  ;;  %7485 = vmatmul.mubr.f32.vlgmr.msra.gmra.mxu1 %v8577_v51 }
 0x5ff   :  { %7496 = vmatprep.subr.mxu1 %v9857_v35  ;;  %7507 = vmatprep.subr.mxu0 %v9857_v35 }
 0x600   :  { %v494_v56 = vadd.f32 %v8431_v11, %v393_v32  ;;  %7497 = vmatpush3.msra.mxu1 %v1401_v10  ;;  %7508 = vmatpush3.msra.mxu0 %v1488_v16 }
 0x601   :  { %7498 = vmatprep.subr.mxu1 %v9857_v35  ;;  %7509 = vmatprep.subr.mxu0 %v9857_v35 }
 0x602   :  { %7499 = vmatpush3.msra.mxu1 %v8582_v54  ;;  %7510 = vmatpush3.msra.mxu0 %v1495_v21  ;;  %v595_v62 = vadd.f32 %v8465_v44, %v494_v56 }
 0x603   :  { %7500 = vmatprep.subr.mxu1 %v9857_v35  ;;  %7502 = vmatprep.mubr.msk.f32.mxu1 %vm8212_vm1, %v9857_v35 }
 0x604   :  { %7501 = vmatpush3.msra.mxu1 %v8597_v12  ;;  %7511 = vmatprep.mubr.msk.f32.mxu0 %vm8212_vm1, %v9857_v35  ;;  %v688_v2 = vadd.f32 %v8469_v48, %v595_v62 }
 0x605   :  { %7503 = vmatmul.mubr.f32.vlgmr.msra.gmra.mxu1 %v1444_v57  ;;  %7514 = vmatprep.subr.mxu1 %v9857_v35 }
 0x606   :  { %7515 = vmatpush3.msra.mxu1 %v1401_v10  ;;  %7512 = vmatmul.mubr.f32.vlgmr.msra.gmra.mxu0 %v8577_v51  ;;  %v8635_v11 = vmax.f32 %v688_v2, 0.0 }
 0x607   :  { %7516 = vmatprep.subr.mxu1 %v9857_v35  ;;  %7520 = vmatprep.mubr.msk.f32.mxu1 %vm8212_vm1, %v9857_v35 }
 0x608   :  { %7517 = vmatpush3.msra.mxu1 %v8582_v54  ;;  %701 = vadd.xlane.f32.xlu1 %v8635_v11  ;;  %v711_v44 = vmul.f32 %v8635_v11, %v8635_v11 }
 0x609   :  { %7518 = vmatprep.subr.mxu1 %v9857_v35  ;;  %7523 = vmatprep.subr.mxu0 %v9857_v35 }
 0x60a   :  { %7519 = vmatpush3.msra.mxu1 %v8597_v12  ;;  %7529 = vmatprep.mubr.msk.f32.mxu0 %vm8212_vm1, %v9857_v35 }
 0x60b   :  { %7521 = vmatmul.mubr.f32.vlgmr.msra.gmra.mxu1 %v8577_v51  ;;  %7532 = vmatprep.subr.mxu1 %v9857_v35 }
 0x60c   :  { %718 = vadd.xlane.f32.xlu1 %v711_v44  ;;  %7538 = vmatprep.mubr.msk.f32.mxu1 %vm8212_vm1, %v9857_v35 }
 0x691   :  { %v702_v48 = vpop.xlane.xlu1 %701 }
 0x692   :  { %v707_v33 = vmul.f32 0.0078125, %v702_v48 }
 0x694   :  { %v727_v36 = vmul.f32 %v707_v33, %v707_v33 }
 0x695   :  { %v719_v34 = vpop.xlane.xlu1 %718 }
 0x696   :  { %v723_v37 = vmul.f32 0.0078125, %v719_v34 }
 0x698   :  { %v731_v38 = vsub.f32 %v723_v37, %v727_v36 }
 0x69a   :  { %v735_v39 = vadd.f32 1e-05, %v731_v38  ;;  %v6894_v38 = vld [vmem:[%s9847_s2 + $0x10] sm:$0xff] }
 0x69c   :  { %8163 = vrsqrt.f32 %v735_v39  ;;  %v1896_v39 = vsel %vm846_vm2, %v6894_v38, 0 }
 0x6a9   :  { %v8164_v40 = vpop.eup %8163 }
 0x6aa   :  { %v743_v41 = vmul.f32 %v8164_v40, %v8562_v15  ;;  %v8686_v40 = vand.u32 4294901760, %v1896_v39 }
 0x6ac   :  { %v771_v43 = vmul.f32 %v743_v41, %v707_v33 }
 0x6ae   :  { %782 = vrot.lane.b32.xlu1 %v771_v43, %s8210_s28 }
 0x6b2   :  { %761 = vperm.xlu1 %8133, %v743_v41   ;;  %v8689_v41 = vsub.f32 %v1896_v39, %v8686_v40 }
 0x6b6   :  { %v1448_v46 = vpop.f32.mrf.mxu0 }
 0x6b7   :  { %v1449_v50 = vadd.f32 %v1448_v46, %v1369_v47  ;;  %v1968_v46 = vand.u32 4294901760, %v8689_v41 }
 0x6b8   :  { %v7477_v49 = vpop.f32.mrf.mxu0 }
 0x6bd   :  { %v1612_v51 = vpop.f32.mrf.mxu0 }
 0x6be   :  { %v1534_v53 = vpop.f32.mrf.mxu1 }
 0x6bf   :  { %v1535_v54 = vadd.f32 %v1534_v53, %v1449_v50  ;;  %v7495_v57 = vpop.f32.mrf.mxu0 }
 0x6c0   :  { %v7486_v58 = vpop.f32.mrf.mxu1 }
 0x6c1   :  { %v1613_v61 = vadd.f32 %v1612_v51, %v1535_v54  ;;  %v1969_v58 = vsub.f32 %v8689_v41, %v1968_v46 }
 0x6c5   :  { %v1688_v1 = vpop.f32.mrf.mxu1 }
 0x6c6   :  { %v1689_v4 = vadd.f32 %v1688_v1, %v1613_v61  ;;  %v1768_v5 = vpop.f32.mrf.mxu0  ;;  %v6895_v61 = vld [vmem:[%s9848_s3 + $0x20] sm:$0xff] }
 0x6c7   :  { %v7504_v6 = vpop.f32.mrf.mxu1 }
 0x6c8   :  { %v7513_v8 = vpop.f32.mrf.mxu0  ;;  %v1769_v9 = vadd.f32 %v1768_v5, %v1689_v4  ;;  %v6896_v5 = vld [vmem:[%s9848_s3 + $0x28] sm:$0xff] }
 0x6cb   :  { %v1842_v10 = vpop.f32.mrf.mxu1 }
 0x6cc   :  { %v1843_v12 = vadd.f32 %v1842_v10, %v1769_v9  ;;  %v2412_v9 = vsel %vm2410_vm7, %v6895_v61, 0  ;;  %v1970_v10 = vand.u32 4294901760, %v1969_v58 }
 0x6cd   :  { %v7522_v13 = vpop.f32.mrf.mxu1 }
 0x6ce   :  { %v1846_v14 = vmax.f32 %v1843_v12, 0.0  ;;  %v2415_v12 = vsel %vm2410_vm7, %v6896_v5, 0 }
 0x6d0   :  { %1847 = vadd.xlane.f32.xlu0 %v1846_v14  ;;  %v1850_v16 = vmul.f32 %v1846_v14, %v1846_v14 }
 0x6d4   :  { %1851 = vadd.xlane.f32.xlu0 %v1850_v16  ;;  %v6897_v16 = vld [vmem:[%s9848_s3 + $0x30] sm:$0xff] }
 0x720   :  { %v783_v30 = vpop.permute.xlu1 %782 }
 0x721   :  { %v791_v31 = vsub.f32 %v8562_v15, %v783_v30 }
 0x72d   :  { %v762_v62 = vpop.permute.xlu1 %761 }
 0x72e   :  { %v767_v48 = vmul.f32 %v762_v62, %v8635_v11  ;;  %v8676_v11 = vld [vmem:[%s9846_s7 + $0x10] sm:$0xff] }
 0x759   :  { %v1848_v17 = vpop.xlane.xlu0 %1847 }
 0x75a   :  { %v1849_v18 = vmul.f32 0.0078125, %v1848_v17  ;;  %v8733_v17 = vand.u32 4294901760, %v2412_v9 }
 0x75c   :  { %v1854_v22 = vmul.f32 %v1849_v18, %v1849_v18 }
 0x75d   :  { %v1852_v21 = vpop.xlane.xlu0 %1851 }
 0x75e   :  { %v1853_v23 = vmul.f32 0.0078125, %v1852_v21 }
 0x760   :  { %v1855_v24 = vsub.f32 %v1853_v23, %v1854_v22  ;;  %v8737_v22 = vand.u32 4294901760, %v2415_v12  ;;  %v6898_v23 = vld [vmem:[%s9848_s3 + $0x38] sm:$0xff] }
 0x762   :  { %v1856_v25 = vadd.f32 1e-05, %v1855_v24  ;;  %v2418_v24 = vsel %vm2410_vm7, %v6897_v16, 0 }
 0x764   :  { %8165 = vrsqrt.f32 %v1856_v25 }
 0x771   :  { %v8166_v26 = vpop.eup %8165 }
 0x772   :  { %v1858_v27 = vmul.f32 %v8166_v26, %v8569_v52 }
 0x774   :  { %1861 = vperm.xlu1 %8133, %v1858_v27   ;;  %v1865_v29 = vmul.f32 %v1858_v27, %v1849_v18  ;;  %v8749_v27 = vsub.f32 %v2412_v9, %v8733_v17 }
 0x776   :  { %1867 = vrot.lane.b32.xlu0 %v1865_v29, %s8210_s28  ;;  %v2421_v29 = vsel %vm2410_vm7, %v6898_v23, 0 }
 0x778   :  { %8135 = vset.pattern.permute.xlu1 %v8209_v28 }
 0x77a   :  { %809 = vperm.xlu0 %8134, %v791_v31  }
 0x77e   :  { %8137 = vset.pattern.permute.xlu0 %v9855_v3 }
 0x7e8   :  { %v1868_v32 = vpop.permute.xlu0 %1867 }
 0x7e9   :  { %v1870_v56 = vsub.f32 %v8569_v52, %v1868_v32  ;;  %v8671_v52 = vld [vmem:[%s9845_s6] sm:$0xff]  ;;  %v8754_v32 = vsub.f32 %v2415_v12, %v8737_v22 }
 0x7eb   :  { %1873 = vperm.xlu1 %8135, %v1870_v56   ;;  %v8756_v56 = vand.u32 4294901760, %v2418_v24 }
 0x7ef   :  { %8136 = vset.pattern.permute.xlu1 %v9855_v3  ;;  %v1862_v2 = vpop.permute.xlu1 %1861 }
 0x7f0   :  { %v1864_v33 = vmul.f32 %v1862_v2, %v1846_v14 }
 0x7f5   :  { %v810_v44 = vpop.permute.xlu0 %809 }
 0x7f6   :  { %v815_v36 = vadd.f32 %v810_v44, %v767_v48  ;;  %v8762_v44 = vand.u32 4294901760, %v2421_v29 }
 0x866   :  { %v1874_v34 = vpop.permute.xlu1 %1873 }
 0x867   :  { %v8663_v15 = vadd.f32 %v1874_v34, %v1864_v33  ;;  %v2491_v33 = vand.u32 4294901760, %v8749_v27  ;;  %v2501_v34 = vand.u32 4294901760, %v8754_v32 }
 0x869   :  { %v1877_v37 = vadd.f32 %v8663_v15, %v815_v36  ;;  %v8774_v36 = vsub.f32 %v2418_v24, %v8756_v56  ;;  %v2492_v39 = vsub.f32 %v8749_v27, %v2491_v33 }
 0x86b   :  { %1884 = vrot.lane.b32.xlu0 %v1877_v37, %s8214_s30  ;;  %1882 = vrot.lane.b32.xlu1 %v1877_v37, %s8213_s29  ;;  %v8691_v43 = vand.u32 4294901760, %v1877_v37 }
 0x86d   :  { %v8699_v53 = vsub.f32 %v1877_v37, %v8691_v43 }
 0x86f   :  { %46 = vperm.xlu1 %8136, %v8671_v52   ;;  %1892 = vperm.xlu0 %8137, %v8676_v11   ;;  %v2012_v8 = vand.u32 4294901760, %v8699_v53 }
 0x871   :  { %v2013_v21 = vsub.f32 %v8699_v53, %v2012_v8 }
 0x873   :  { %8138 = vset.pattern.permute.xlu1 %v9853_v20  ;;  %8140 = vset.pattern.permute.xlu0 %v9853_v20  ;;  %v2014_v31 = vand.u32 4294901760, %v2013_v21 }
 0x8dd   :  { %v1885_v47 = vpop.permute.xlu0 %1884  ;;  %v1883_v49 = vpop.permute.xlu1 %1882 }
 0x8de   :  { %v1886_v50 = vsel %vm825_vm4, %v1883_v49, %v1885_v47  ;;  %v1888_v51 = vsel %vm833_vm3, %v1877_v37, %v1883_v49 }
 0x8df   :  { %v1887_v54 = vsel %vm829_vm6, %v1877_v37, %v1886_v50  ;;  %v1889_v57 = vsel %vm837_vm5, %v1885_v47, %v1888_v51  ;;  %v2502_v47 = vsub.f32 %v8754_v32, %v2501_v34  ;;  %v2493_v50 = vand.u32 4294901760, %v2492_v39 }
 0x8e0   :  { %v8711_v1 = vand.u32 4294901760, %v1889_v57  ;;  %v8713_v4 = vand.u32 4294901760, %v1887_v54 }
 0x8e2   :  { %v2004_v0 = vsub.f32 %v1889_v57, %v8711_v1  ;;  %v8720_v6 = vsub.f32 %v1887_v54, %v8713_v4  ;;  %7524 = vmatpush3.msra.mxu0 %v8711_v1 }
 0x8e3   :  { %7525 = vmatprep.subr.mxu0 %v9857_v35 }
 0x8e4   :  { %v2005_v13 = vand.u32 4294901760, %v2004_v0  ;;  %v2019_v14 = vand.u32 4294901760, %v8720_v6  ;;  %7526 = vmatpush3.msra.mxu0 %v8691_v43 }
 0x8e5   :  { %7527 = vmatprep.subr.mxu0 %v9857_v35 }
 0x8e6   :  { %7528 = vmatpush3.msra.mxu0 %v8713_v4  ;;  %v2006_v18 = vsub.f32 %v2004_v0, %v2005_v13  ;;  %v2020_v26 = vsub.f32 %v8720_v6, %v2019_v14 }
 0x8e7   :  { %7541 = vmatprep.subr.mxu0 %v9857_v35  ;;  %7530 = vmatmul.mubr.f32.vlgmr.msra.gmra.mxu0 %v1970_v10 }
 0x8e8   :  { %7542 = vmatpush3.msra.mxu0 %v2004_v0  ;;  %v2007_v25 = vand.u32 4294901760, %v2006_v18  ;;  %7547 = vmatprep.mubr.msk.f32.mxu0 %vm8212_vm1, %v9857_v35  ;;  %v2021_v2 = vand.u32 4294901760, %v2020_v26 }
 0x8e9   :  { %7543 = vmatprep.subr.mxu0 %v9857_v35 }
 0x8ea   :  { %7533 = vmatpush3.msra.mxu1 %v2007_v25  ;;  %v47_v30 = vpop.permute.xlu1 %46  ;;  %7544 = vmatpush3.msra.mxu0 %v8699_v53 }
 0x8eb   :  { %v153_v62 = vadd.f32 %v8413_v55, %v47_v30  ;;  %7534 = vmatprep.subr.mxu1 %v9857_v35  ;;  %7545 = vmatprep.subr.mxu0 %v9857_v35  ;;  %v8769_v55 = vand.u32 4294901760, %v8554_v19 }
 0x8ec   :  { %7535 = vmatpush3.msra.mxu1 %v2014_v31  ;;  %7546 = vmatpush3.msra.mxu0 %v8720_v6 }
 0x8ed   :  { %v274_v48 = vadd.f32 %v8419_v59, %v153_v62  ;;  %7536 = vmatprep.subr.mxu1 %v9857_v35  ;;  %7559 = vmatprep.subr.mxu0 %v9857_v35  ;;  %v8781_v59 = vsub.f32 %v2421_v29, %v8762_v44 }
 0x8ee   :  { %7537 = vmatpush3.msra.mxu1 %v2021_v2  ;;  %7548 = vmatmul.mubr.f32.vlgmr.msra.gmra.mxu0 %v8689_v41 }
 0x8ef   :  { %v372_v37 = vadd.f32 %v8423_v63, %v274_v48  ;;  %7560 = vmatpush3.msra.mxu0 %v2005_v13  ;;  %7539 = vmatmul.mubr.f32.vlgmr.msra.gmra.mxu1 %v8686_v40  ;;  %v2561_v63 = vsub.f32 %v8554_v19, %v8769_v55  ;;  %v2521_v19 = vand.u32 4294901760, %v8781_v59 }
 0x8f0   :  { %7550 = vmatprep.subr.mxu1 %v9857_v35  ;;  %7561 = vmatprep.subr.mxu0 %v9857_v35 }
 0x8f1   :  { %v470_v38 = vadd.f32 %v8429_v7, %v372_v37  ;;  %7551 = vmatpush3.msra.mxu1 %v8711_v1  ;;  %7562 = vmatpush3.msra.mxu0 %v2012_v8  ;;  %v2511_v7 = vand.u32 4294901760, %v8774_v36  ;;  %v2562_v53 = vand.u32 4294901760, %v2561_v63 }
 0x8f2   :  { %7552 = vmatprep.subr.mxu1 %v9857_v35  ;;  %7563 = vmatprep.subr.mxu0 %v9857_v35 }
 0x8f3   :  { %7553 = vmatpush3.msra.mxu1 %v8691_v43  ;;  %7564 = vmatpush3.msra.mxu0 %v2019_v14  ;;  %v577_v49 = vadd.f32 %v8463_v42, %v470_v38  ;;  %v2503_v42 = vand.u32 4294901760, %v2502_v47  ;;  %v2512_v54 = vsub.f32 %v8774_v36, %v2511_v7  ;;  %v2563_v61 = vsub.f32 %v2561_v63, %v2562_v53 }
 0x8f4   :  { %7565 = vmatprep.mubr.msk.f32.mxu0 %vm8212_vm1, %v9857_v35  ;;  %7554 = vmatprep.subr.mxu1 %v9857_v35 }
 0x8f5   :  { %7566 = vmatmul.mubr.f32.vlgmr.msra.gmra.mxu0 %v8686_v40  ;;  %7577 = vmatprep.subr.mxu0 %v8769_v55  ;;  %v670_v51 = vadd.f32 %v8467_v45, %v577_v49  ;;  %v2522_v45 = vsub.f32 %v8781_v59, %v2521_v19  ;;  %v2513_v58 = vand.u32 4294901760, %v2512_v54 }
 0x8f6   :  { %7555 = vmatpush3.msra.mxu1 %v8713_v4  ;;  %7556 = vmatprep.mubr.msk.f32.mxu1 %vm8212_vm1, %v9857_v35 }
 0x8f7   :  { %7578 = vmatpush3.msra.mxu0 %v8769_v55  ;;  %7557 = vmatmul.mubr.f32.vlgmr.msra.gmra.mxu1 %v1968_v46  ;;  %v8812_v57 = vmax.f32 %v670_v51, 0.0  ;;  %v2523_v46 = vand.u32 4294901760, %v2522_v45  ;;  %v2402_v45 = vld [vmem:[%s9848_s3 + $0x8] sm:$0xff] }
 0x8f8   :  { %7568 = vmatprep.subr.mxu1 %v9857_v35  ;;  %7593 = vmatprep.subr.mxu0 %v2561_v63 }
 0x8f9   :  { %7569 = vmatpush3.msra.mxu1 %v8711_v1  ;;  %7579 = vmatprep.mubr.f32.mxu0 %v2493_v50  ;;  %v708_v41 = vmul.f32 %v8812_v57, %v8812_v57  ;;  %v2564_v1 = vand.u32 4294901760, %v2563_v61  ;;  %v3002_v61 = vsel %vm2410_vm7, %v2402_v45, 0 }
 0x8fa   :  { %7570 = vmatprep.subr.mxu1 %v9857_v35  ;;  %7580 = vmatmul.mubr.f32.vlgmr.msra.gmra.mxu0 %v2503_v42 }
 0x8fb   :  { %7594 = vmatpush3.msra.mxu0 %v2561_v63  ;;  %7571 = vmatpush3.msra.mxu1 %v8691_v43 }
 0x8fc   :  { %7609 = vmatprep.subr.mxu0 %v2562_v53  ;;  %695 = vadd.xlane.f32.xlu1 %v8812_v57 }
 0x8fd   :  { %7572 = vmatprep.subr.mxu1 %v9857_v35  ;;  %7574 = vmatprep.mubr.msk.f32.mxu1 %vm8212_vm1, %v9857_v35 }
 0x8fe   :  { %7573 = vmatpush3.msra.mxu1 %v8713_v4  ;;  %7582 = vmatprep.mubr.f32.mxu0 %v2513_v58  ;;  %v1893_v4 = vpop.permute.xlu0 %1892  ;;  %v2403_v58 = vld [vmem:[%s9848_s3 + $0x10] sm:$0xff] }
 0x8ff   :  { %712 = vadd.xlane.f32.xlu0 %v708_v41  ;;  %7575 = vmatmul.mubr.f32.vlgmr.msra.gmra.mxu1 %v8686_v40  ;;  %v3005_v41 = vsel %vm2410_vm7, %v2403_v58, 0 }
 0x900   :  { %7583 = vmatmul.mubr.f32.gmra.mxu0 %v2523_v46  ;;  %7585 = vmatprep.subr.mxu1 %v2564_v1  ;;  %v2404_v46 = vld [vmem:[%s9848_s3 + $0x18] sm:$0xff] }
 0x901   :  { %7586 = vmatpush3.msra.mxu1 %v2564_v1  ;;  %7587 = vmatprep.mubr.f32.mxu1 %v8733_v17  ;;  %v8887_v1 = vand.u32 4294901760, %v3002_v61 }
 0x902   :  { %7601 = vmatprep.subr.mxu1 %v8769_v55  ;;  %7595 = vmatprep.mubr.f32.mxu0 %v8749_v27 }
 0x903   :  { %7588 = vmatmul.mubr.f32.vlgmr.msra.gmra.mxu1 %v8737_v22 }
 0x904   :  { %7596 = vmatmul.mubr.f32.vlgmr.msra.gmra.mxu0 %v8754_v32  ;;  %7602 = vmatpush3.msra.mxu1 %v8769_v55 }
 0x905   :  { %7610 = vmatpush3.msra.mxu0 %v2562_v53  ;;  %7617 = vmatprep.subr.mxu1 %v8769_v55 }
 0x906   :  { %7590 = vmatprep.mubr.f32.mxu1 %v8756_v56  ;;  %7598 = vmatprep.mubr.f32.mxu0 %v8774_v36 }
 0x907   :  { %7591 = vmatmul.mubr.f32.gmra.mxu1 %v8762_v44 }
 0x908   :  { %7603 = vmatprep.mubr.f32.mxu1 %v2491_v33  ;;  %7599 = vmatmul.mubr.f32.gmra.mxu0 %v8781_v59  ;;  %v2401_v33 = vld [vmem:[%s9848_s3] sm:$0xff] }
 0x909   :  { %7611 = vmatprep.mubr.f32.mxu0 %v8733_v17 }
 0x90b   :  { %7604 = vmatmul.mubr.f32.vlgmr.msra.gmra.mxu1 %v2501_v34 }
 0x90c   :  { %7618 = vmatpush3.msra.mxu1 %v8769_v55  ;;  %7612 = vmatmul.mubr.f32.vlgmr.msra.gmra.mxu0 %v8737_v22  ;;  %v2999_v55 = vsel %vm2410_vm7, %v2401_v33, 0 }
 0x90d   :  { %7606 = vmatprep.mubr.f32.mxu1 %v2511_v7  ;;  %7614 = vmatprep.mubr.f32.mxu0 %v8756_v56  ;;  %v8863_v36 = vand.u32 4294901760, %v2999_v55 }
 0x90f   :  { %7607 = vmatmul.mubr.f32.gmra.mxu1 %v2521_v19  ;;  %v8866_v38 = vsub.f32 %v2999_v55, %v8863_v36 }
 0x910   :  { %7615 = vmatmul.mubr.f32.gmra.mxu0 %v8762_v44  ;;  %7619 = vmatprep.mubr.f32.mxu1 %v8733_v17 }
 0x913   :  { %7620 = vmatmul.mubr.f32.vlgmr.msra.gmra.mxu1 %v8737_v22 }
 0x914   :  { %7622 = vmatprep.mubr.f32.mxu1 %v8756_v56 }
 0x917   :  { %7623 = vmatmul.mubr.f32.gmra.mxu1 %v8762_v44 }
 0x918   :  { %7635 = vmatprep.mubr.f32.mxu1 %v8863_v36 }
 0x985   :  { %v696_v5 = vpop.xlane.xlu1 %695 }
 0x986   :  { %v704_v8 = vmul.f32 0.0078125, %v696_v5 }
 0x988   :  { %v713_v10 = vpop.xlane.xlu0 %712  ;;  %v724_v16 = vmul.f32 %v704_v8, %v704_v8 }
 0x989   :  { %v720_v17 = vmul.f32 0.0078125, %v713_v10 }
 0x98b   :  { %v728_v22 = vsub.f32 %v720_v17, %v724_v16 }
 0x98d   :  { %v732_v27 = vadd.f32 1e-05, %v728_v22 }
 0x98f   :  { %8167 = vrsqrt.f32 %v732_v27  ;;  %v6900_v27 = vld [vmem:[%s9848_s3 + $0x48] sm:$0xff] }
 0x99c   :  { %v8168_v2 = vpop.eup %8167 }
 0x99d   :  { %v740_v44 = vmul.f32 %v8168_v2, %v8671_v52  ;;  %v3594_v2 = vsel %vm2410_vm7, %v6900_v27, 0 }
 0x99f   :  { %v768_v48 = vmul.f32 %v740_v44, %v704_v8 }
 0x9a7   :  { %v1972_v40 = vpop.f32.mrf.mxu0 }
 0x9a8   :  { %v1973_v0 = vadd.f32 %v1972_v40, %v1893_v4  ;;  %v8889_v40 = vand.u32 4294901760, %v3005_v41  ;;  %v8893_v4 = vsub.f32 %v3002_v61, %v8887_v1 }
 0x9a9   :  { %v7531_v43 = vpop.f32.mrf.mxu0 }
 0x9aa   :  { %v3008_v43 = vsel %vm2410_vm7, %v2404_v46, 0 }
 0x9ab   :  { %v8895_v5 = vand.u32 4294901760, %v3008_v43 }
 0x9ad   :  { %v8902_v8 = vsub.f32 %v3008_v43, %v8895_v5 }
 0x9ae   :  { %v2136_v6 = vpop.f32.mrf.mxu0 }
 0x9af   :  { %v2058_v9 = vpop.f32.mrf.mxu1 }
 0x9b0   :  { %v7549_v12 = vpop.f32.mrf.mxu0  ;;  %v2059_v14 = vadd.f32 %v2058_v9, %v1973_v0  ;;  %v8898_v0 = vsub.f32 %v3005_v41, %v8889_v40 }
 0x9b1   :  { %v7540_v13 = vpop.f32.mrf.mxu1 }
 0x9b2   :  { %v2137_v21 = vadd.f32 %v2136_v6, %v2059_v14  ;;  %v3088_v6 = vand.u32 4294901760, %v8893_v4  ;;  %v3098_v10 = vand.u32 4294901760, %v8898_v0  ;;  %v3108_v14 = vand.u32 4294901760, %v8902_v8 }
 0x9b4   :  { %v3089_v13 = vsub.f32 %v8893_v4, %v3088_v6  ;;  %v3099_v17 = vsub.f32 %v8898_v0, %v3098_v10 }
 0x9b5   :  { %v2292_v18 = vpop.f32.mrf.mxu0 }
 0x9b6   :  { %v3090_v22 = vand.u32 4294901760, %v3089_v13 }
 0x9b7   :  { %v2212_v23 = vpop.f32.mrf.mxu1  ;;  %v7567_v24 = vpop.f32.mrf.mxu0 }
 0x9b8   :  { %v2213_v26 = vadd.f32 %v2212_v23, %v2137_v21  ;;  %v3109_v23 = vsub.f32 %v8902_v8, %v3108_v14  ;;  %v3100_v24 = vand.u32 4294901760, %v3099_v17 }
 0x9b9   :  { %v7558_v25 = vpop.f32.mrf.mxu1 }
 0x9ba   :  { %v2293_v29 = vadd.f32 %v2292_v18, %v2213_v26 }
 0x9bf   :  { %v2366_v30 = vpop.f32.mrf.mxu1 }
 0x9c0   :  { %v2367_v31 = vadd.f32 %v2366_v30, %v2293_v29  ;;  %v8924_v29 = vand.u32 4294901760, %v8663_v15 }
 0x9c1   :  { %v7576_v32 = vpop.f32.mrf.mxu1 }
 0x9c2   :  { %v8851_v56 = vmax.f32 %v2367_v31, 0.0  ;;  %v3110_v31 = vand.u32 4294901760, %v3109_v23  ;;  %v3740_v33 = vsub.f32 %v8663_v15, %v8924_v29 }
 0x9c4   :  { %2371 = vadd.xlane.f32.xlu1 %v8851_v56  ;;  %v2374_v62 = vmul.f32 %v8851_v56, %v8851_v56  ;;  %v3741_v15 = vand.u32 4294901760, %v3740_v33 }
 0x9c6   :  { %2375 = vadd.xlane.f32.xlu0 %v2374_v62 }
 0x9d5   :  { %776 = vrot.lane.b32.xlu1 %v768_v48, %s8210_s28  ;;  %v6902_v48 = vld [vmem:[%s9848_s3 + $0x58] sm:$0xff] }
 0x9d9   :  { %746 = vperm.xlu1 %8138, %v740_v44   ;;  %v6901_v44 = vld [vmem:[%s9848_s3 + $0x50] sm:$0xff] }
 0x9dd   :  { %8139 = vset.pattern.permute.xlu1 %v8209_v28  ;;  %v3078_v28 = vand.u32 4294901760, %v8866_v38 }
 0x9df   :  { %v3079_v19 = vsub.f32 %v8866_v38, %v3078_v28 }
 0x9e1   :  { %v3080_v51 = vand.u32 4294901760, %v3079_v19 }
 0x9e3   :  { %7627 = vmatprep.mubr.f32.mxu0 %v3080_v51 }
 0xa4d   :  { %v2372_v34 = vpop.xlane.xlu1 %2371 }
 0xa4e   :  { %v2373_v37 = vmul.f32 0.0078125, %v2372_v34 }
 0xa4f   :  { %v2376_v59 = vpop.xlane.xlu0 %2375 }
 0xa50   :  { %v2378_v39 = vmul.f32 %v2373_v37, %v2373_v37  ;;  %v2377_v63 = vmul.f32 0.0078125, %v2376_v59  ;;  %v8939_v59 = vand.u32 4294901760, %v3594_v2 }
 0xa51   :  { %v777_v47 = vpop.permute.xlu1 %776 }
 0xa52   :  { %v2379_v7 = vsub.f32 %v2377_v63, %v2378_v39  ;;  %v788_v49 = vsub.f32 %v8671_v52, %v777_v47  ;;  %v3597_v39 = vsel %vm2410_vm7, %v6901_v44, 0  ;;  %v3600_v47 = vsel %vm2410_vm7, %v6902_v48, 0 }
 0xa54   :  { %v2380_v50 = vadd.f32 1e-05, %v2379_v7  ;;  %794 = vperm.xlu1 %8139, %v788_v49   ;;  %v8951_v7 = vsub.f32 %v3594_v2, %v8939_v59  ;;  %v8953_v49 = vand.u32 4294901760, %v3600_v47 }
 0xa55   :  { %v747_v9 = vpop.permute.xlu1 %746 }
 0xa56   :  { %8169 = vrsqrt.f32 %v2380_v50  ;;  %v764_v12 = vmul.f32 %v747_v9, %v8812_v57  ;;  %v6899_v57 = vld [vmem:[%s9848_s3 + $0x40] sm:$0xff]  ;;  %v3742_v50 = vsub.f32 %v3740_v33, %v3741_v15  ;;  %v7589_v9 = vpop.f32.mrf.mxu1 }
 0xa57   :  { %v3591_v26 = vsel %vm2410_vm7, %v6899_v57, 0 }
 0xa58   :  { %v8926_v62 = vand.u32 4294901760, %v3591_v26  ;;  %v3743_v45 = vand.u32 4294901760, %v3742_v50 }
 0xa5a   :  { %v8943_v63 = vsub.f32 %v3591_v26, %v8926_v62 }
 0xa5c   :  { %v3670_v19 = vand.u32 4294901760, %v8943_v63 }
 0xa63   :  { %v8170_v42 = vpop.eup %8169 }
 0xa64   :  { %v2382_v53 = vmul.f32 %v8170_v42, %v8676_v11  ;;  %v3680_v42 = vand.u32 4294901760, %v8951_v7 }
 0xa66   :  { %v2389_v54 = vmul.f32 %v2382_v53, %v2373_v37 }
 0xa68   :  { %2391 = vrot.lane.b32.xlu0 %v2389_v54, %s8210_s28  ;;  %v3671_v54 = vsub.f32 %v8943_v63, %v3670_v19 }
 0xa6a   :  { %v3672_v61 = vand.u32 4294901760, %v3671_v54 }
 0xa6c   :  { %2385 = vperm.xlu0 %8140, %v2382_v53   ;;  %v8968_v53 = vsub.f32 %v3600_v47, %v8953_v49 }
 0xacf   :  { %v795_v16 = vpop.permute.xlu1 %794 }
 0xad0   :  { %v812_v18 = vadd.f32 %v795_v16, %v764_v12  ;;  %v8215_v12 = vmov 3   ;;  %v2601_v16 = vpop.f32.mrf.mxu1 }
 0xad1   :  { %8142 = vset.pattern.permute.xlu0 %v8215_v12 }
 0xad2   :  { %v3041_v21 = vand.u32 4294901760, %v812_v18 }
 0xad4   :  { %v3148_v25 = vsub.f32 %v812_v18, %v3041_v21  ;;  %7625 = vmatprep.subr.mxu0 %v3041_v21  ;;  %v9030_v18 = vld [vmem:[%s9845_s6 + $0x8] sm:$0xff] }
 0xad5   :  { %7626 = vmatpush3.msra.mxu0 %v3041_v21  ;;  %9881 = vst [vmem:[#allocation3_spill] sm:$0xff] %v9030_v18  ;;  %4782 = vperm.xlu0 %8142, %v9030_v18  }
 0xad6   :  { %7628 = vmatmul.mubr.f32.vlgmr.msra.gmra.mxu0 %v3090_v22  ;;  %7641 = vmatprep.subr.mxu0 %v3148_v25  ;;  %v3149_v30 = vand.u32 4294901760, %v3148_v25  ;;  %v7592_v22 = vpop.f32.mrf.mxu1 }
 0xad7   :  { %7642 = vmatpush3.msra.mxu0 %v3148_v25  ;;  %7630 = vmatprep.mubr.f32.mxu0 %v3100_v24 }
 0xad8   :  { %7657 = vmatprep.subr.mxu0 %v3149_v30  ;;  %v3150_v32 = vsub.f32 %v3148_v25, %v3149_v30  ;;  %v2613_v24 = vpop.f32.mrf.mxu1  ;;  %v9039_v25 = vld [vmem:[%s9845_s6 + $0x10] sm:$0xff] }
 0xad9   :  { %9882 = vst [vmem:[#allocation4_spill] sm:$0xff] %v9039_v25 }
 0xada   :  { %7631 = vmatmul.mubr.f32.gmra.mxu0 %v3110_v31  ;;  %v2392_v55 = vpop.permute.xlu0 %2391  ;;  %v3151_v34 = vand.u32 4294901760, %v3150_v32  ;;  %v9059_v32 = vld [vmem:[%s9845_s6 + $0x18] sm:$0xff] }
 0xadb   :  { %v2394_v37 = vsub.f32 %v8676_v11, %v2392_v55  ;;  %7643 = vmatprep.mubr.f32.mxu0 %v8866_v38  ;;  %v8948_v11 = vand.u32 4294901760, %v3597_v39  ;;  %v3681_v38 = vsub.f32 %v8951_v7, %v3680_v42  ;;  %9883 = vst [vmem:[#allocation5_spill] sm:$0xff] %v9059_v32 }
 0xadc   :  { %7633 = vmatprep.subr.mxu1 %v3151_v34 }
 0xadd   :  { %7634 = vmatpush3.msra.mxu1 %v3151_v34  ;;  %2397 = vperm.xlu1 %8139, %v2394_v37   ;;  %v8961_v51 = vsub.f32 %v3597_v39, %v8948_v11  ;;  %v3682_v46 = vand.u32 4294901760, %v3681_v38 }
 0xade   :  { %7636 = vmatmul.mubr.f32.vlgmr.msra.gmra.mxu1 %v8887_v1  ;;  %7644 = vmatmul.mubr.f32.vlgmr.msra.gmra.mxu0 %v8893_v4  ;;  %v6903_v4 = vld [vmem:[%s9848_s3 + $0x60] sm:$0xff] }
 0xadf   :  { %7649 = vmatprep.subr.mxu1 %v3041_v21  ;;  %7658 = vmatpush3.msra.mxu0 %v3149_v30  ;;  %v3690_v58 = vand.u32 4294901760, %v8961_v51 }
 0xae0   :  { %7650 = vmatpush3.msra.mxu1 %v3041_v21  ;;  %7673 = vmatprep.subr.mxu0 %v8924_v29 }
 0xae1   :  { %7665 = vmatprep.subr.mxu1 %v3041_v21  ;;  %7638 = vmatprep.mubr.f32.mxu1 %v8889_v40  ;;  %v3691_v41 = vsub.f32 %v8961_v51, %v3690_v58 }
 0xae2   :  { %7646 = vmatprep.mubr.f32.mxu0 %v8898_v0  ;;  %7639 = vmatmul.mubr.f32.gmra.mxu1 %v8895_v5 }
 0xae3   :  { %7647 = vmatmul.mubr.f32.gmra.mxu0 %v8902_v8  ;;  %7651 = vmatprep.mubr.f32.mxu1 %v3078_v28  ;;  %v3700_v28 = vand.u32 4294901760, %v8968_v53  ;;  %v3692_v0 = vand.u32 4294901760, %v3691_v41 }
 0xae4   :  { %7659 = vmatprep.mubr.f32.mxu0 %v8863_v36  ;;  %8141 = vset.pattern.permute.xlu1 %v8215_v12 }
 0xae5   :  { %v3701_v43 = vsub.f32 %v8968_v53, %v3700_v28  ;;  %4778 = vperm.xlu1 %8141, %v8671_v52  }
 0xae6   :  { %7652 = vmatmul.mubr.f32.vlgmr.msra.gmra.mxu1 %v3088_v6  ;;  %v4187_v6 = vsel %vm2410_vm7, %v6903_v4, 0 }
 0xae7   :  { %7660 = vmatmul.mubr.f32.vlgmr.msra.gmra.mxu0 %v8887_v1  ;;  %7666 = vmatpush3.msra.mxu1 %v3041_v21  ;;  %v3702_v8 = vand.u32 4294901760, %v3701_v43  ;;  %v2386_v41 = vpop.permute.xlu0 %2385 }
 0xae8   :  { %7674 = vmatpush3.msra.mxu0 %v8924_v29  ;;  %7681 = vmatprep.subr.mxu1 %v3743_v45  ;;  %v2388_v43 = vmul.f32 %v2386_v41, %v8851_v56 }
 0xae9   :  { %7689 = vmatprep.subr.mxu0 %v3740_v33  ;;  %7654 = vmatprep.mubr.f32.mxu1 %v3098_v10 }
 0xaea   :  { %7662 = vmatprep.mubr.f32.mxu0 %v8889_v40  ;;  %7655 = vmatmul.mubr.f32.gmra.mxu1 %v3108_v14 }
 0xaeb   :  { %7663 = vmatmul.mubr.f32.gmra.mxu0 %v8895_v5  ;;  %7667 = vmatprep.mubr.f32.mxu1 %v8863_v36  ;;  %v8999_v36 = vand.u32 4294901760, %v4187_v6 }
 0xaec   :  { %7675 = vmatprep.mubr.f32.mxu0 %v3672_v61  ;;  %4786 = vperm.xlu1 %8141, %v9039_v25  }
 0xaee   :  { %7668 = vmatmul.mubr.f32.vlgmr.msra.gmra.mxu1 %v8887_v1  ;;  %v9005_v1 = vsub.f32 %v4187_v6, %v8999_v36 }
 0xaef   :  { %7676 = vmatmul.mubr.f32.vlgmr.msra.gmra.mxu0 %v3682_v46  ;;  %7682 = vmatpush3.msra.mxu1 %v3743_v45 }
 0xaf0   :  { %7690 = vmatpush3.msra.mxu0 %v3740_v33  ;;  %7697 = vmatprep.subr.mxu1 %v8924_v29 }
 0xaf1   :  { %7705 = vmatprep.subr.mxu0 %v3741_v15  ;;  %7670 = vmatprep.mubr.f32.mxu1 %v8889_v40  ;;  %v4266_v40 = vand.u32 4294901760, %v9005_v1 }
 0xaf2   :  { %7678 = vmatprep.mubr.f32.mxu0 %v3692_v0  ;;  %7671 = vmatmul.mubr.f32.gmra.mxu1 %v8895_v5  ;;  %v7581_v5 = vpop.f32.mrf.mxu0 }
 0xaf3   :  { %7679 = vmatmul.mubr.f32.gmra.mxu0 %v3702_v8  ;;  %7683 = vmatprep.mubr.f32.mxu1 %v8926_v62  ;;  %v9017_v10 = vadd.f32 %v7589_v9, %v7581_v5  ;;  %v4267_v13 = vsub.f32 %v9005_v1, %v4266_v40 }
 0xaf4   :  { %7691 = vmatprep.mubr.f32.mxu0 %v8943_v63  ;;  %v2495_v14 = vpop.f32.mrf.mxu0  ;;  %4790 = vperm.xlu1 %8141, %v9059_v32  }
 0xaf5   :  { %v9025_v17 = vadd.f32 %v2601_v16, %v2495_v14  ;;  %v4268_v23 = vand.u32 4294901760, %v4267_v13 }
 0xaf6   :  { %7684 = vmatmul.mubr.f32.vlgmr.msra.gmra.mxu1 %v8939_v59  ;;  %v7584_v21 = vpop.f32.mrf.mxu0 }
 0xaf7   :  { %7692 = vmatmul.mubr.f32.vlgmr.msra.gmra.mxu0 %v8951_v7  ;;  %7698 = vmatpush3.msra.mxu1 %v8924_v29  ;;  %v2620_v52 = vadd.f32 %v7592_v22, %v7584_v21  ;;  %v6904_v7 = vld [vmem:[%s9848_s3 + $0x68] sm:$0xff] }
 0xaf8   :  { %7706 = vmatpush3.msra.mxu0 %v3741_v15  ;;  %7713 = vmatprep.subr.mxu1 %v8924_v29  ;;  %v2515_v57 = vpop.f32.mrf.mxu0 }
 0xaf9   :  { %7686 = vmatprep.mubr.f32.mxu1 %v8948_v11  ;;  %7694 = vmatprep.mubr.f32.mxu0 %v8961_v51  ;;  %v9044_v26 = vadd.f32 %v2613_v24, %v2515_v57  ;;  %v6906_v51 = vld [vmem:[%s9848_s3 + $0x78] sm:$0xff] }
 0xafa   :  { %7687 = vmatmul.mubr.f32.gmra.mxu1 %v8953_v49  ;;  %v9047_v27 = vpop.f32.mrf.mxu0  ;;  %v4196_v54 = vsel %vm2410_vm7, %v6906_v51, 0 }
 0xafb   :  { %7699 = vmatprep.mubr.f32.mxu1 %v3670_v19  ;;  %7695 = vmatmul.mubr.f32.gmra.mxu0 %v8968_v53  ;;  %v4190_v19 = vsel %vm2410_vm7, %v6904_v7, 0 }
 0xafc   :  { %7707 = vmatprep.mubr.f32.mxu0 %v8926_v62  ;;  %v9052_v30 = vpop.f32.mrf.mxu0 }
 0xafe   :  { %7700 = vmatmul.mubr.f32.vlgmr.msra.gmra.mxu1 %v3680_v42  ;;  %v4274_v42 = vand.u32 4294901760, %v4190_v19 }
 0xaff   :  { %7714 = vmatpush3.msra.mxu1 %v8924_v29  ;;  %7702 = vmatprep.mubr.f32.mxu1 %v3690_v58  ;;  %v9049_v29 = vpop.f32.mrf.mxu1  ;;  %v4294_v58 = vand.u32 4294901760, %v4196_v54 }
 0xb00   :  { %7708 = vmatmul.mubr.f32.vlgmr.msra.gmra.mxu0 %v8939_v59  ;;  %v4275_v45 = vsub.f32 %v4190_v19, %v4274_v42 }
 0xb01   :  { %7710 = vmatprep.mubr.f32.mxu0 %v8948_v11  ;;  %v9054_v31 = vpop.f32.mrf.mxu1  ;;  %v4295_v61 = vsub.f32 %v4196_v54, %v4294_v58 }
 0xb02   :  { %7703 = vmatmul.mubr.f32.gmra.mxu1 %v3700_v28  ;;  %v4276_v28 = vand.u32 4294901760, %v4275_v45 }
 0xb03   :  { %7715 = vmatprep.mubr.f32.mxu1 %v8926_v62  ;;  %v7600_v62 = vpop.f32.mrf.mxu0  ;;  %v7608_v2 = vpop.f32.mrf.mxu1  ;;  %v4296_v0 = vand.u32 4294901760, %v4295_v61 }
 0xb04   :  { %7711 = vmatmul.mubr.f32.gmra.mxu0 %v8953_v49  ;;  %v2715_v44 = vadd.f32 %v7600_v62, %v2620_v52  ;;  %v4277_v4 = vsub.f32 %v4275_v45, %v4276_v28 }
 0xb05   :  { %7723 = vmatprep.mubr.f32.mxu0 %v4268_v23  ;;  %v9064_v48 = vpop.f32.mrf.mxu0  ;;  %v9066_v33 = vpop.f32.mrf.mxu1  ;;  %v4297_v13 = vsub.f32 %v4295_v61, %v4296_v0 }
 0xb06   :  { %7716 = vmatmul.mubr.f32.vlgmr.msra.gmra.mxu1 %v8939_v59  ;;  %v2813_v55 = vadd.f32 %v7608_v2, %v2715_v44  ;;  %v4278_v12 = vand.u32 4294901760, %v4277_v4  ;;  %v2708_v3 = vadd.f32 %v9064_v48, %v9044_v26 }
 0xb07   :  { %7718 = vmatprep.mubr.f32.mxu1 %v8948_v11  ;;  %v9070_v34 = vpop.f32.mrf.mxu0  ;;  %v9072_v37 = vpop.f32.mrf.mxu1  ;;  %v4298_v22 = vand.u32 4294901760, %v4297_v13 }
 0xb08   :  { %v2805_v25 = vadd.f32 %v9066_v33, %v2708_v3 }
 0xb09   :  { %v9074_v39 = vpop.f32.mrf.mxu0  ;;  %v9076_v59 = vpop.f32.mrf.mxu1 }
 0xb0a   :  { %7719 = vmatmul.mubr.f32.gmra.mxu1 %v8953_v49  ;;  %v6905_v49 = vld [vmem:[%s9848_s3 + $0x70] sm:$0xff] }
 0xb0b   :  { %7731 = vmatprep.mubr.f32.mxu1 %v8999_v36  ;;  %v7616_v63 = vpop.f32.mrf.mxu0  ;;  %v7624_v15 = vpop.f32.mrf.mxu1  ;;  %v4193_v50 = vsel %vm2410_vm7, %v6905_v49, 0 }
 0xb0c   :  { %v2905_v47 = vadd.f32 %v7616_v63, %v2813_v55  ;;  %v4284_v53 = vand.u32 4294901760, %v4193_v50 }
 0xb0d   :  { %v2898_v23 = vpop.f32.mrf.mxu0  ;;  %v2988_v62 = vpop.f32.mrf.mxu1 }
 0xb0e   :  { %v9078_v11 = vadd.f32 %v7624_v15, %v2905_v47  ;;  %v4285_v38 = vsub.f32 %v4193_v50, %v4284_v53 }
 0xb10   :  { %v4286_v46 = vand.u32 4294901760, %v4285_v38 }
 0xb12   :  { %v4287_v8 = vsub.f32 %v4285_v38, %v4286_v46 }
 0xb14   :  { %v4288_v14 = vand.u32 4294901760, %v4287_v8 }
 0xb58   :  { %v2398_v6 = vpop.permute.xlu1 %2397 }
 0xb59   :  { %v2400_v5 = vadd.f32 %v2398_v6, %v2388_v43 }
 0xb5b   :  { %v4229_v9 = vand.u32 4294901760, %v2400_v5 }
 0xb5d   :  { %v4336_v16 = vsub.f32 %v2400_v5, %v4229_v9  ;;  %7721 = vmatprep.subr.mxu0 %v4229_v9 }
 0xb5e   :  { %7722 = vmatpush3.msra.mxu0 %v4229_v9 }
 0xb5f   :  { %7724 = vmatmul.mubr.f32.vlgmr.msra.gmra.mxu0 %v4278_v12  ;;  %7737 = vmatprep.subr.mxu0 %v4336_v16  ;;  %v4337_v21 = vand.u32 4294901760, %v4336_v16 }
 0xb60   :  { %7738 = vmatpush3.msra.mxu0 %v4336_v16  ;;  %7726 = vmatprep.mubr.f32.mxu0 %v4288_v14 }
 0xb61   :  { %7753 = vmatprep.subr.mxu0 %v4337_v21  ;;  %v4338_v56 = vsub.f32 %v4336_v16, %v4337_v21 }
 0xb63   :  { %7727 = vmatmul.mubr.f32.gmra.mxu0 %v4298_v22  ;;  %v4339_v52 = vand.u32 4294901760, %v4338_v56  ;;  %v2701_v56 = vadd.f32 %v9047_v27, %v9017_v10 }
 0xb64   :  { %7739 = vmatprep.mubr.f32.mxu0 %v9005_v1 }
 0xb65   :  { %7729 = vmatprep.subr.mxu1 %v4339_v52 }
 0xb66   :  { %7730 = vmatpush3.msra.mxu1 %v4339_v52  ;;  %v2694_v52 = vadd.f32 %v9052_v30, %v9025_v17 }
 0xb67   :  { %7732 = vmatmul.mubr.f32.vlgmr.msra.gmra.mxu1 %v4274_v42  ;;  %7740 = vmatmul.mubr.f32.vlgmr.msra.gmra.mxu0 %v4275_v45 }
 0xb68   :  { %7745 = vmatprep.subr.mxu1 %v4229_v9  ;;  %7754 = vmatpush3.msra.mxu0 %v4337_v21  ;;  %v2789_v20 = vadd.f32 %v9054_v31, %v2694_v52 }
 0xb69   :  { %7746 = vmatpush3.msra.mxu1 %v4229_v9  ;;  %7734 = vmatprep.mubr.f32.mxu1 %v4284_v53 }
 0xb6a   :  { %7761 = vmatprep.subr.mxu1 %v4229_v9  ;;  %7742 = vmatprep.mubr.f32.mxu0 %v4285_v38  ;;  %v2887_v10 = vadd.f32 %v9074_v39, %v2789_v20 }
 0xb6b   :  { %7735 = vmatmul.mubr.f32.gmra.mxu1 %v4294_v58  ;;  %7743 = vmatmul.mubr.f32.gmra.mxu0 %v4295_v61 }
 0xb6c   :  { %7747 = vmatprep.mubr.f32.mxu1 %v4266_v40  ;;  %7755 = vmatprep.mubr.f32.mxu0 %v8999_v36 }
 0xb6f   :  { %7748 = vmatmul.mubr.f32.vlgmr.msra.gmra.mxu1 %v4276_v28  ;;  %7756 = vmatmul.mubr.f32.vlgmr.msra.gmra.mxu0 %v4274_v42 }
 0xb70   :  { %7762 = vmatpush3.msra.mxu1 %v4229_v9  ;;  %7750 = vmatprep.mubr.f32.mxu1 %v4286_v46 }
 0xb71   :  { %7758 = vmatprep.mubr.f32.mxu0 %v4284_v53 }
 0xb73   :  { %7751 = vmatmul.mubr.f32.gmra.mxu1 %v4296_v0  ;;  %7759 = vmatmul.mubr.f32.gmra.mxu0 %v4294_v58 }
 0xb74   :  { %7763 = vmatprep.mubr.f32.mxu1 %v8999_v36 }
 0xb77   :  { %7764 = vmatmul.mubr.f32.vlgmr.msra.gmra.mxu1 %v4274_v42 }
 0xb78   :  { %7766 = vmatprep.mubr.f32.mxu1 %v4284_v53 }
 0xb7b   :  { %7767 = vmatmul.mubr.f32.gmra.mxu1 %v4294_v58 }
 0xb96   :  { %v7629_v57 = vpop.f32.mrf.mxu0 }
 0xb98   :  { %v3082_v24 = vpop.f32.mrf.mxu0 }
 0xb9a   :  { %v7632_v1 = vpop.f32.mrf.mxu0 }
 0xb9b   :  { %v3113_v40 = vadd.f32 %v7632_v1, %v9078_v11 }
 0xb9c   :  { %v3102_v47 = vpop.f32.mrf.mxu0 }
 0xb9e   :  { %v7637_v2 = vpop.f32.mrf.mxu1  ;;  %v9103_v15 = vpop.f32.mrf.mxu0 }
 0xba0   :  { %v9099_v44 = vpop.f32.mrf.mxu1  ;;  %v9107_v7 = vpop.f32.mrf.mxu0 }
 0xba2   :  { %v7640_v55 = vpop.f32.mrf.mxu1 }
 0xba3   :  { %v9101_v63 = vadd.f32 %v7640_v55, %v3113_v40  ;;  %v9111_v19 = vpop.f32.mrf.mxu0  ;;  %v2797_v55 = vadd.f32 %v9049_v29, %v2701_v56  ;;  %v2977_v29 = vadd.f32 %v9076_v59, %v2887_v10  ;;  %v2899_v56 = vadd.f32 %v2898_v23, %v2805_v25 }
 0xba4   :  { %v9105_v36 = vpop.f32.mrf.mxu1 }
 0xba5   :  { %v9115_v11 = vpop.f32.mrf.mxu0  ;;  %v2893_v32 = vadd.f32 %v9070_v34, %v2797_v55  ;;  %v2989_v18 = vadd.f32 %v2988_v62, %v2899_v56 }
 0xba6   :  { %v9109_v49 = vpop.f32.mrf.mxu1 }
 0xba7   :  { %v9119_v42 = vpop.f32.mrf.mxu0  ;;  %v2983_v30 = vadd.f32 %v9072_v37, %v2893_v32 }
 0xba8   :  { %v9113_v50 = vpop.f32.mrf.mxu1 }
 0xba9   :  { %v9123_v54 = vpop.f32.mrf.mxu0  ;;  %v3093_v26 = vadd.f32 %v7629_v57, %v2983_v30 }
 0xbaa   :  { %v9117_v51 = vpop.f32.mrf.mxu1 }
 0xbab   :  { %v9127_v58 = vpop.f32.mrf.mxu0  ;;  %v3195_v33 = vadd.f32 %v7637_v2, %v3093_v26 }
 0xbac   :  { %v9121_v53 = vpop.f32.mrf.mxu1 }
 0xbad   :  { %v9131_v28 = vpop.f32.mrf.mxu0  ;;  %v3288_v59 = vadd.f32 %v9103_v15, %v3195_v33 }
 0xbae   :  { %v9125_v45 = vpop.f32.mrf.mxu1 }
 0xbaf   :  { %v7677_v41 = vpop.f32.mrf.mxu0 }
 0xbb0   :  { %v9129_v38 = vpop.f32.mrf.mxu1 }
 0xbb1   :  { %v3674_v43 = vpop.f32.mrf.mxu0 }
 0xbb2   :  { %v9133_v61 = vpop.f32.mrf.mxu1 }
 0xbb3   :  { %9884 = vst [vmem:[#allocation6_spill] sm:$0xff] %v9133_v61  ;;  %v7680_v0 = vpop.f32.mrf.mxu0  ;;  %v3083_v61 = vadd.f32 %v3082_v24, %v2977_v29 }
 0xbb4   :  { %v9135_v46 = vpop.f32.mrf.mxu1 }
 0xbb5   :  { %v3694_v8 = vpop.f32.mrf.mxu0  ;;  %v3189_v55 = vadd.f32 %v9099_v44, %v3083_v61  ;;  %v3384_v44 = vadd.f32 %v9109_v49, %v3288_v59  ;;  %v3302_v49 = vadd.f32 %v9111_v19, %v9101_v63 }
 0xbb6   :  { %v7685_v4 = vpop.f32.mrf.mxu1 }
 0xbb7   :  { %v7693_v9 = vpop.f32.mrf.mxu0  ;;  %v3787_v20 = vadd.f32 %v7685_v4, %v7677_v41  ;;  %v3281_v62 = vadd.f32 %v9107_v7, %v3189_v55  ;;  %v3400_v19 = vadd.f32 %v9117_v51, %v3302_v49  ;;  %v4783_v51 = vpop.permute.xlu0 %4782 }
 0xbb8   :  { %v3780_v6 = vpop.f32.mrf.mxu1 }
 0xbb9   :  { %v3872_v13 = vpop.f32.mrf.mxu0  ;;  %v3781_v25 = vadd.f32 %v3780_v6, %v3674_v43  ;;  %v3880_v23 = vadd.f32 %v7693_v9, %v3787_v20  ;;  %v3376_v43 = vadd.f32 %v9113_v50, %v3281_v62 }
 0xbba   :  { %v7688_v5 = vpop.f32.mrf.mxu1 }
 0xbbb   :  { %v9137_v16 = vpop.f32.mrf.mxu0  ;;  %v3873_v4 = vadd.f32 %v3872_v13, %v3781_v25  ;;  %v3799_v6 = vadd.f32 %v7688_v5, %v7680_v0  ;;  %v3474_v50 = vadd.f32 %v9123_v54, %v3376_v43 }
 0xbbc   :  { %v3792_v12 = vpop.f32.mrf.mxu1 }
 0xbbd   :  { %v3886_v22 = vpop.f32.mrf.mxu0  ;;  %v3793_v30 = vadd.f32 %v3792_v12, %v3694_v8  ;;  %v3480_v8 = vadd.f32 %v9119_v42, %v3384_v44 }
 0xbbe   :  { %v7701_v14 = vpop.f32.mrf.mxu1 }
 0xbbf   :  { %v3887_v9 = vadd.f32 %v3886_v22, %v3793_v30 }
 0xbc0   :  { %v3967_v21 = vpop.f32.mrf.mxu1  ;;  %v7709_v40 = vpop.f32.mrf.mxu0 }
 0xbc2   :  { %v9143_v1 = vpop.f32.mrf.mxu1  ;;  %v4065_v60 = vpop.f32.mrf.mxu0 }
 0xbc4   :  { %v3983_v35 = vpop.f32.mrf.mxu1  ;;  %v9152_v17 = vpop.f32.mrf.mxu0 }
 0xbc5   :  { %9885 = vst [vmem:[#allocation7_spill] sm:$0xff] %v9152_v17  ;;  %v3103_v17 = vadd.f32 %v3102_v47, %v2989_v18  ;;  %v3976_v18 = vadd.f32 %v7701_v14, %v3880_v23  ;;  %v3984_v0 = vadd.f32 %v3983_v35, %v3887_v9 }
 0xbc6   :  { %v7717_v27 = vpop.f32.mrf.mxu1  ;;  %v4077_v52 = vpop.f32.mrf.mxu0 }
 0xbc7   :  { %v3201_v24 = vadd.f32 %v9105_v36, %v3103_v17  ;;  %v3968_v17 = vadd.f32 %v3967_v21, %v3873_v4  ;;  %v4072_v12 = vadd.f32 %v7709_v40, %v3976_v18  ;;  %v3570_v40 = vadd.f32 %v9125_v45, %v3480_v8 }
 0xbc8   :  { %v9156_v31 = vpop.f32.mrf.mxu1 }
 0xbc9   :  { %v3295_v15 = vadd.f32 %v9115_v11, %v3201_v24  ;;  %v3894_v11 = vadd.f32 %v9137_v16, %v3799_v6  ;;  %v4066_v21 = vadd.f32 %v4065_v60, %v3968_v17  ;;  %v4162_v20 = vadd.f32 %v7717_v27, %v4072_v12  ;;  %v9887_v6 = vld [vmem:[#allocation6_spill] sm:$0xff] }
 0xbca   :  { %v9158_v34 = vpop.f32.mrf.mxu1  ;;  %v4078_v16 = vadd.f32 %v4077_v52, %v3984_v0  ;;  %v3564_v60 = vadd.f32 %v9129_v38, %v3474_v50 }
 0xbcb   :  { %v3992_v54 = vadd.f32 %v9143_v1, %v3894_v11  ;;  %v4178_v45 = vadd.f32 %v4162_v20, %v3570_v40 }
 0xbcc   :  { %v9161_v32 = vpop.f32.mrf.mxu1  ;;  %v9886_v52 = vld [vmem:[#allocation7_spill] sm:$0xff] }
 0xbcd   :  { %v4084_v30 = vadd.f32 %v9886_v52, %v3992_v54 }
 0xc1f   :  { %v7725_v48 = vpop.f32.mrf.mxu0 }
 0xc21   :  { %v4270_v3 = vpop.f32.mrf.mxu0 }
 0xc23   :  { %v7728_v39 = vpop.f32.mrf.mxu0 }
 0xc25   :  { %v4290_v37 = vpop.f32.mrf.mxu0 }
 0xc27   :  { %v7733_v57 = vpop.f32.mrf.mxu1  ;;  %v7741_v10 = vpop.f32.mrf.mxu0 }
 0xc28   :  { %v4383_v29 = vadd.f32 %v7733_v57, %v7725_v48  ;;  %v3392_v48 = vadd.f32 %v9121_v53, %v3295_v15 }
 0xc29   :  { %v4376_v2 = vpop.f32.mrf.mxu1  ;;  %v4468_v41 = vpop.f32.mrf.mxu0 }
 0xc2a   :  { %v4377_v7 = vadd.f32 %v4376_v2, %v4270_v3  ;;  %v4476_v14 = vadd.f32 %v7741_v10, %v4383_v29  ;;  %v3486_v53 = vadd.f32 %v9131_v28, %v3392_v48  ;;  %v3492_v28 = vadd.f32 %v9127_v58, %v3400_v19 }
 0xc2b   :  { %v7736_v47 = vpop.f32.mrf.mxu1  ;;  %v7744_v61 = vpop.f32.mrf.mxu0  ;;  %v4168_v2 = vadd.f32 %v9161_v32, %v4078_v16  ;;  %v4174_v58 = vadd.f32 %v9158_v34, %v4084_v30 }
 0xc2c   :  { %v4469_v3 = vadd.f32 %v4468_v41, %v4377_v7  ;;  %v4395_v25 = vadd.f32 %v7736_v47, %v7728_v39  ;;  %v3576_v1 = vadd.f32 %v9135_v46, %v3486_v53  ;;  %v4779_v47 = vpop.permute.xlu1 %4778  ;;  %v3582_v9 = vadd.f32 %v9887_v6, %v3492_v28 }
 0xc2d   :  { %v4388_v56 = vpop.f32.mrf.mxu1  ;;  %v4482_v36 = vpop.f32.mrf.mxu0 }
 0xc2e   :  { %v4389_v33 = vadd.f32 %v4388_v56, %v4290_v37  ;;  %v4156_v37 = vadd.f32 %v9156_v31, %v4066_v21  ;;  %v4490_v10 = vadd.f32 %v7744_v61, %v4395_v25  ;;  %v4179_v46 = vadd.f32 %v4168_v2, %v3576_v1 }
 0xc2f   :  { %v7749_v13 = vpop.f32.mrf.mxu1  ;;  %v7757_v26 = vpop.f32.mrf.mxu0  ;;  %v4180_v49 = vadd.f32 %v4174_v58, %v3582_v9  ;;  %v9890_v58 = vld [vmem:[#allocation5_spill] sm:$0xff] }
 0xc30   :  { %v4572_v42 = vadd.f32 %v7749_v13, %v4476_v14  ;;  %v4483_v23 = vadd.f32 %v4482_v36, %v4389_v33  ;;  %v4177_v31 = vadd.f32 %v4156_v37, %v3564_v60  ;;  %v9868_v33 = vmov 4  }
 0xc31   :  { %v4563_v5 = vpop.f32.mrf.mxu1  ;;  %v4661_v22 = vpop.f32.mrf.mxu0  ;;  %8143 = vset.pattern.permute.xlu0 %v9868_v33  ;;  %8144 = vset.pattern.permute.xlu1 %v9868_v33 }
 0xc32   :  { %v4564_v63 = vadd.f32 %v4563_v5, %v4469_v3  ;;  %v4668_v57 = vadd.f32 %v7757_v26, %v4572_v42  ;;  %v4787_v26 = vpop.permute.xlu1 %4786 }
 0xc33   :  { %v7752_v55 = vpop.f32.mrf.mxu1  ;;  %v7760_v59 = vpop.f32.mrf.mxu0 }
 0xc34   :  { %v4662_v39 = vadd.f32 %v4661_v22, %v4564_v63  ;;  %v4588_v4 = vadd.f32 %v7752_v55, %v4490_v10 }
 0xc35   :  { %v4579_v35 = vpop.f32.mrf.mxu1  ;;  %v4673_v38 = vpop.f32.mrf.mxu0 }
 0xc36   :  { %v4580_v24 = vadd.f32 %v4579_v35, %v4483_v23  ;;  %v4680_v36 = vadd.f32 %v7760_v59, %v4588_v4  ;;  %v4791_v11 = vpop.permute.xlu1 %4790 }
 0xc37   :  { %v7765_v27 = vpop.f32.mrf.mxu1 }
 0xc38   :  { %v4758_v62 = vadd.f32 %v7765_v27, %v4668_v57  ;;  %v4674_v29 = vadd.f32 %v4673_v38, %v4580_v24 }
 0xc39   :  { %v4751_v41 = vpop.f32.mrf.mxu1 }
 0xc3a   :  { %v4752_v44 = vadd.f32 %v4751_v41, %v4662_v39  ;;  %v4774_v18 = vadd.f32 %v4758_v62, %v4178_v45  ;;  %v9212_v41 = vld [vmem:[%s9845_s6] sm:$0xff] }
 0xc3b   :  { %v7768_v61 = vpop.f32.mrf.mxu1 }
 0xc3c   :  { %v4773_v43 = vadd.f32 %v4752_v44, %v4177_v31  ;;  %v4794_v15 = vadd.f32 %v4783_v51, %v4774_v18  ;;  %v4770_v8 = vadd.f32 %v7768_v61, %v4680_v36  ;;  %v9867_v36 = vmov 5  }
 0xc3d   :  { %v4763_v56 = vpop.f32.mrf.mxu1 }
 0xc3e   :  { %v9187_v17 = vmax.f32 %v4794_v15, 0.0  ;;  %v4764_v32 = vadd.f32 %v4763_v56, %v4674_v29  ;;  %v4793_v7 = vadd.f32 %v4779_v47, %v4773_v43  ;;  %v4776_v48 = vadd.f32 %v4770_v8, %v4180_v49  ;;  %v9888_v47 = vld [vmem:[#allocation3_spill] sm:$0xff]  ;;  %v9889_v29 = vld [vmem:[#allocation4_spill] sm:$0xff] }
 0xc3f   :  { %v4934_v8 = vld [vmem:[%s9849_s8 + $0x68] sm:$0xff] }
 0xc40   :  { %v4775_v12 = vadd.f32 %v4764_v32, %v4179_v46  ;;  %4803 = vadd.xlane.f32.xlu1 %v9187_v17  ;;  %v9190_v13 = vmax.f32 %v4793_v7, 0.0  ;;  %v4796_v0 = vadd.f32 %v4791_v11, %v4776_v48  ;;  %v4814_v5 = vmul.f32 %v9187_v17, %v9187_v17  ;;  %v4936_v32 = vld [vmem:[%s9849_s8 + $0x78] sm:$0xff]  ;;  %v4935_v7 = vld [vmem:[%s9849_s8 + $0x70] sm:$0xff] }
 0xc41   :  { %v9242_v49 = vand.u32 4294901760, %v4934_v8  ;;  %v4932_v48 = vld [vmem:[%s9849_s8 + $0x58] sm:$0xff] }
 0xc42   :  { %4801 = vadd.xlane.f32.xlu0 %v9190_v13  ;;  %v4795_v14 = vadd.f32 %v4787_v26, %v4775_v12  ;;  %v4813_v34 = vmul.f32 %v9190_v13, %v9190_v13  ;;  %v9202_v21 = vmax.f32 %v4796_v0, 0.0  ;;  %v9238_v12 = vand.u32 4294901760, %v4936_v32 }
 0xc43   :  { %v9240_v26 = vand.u32 4294901760, %v4935_v7  ;;  %v9255_v0 = vand.u32 4294901760, %v4932_v48 }
 0xc44   :  { %v9195_v50 = vmax.f32 %v4795_v14, 0.0  ;;  %v4816_v3 = vmul.f32 %v9202_v21, %v9202_v21  ;;  %v4933_v14 = vld [vmem:[%s9849_s8 + $0x60] sm:$0xff]  ;;  %7769 = vmatprep.subr.mxu0 %v9238_v12 }
 0xc45   :  { %v9253_v11 = vand.u32 4294901760, %v4933_v14  ;;  %7770 = vmatpush3.msra.mxu0 %v9238_v12 }
 0xc46   :  { %4817 = vadd.xlane.f32.xlu0 %v4813_v34  ;;  %4805 = vadd.xlane.f32.xlu1 %v9195_v50  ;;  %v4815_v22 = vmul.f32 %v9195_v50, %v9195_v50  ;;  %v4931_v34 = vld [vmem:[%s9849_s8 + $0x50] sm:$0xff] }
 0xc47   :  { %7771 = vmatprep.subr.mxu0 %v9240_v26 }
 0xc48   :  { %7772 = vmatpush3.msra.mxu0 %v9240_v26 }
 0xc49   :  { %7773 = vmatprep.subr.mxu0 %v9242_v49 }
 0xc4a   :  { %4819 = vadd.xlane.f32.xlu0 %v4814_v5  ;;  %4821 = vadd.xlane.f32.xlu1 %v4815_v22  ;;  %v9257_v5 = vand.u32 4294901760, %v4931_v34  ;;  %v4930_v22 = vld [vmem:[%s9849_s8 + $0x48] sm:$0xff] }
 0xc4b   :  { %7774 = vmatpush3.msra.mxu0 %v9242_v49 }
 0xc4c   :  { %7775 = vmatprep.subr.mxu0 %v9253_v11 }
 0xc4d   :  { %7776 = vmatpush3.msra.mxu0 %v9253_v11 }
 0xc4e   :  { %4807 = vadd.xlane.f32.xlu0 %v9202_v21  ;;  %7777 = vmatprep.subr.mxu0 %v9255_v0 }
 0xc4f   :  { %7778 = vmatpush3.msra.mxu0 %v9255_v0 }
 0xc50   :  { %7779 = vmatprep.subr.mxu0 %v9257_v5 }
 0xc51   :  { %7780 = vmatpush3.msra.mxu0 %v9257_v5 }
 0xc52   :  { %4823 = vadd.xlane.f32.xlu0 %v4816_v3  ;;  %v4929_v3 = vld [vmem:[%s9849_s8 + $0x40] sm:$0xff] }
 0xcc9   :  { %v4804_v42 = vpop.xlane.xlu1 %4803 }
 0xcca   :  { %v4810_v55 = vmul.f32 0.0078125, %v4804_v42  ;;  %v9266_v42 = vsub.f32 %v4936_v32, %v9238_v12 }
 0xccb   :  { %v4802_v40 = vpop.xlane.xlu0 %4801 }
 0xccc   :  { %v4809_v20 = vmul.f32 0.0078125, %v4802_v40  ;;  %v4830_v35 = vmul.f32 %v4810_v55, %v4810_v55  ;;  %v9269_v40 = vsub.f32 %v4935_v7, %v9240_v26 }
 0xcce   :  { %v4829_v19 = vmul.f32 %v4809_v20, %v4809_v20 }
 0xccf   :  { %v4818_v25 = vpop.xlane.xlu0 %4817  ;;  %v4806_v63 = vpop.xlane.xlu1 %4805 }
 0xcd0   :  { %v4825_v53 = vmul.f32 0.0078125, %v4818_v25  ;;  %v4811_v54 = vmul.f32 0.0078125, %v4806_v63  ;;  %v9278_v25 = vsub.f32 %v4933_v14, %v9253_v11  ;;  %v9281_v63 = vsub.f32 %v4932_v48, %v9255_v0 }
 0xcd2   :  { %v4833_v16 = vsub.f32 %v4825_v53, %v4829_v19  ;;  %v4831_v23 = vmul.f32 %v4811_v54, %v4811_v54  ;;  %v9285_v19 = vsub.f32 %v4931_v34, %v9257_v5  ;;  %v9287_v53 = vand.u32 4294901760, %v4929_v3 }
 0xcd3   :  { %v4820_v59 = vpop.xlane.xlu0 %4819  ;;  %v4822_v60 = vpop.xlane.xlu1 %4821 }
 0xcd4   :  { %v4837_v37 = vadd.f32 1e-05, %v4833_v16  ;;  %v4826_v57 = vmul.f32 0.0078125, %v4820_v59  ;;  %v4827_v45 = vmul.f32 0.0078125, %v4822_v60  ;;  %v9293_v16 = vand.u32 4294901760, %v9269_v40 }
 0xcd5   :  { %v9300_v59 = vand.u32 4294901760, %v9278_v25  ;;  %v9303_v60 = vand.u32 4294901760, %v9281_v63 }
 0xcd6   :  { %8171 = vrsqrt.f32 %v4837_v37  ;;  %v4834_v27 = vsub.f32 %v4826_v57, %v4830_v35  ;;  %v4835_v10 = vsub.f32 %v4827_v45, %v4831_v23  ;;  %v5069_v57 = vsub.f32 %v9269_v40, %v9293_v16 }
 0xcd7   :  { %v4808_v39 = vpop.xlane.xlu0 %4807 }
 0xcd8   :  { %v4838_v24 = vadd.f32 1e-05, %v4834_v27  ;;  %v4839_v62 = vadd.f32 1e-05, %v4835_v10  ;;  %v4812_v51 = vmul.f32 0.0078125, %v4808_v39  ;;  %v9318_v27 = vand.u32 4294901760, %v9285_v19 }
 0xcd9   :  { %v9322_v10 = vsub.f32 %v4929_v3, %v9287_v53  ;;  %v4928_v39 = vld [vmem:[%s9849_s8 + $0x38] sm:$0xff] }
 0xcda   :  { %8173 = vrsqrt.f32 %v4838_v24  ;;  %v4832_v1 = vmul.f32 %v4812_v51, %v4812_v51  ;;  %v4927_v24 = vld [vmem:[%s9849_s8 + $0x30] sm:$0xff] }
 0xcdb   :  { %8175 = vrsqrt.f32 %v4839_v62  ;;  %v4824_v28 = vpop.xlane.xlu0 %4823  ;;  %v4926_v62 = vld [vmem:[%s9849_s8 + $0x28] sm:$0xff] }
 0xcdc   :  { %v4828_v52 = vmul.f32 0.0078125, %v4824_v28  ;;  %v5070_v28 = vand.u32 4294901760, %v5069_v57 }
 0xcde   :  { %v4836_v30 = vsub.f32 %v4828_v52, %v4832_v1  ;;  %v5083_v1 = vsub.f32 %v9278_v25, %v9300_v59  ;;  %v5090_v52 = vsub.f32 %v9281_v63, %v9303_v60 }
 0xce0   :  { %v4840_v2 = vadd.f32 1e-05, %v4836_v30 }
 0xce2   :  { %8177 = vrsqrt.f32 %v4840_v2  ;;  %v4925_v2 = vld [vmem:[%s9849_s8 + $0x20] sm:$0xff] }
 0xce3   :  { %v8172_v38 = vpop.eup %8171  ;;  %v9368_v32 = vand.u32 4294901760, %v4925_v2 }
 0xce4   :  { %v4845_v31 = vmul.f32 %v9212_v41, %v8172_v38 }
 0xce5   :  { %v9390_v57 = vsub.f32 %v4925_v2, %v9368_v32 }
 0xce6   :  { %v4873_v4 = vmul.f32 %v4845_v31, %v4809_v20  ;;  %v9272_v20 = vsub.f32 %v4934_v8, %v9242_v49  ;;  %v5091_v8 = vand.u32 4294901760, %v5090_v52 }
 0xce7   :  { %v8174_v44 = vpop.eup %8173 }
 0xce8   :  { %v8176_v18 = vpop.eup %8175  ;;  %4881 = vrot.lane.b32.xlu1 %v4873_v4, %s8210_s28  ;;  %v4846_v61 = vmul.f32 %v9888_v47, %v8174_v44  ;;  %v9296_v35 = vand.u32 4294901760, %v9272_v20  ;;  %v9348_v4 = vand.u32 4294901760, %v4927_v24  ;;  %v9350_v44 = vand.u32 4294901760, %v4926_v62 }
 0xce9   :  { %v9218_v43 = vmul.f32 %v9889_v29, %v8176_v18  ;;  %v5097_v18 = vsub.f32 %v9285_v19, %v9318_v27 }
 0xcea   :  { %v4874_v15 = vmul.f32 %v4846_v61, %v4810_v55  ;;  %v9275_v55 = vand.u32 4294901760, %v4930_v22  ;;  %v5076_v45 = vsub.f32 %v9272_v20, %v9296_v35  ;;  %v9378_v48 = vsub.f32 %v4926_v62, %v9350_v44 }
 0xceb   :  { %v4875_v6 = vmul.f32 %v9218_v43, %v4811_v54  ;;  %v9290_v54 = vand.u32 4294901760, %v9266_v42 }
 0xcec   :  { %4883 = vrot.lane.b32.xlu0 %v4874_v15, %s8210_s28  ;;  %v9307_v37 = vsub.f32 %v4930_v22, %v9275_v55  ;;  %v5077_v38 = vand.u32 4294901760, %v5076_v45  ;;  %v4924_v15 = vld [vmem:[%s9849_s8 + $0x18] sm:$0xff]  ;;  %7781 = vmatprep.subr.mxu0 %v9275_v55  ;;  %v5098_v22 = vand.u32 4294901760, %v5097_v18 }
 0xced   :  { %4885 = vrot.lane.b32.xlu1 %v4875_v6, %s8210_s28  ;;  %v5062_v23 = vsub.f32 %v9266_v42, %v9290_v54  ;;  %v5084_v6 = vand.u32 4294901760, %v5083_v1  ;;  %v9380_v34 = vand.u32 4294901760, %v4924_v15  ;;  %7782 = vmatpush3.msra.mxu0 %v9275_v55  ;;  %v9406_v1 = vand.u32 4294901760, %v9390_v57 }
 0xcee   :  { %v9339_v30 = vand.u32 4294901760, %v9307_v37  ;;  %7783 = vmatprep.subr.mxu0 %v9287_v53 }
 0xcef   :  { %v8178_v9 = vpop.eup %8177  ;;  %7784 = vmatpush3.msra.mxu0 %v9287_v53  ;;  %v9400_v62 = vsub.f32 %v4924_v15, %v9380_v34  ;;  %9892 = vst [vmem:[#allocation6_spill] sm:$0xff] %v9406_v1  ;;  %v5139_v15 = vsub.f32 %v9390_v57, %v9406_v1 }
 0xcf0   :  { %4851 = vperm.xlu0 %8143, %v4845_v31   ;;  %v9224_v46 = vmul.f32 %v9890_v58, %v8178_v9  ;;  %v9346_v31 = vand.u32 4294901760, %v4928_v39  ;;  %v5104_v7 = vsub.f32 %v9307_v37, %v9339_v30 }
 0xcf2   :  { %v4876_v56 = vmul.f32 %v9224_v46, %v4812_v51  ;;  %v5063_v51 = vand.u32 4294901760, %v5062_v23  ;;  %v9362_v9 = vsub.f32 %v4928_v39, %v9346_v31  ;;  %v5105_v45 = vand.u32 4294901760, %v5104_v7  ;;  %7785 = vmatprep.subr.mxu0 %v9346_v31 }
 0xcf3   :  { %7786 = vmatpush3.msra.mxu0 %v9346_v31 }
 0xcf4   :  { %4887 = vrot.lane.b32.xlu1 %v4876_v56, %s8210_s28  ;;  %8146 = vset.pattern.permute.xlu0 %v9867_v36  ;;  %v9366_v56 = vsub.f32 %v4927_v24, %v9348_v4  ;;  %v9374_v14 = vand.u32 4294901760, %v9362_v9  ;;  %v9396_v24 = vand.u32 4294901760, %v9378_v48 }
 0xcf5   :  { %7807 = vmatprep.subr.mxu1 %v5063_v51  ;;  %7787 = vmatprep.subr.mxu0 %v9348_v4 }
 0xcf6   :  { %7808 = vmatpush3.msra.mxu1 %v5063_v51  ;;  %v9386_v23 = vand.u32 4294901760, %v9366_v56  ;;  %v5118_v39 = vsub.f32 %v9362_v9, %v9374_v14  ;;  %9891 = vst [vmem:[#allocation7_spill] sm:$0xff] %v9396_v24  ;;  %7788 = vmatpush3.msra.mxu0 %v9348_v4  ;;  %v5132_v2 = vsub.f32 %v9378_v48, %v9396_v24  ;;  %v9896_v24 = vmov 4  }
 0xcf7   :  { %7809 = vmatprep.subr.mxu1 %v5070_v28  ;;  %7789 = vmatprep.subr.mxu0 %v9350_v44 }
 0xcf8   :  { %4856 = vperm.xlu1 %8144, %v4846_v61   ;;  %v9355_v61 = vand.u32 4294901760, %v9322_v10  ;;  %7810 = vmatpush3.msra.mxu1 %v5070_v28  ;;  %v5125_v28 = vsub.f32 %v9366_v56, %v9386_v23  ;;  %v5119_v52 = vand.u32 4294901760, %v5118_v39  ;;  %v4922_v39 = vld [vmem:[%s9849_s8 + $0x8] sm:$0xff] }
 0xcf9   :  { %7811 = vmatprep.subr.mxu1 %v5077_v38  ;;  %7790 = vmatpush3.msra.mxu0 %v9350_v44 }
 0xcfa   :  { %7812 = vmatpush3.msra.mxu1 %v5077_v38  ;;  %v5111_v3 = vsub.f32 %v9322_v10, %v9355_v61  ;;  %v9413_v38 = vand.u32 4294901760, %v9400_v62  ;;  %v5126_v18 = vand.u32 4294901760, %v5125_v28  ;;  %7791 = vmatprep.subr.mxu0 %v9368_v32  ;;  %v9436_v28 = vand.u32 4294901760, %v4922_v39 }
 0xcfb   :  { %7813 = vmatprep.subr.mxu1 %v5084_v6  ;;  %7792 = vmatpush3.msra.mxu0 %v9368_v32 }
 0xcfc   :  { %8145 = vset.pattern.permute.xlu1 %v9867_v36  ;;  %7814 = vmatpush3.msra.mxu1 %v5084_v6  ;;  %v5112_v51 = vand.u32 4294901760, %v5111_v3  ;;  %9893 = vst [vmem:[#allocation3_spill] sm:$0xff] %v9413_v38  ;;  %v5133_v6 = vand.u32 4294901760, %v5132_v2  ;;  %v5146_v7 = vsub.f32 %v9400_v62, %v9413_v38  ;;  %v4923_v3 = vld [vmem:[%s9849_s8 + $0x10] sm:$0xff] }
 0xcfd   :  { %7815 = vmatprep.subr.mxu1 %v5091_v8  ;;  %7793 = vmatprep.subr.mxu0 %v9380_v34 }
 0xcfe   :  { %7816 = vmatpush3.msra.mxu1 %v5091_v8  ;;  %7794 = vmatpush3.msra.mxu0 %v9380_v34  ;;  %v5140_v8 = vand.u32 4294901760, %v5139_v15 }
 0xcff   :  { %7817 = vmatprep.subr.mxu1 %v5098_v22 }
 0xd00   :  { %7818 = vmatpush3.msra.mxu1 %v5098_v22  ;;  %v5147_v22 = vand.u32 4294901760, %v5146_v7 }
 0xd01   :  { %7819 = vmatprep.subr.mxu1 %v5105_v45 }
 0xd02   :  { %7820 = vmatpush3.msra.mxu1 %v5105_v45  ;;  %v9428_v45 = vand.u32 4294901760, %v4923_v3 }
 0xd03   :  { %7821 = vmatprep.subr.mxu1 %v5112_v51 }
 0xd04   :  { %7822 = vmatpush3.msra.mxu1 %v5112_v51  ;;  %v9434_v51 = vsub.f32 %v4923_v3, %v9428_v45  ;;  %7795 = vmatprep.subr.mxu0 %v9428_v45 }
 0xd05   :  { %7823 = vmatprep.subr.mxu1 %v5119_v52  ;;  %7796 = vmatpush3.msra.mxu0 %v9428_v45 }
 0xd06   :  { %7824 = vmatpush3.msra.mxu1 %v5119_v52  ;;  %v4921_v52 = vld [vmem:[%s9849_s8] sm:$0xff]  ;;  %v9444_v2 = vand.u32 4294901760, %v9434_v51  ;;  %7797 = vmatprep.subr.mxu0 %v9436_v28 }
 0xd07   :  { %7825 = vmatprep.subr.mxu1 %v5126_v18  ;;  %v9449_v15 = vand.u32 4294901760, %v4921_v52  ;;  %7798 = vmatpush3.msra.mxu0 %v9436_v28 }
 0xd08   :  { %7826 = vmatpush3.msra.mxu1 %v5126_v18  ;;  %9894 = vst [vmem:[#allocation4_spill] sm:$0xff] %v9444_v2  ;;  %v9447_v18 = vsub.f32 %v4922_v39, %v9436_v28 }
 0xd09   :  { %7827 = vmatprep.subr.mxu1 %v5133_v6  ;;  %7799 = vmatprep.subr.mxu0 %v9449_v15 }
 0xd0a   :  { %7828 = vmatpush3.msra.mxu1 %v5133_v6  ;;  %v5153_v6 = vsub.f32 %v9434_v51, %v9444_v2  ;;  %v9456_v7 = vand.u32 4294901760, %v9447_v18  ;;  %7800 = vmatpush3.msra.mxu0 %v9449_v15 }
 0xd0b   :  { %7829 = vmatprep.subr.mxu1 %v5140_v8  ;;  %7845 = vmatprep.subr.mxu0 %v9266_v42 }
 0xd0c   :  { %7830 = vmatpush3.msra.mxu1 %v5140_v8  ;;  %9895 = vst [vmem:[#allocation5_spill] sm:$0xff] %v9456_v7  ;;  %v9459_v8 = vsub.f32 %v4921_v52, %v9449_v15  ;;  %v5154_v3 = vand.u32 4294901760, %v5153_v6  ;;  %v5160_v39 = vsub.f32 %v9447_v18, %v9456_v7 }
 0xd0d   :  { %7831 = vmatprep.subr.mxu1 %v5147_v22 }
 0xd0e   :  { %7832 = vmatpush3.msra.mxu1 %v5147_v22  ;;  %v9466_v36 = vand.u32 4294901760, %v9459_v8  ;;  %v5161_v2 = vand.u32 4294901760, %v5160_v39 }
 0xd0f   :  { %7833 = vmatprep.subr.mxu1 %v5154_v3 }
 0xd10   :  { %v5167_v52 = vsub.f32 %v9459_v8, %v9466_v36  ;;  %7834 = vmatpush3.msra.mxu1 %v5154_v3 }
 0xd11   :  { %7835 = vmatprep.subr.mxu1 %v5161_v2 }
 0xd12   :  { %v5168_v6 = vand.u32 4294901760, %v5167_v52  ;;  %7836 = vmatpush3.msra.mxu1 %v5161_v2 }
 0xd14   :  { %7837 = vmatprep.subr.mxu1 %v5168_v6 }
 0xd15   :  { %7838 = vmatpush3.msra.mxu1 %v5168_v6 }
 0xd16   :  { %7883 = vmatprep.subr.mxu1 %v9238_v12 }
 0xd5a   :  { %v4882_v22 = vpop.permute.xlu1 %4881 }
 0xd5b   :  { %v4893_v33 = vsub.f32 %v9212_v41, %v4882_v22 }
 0xd5d   :  { %4899 = vperm.xlu1 %8145, %v4893_v33  }
 0xd5e   :  { %v4884_v38 = vpop.permute.xlu0 %4883 }
 0xd5f   :  { %v4894_v1 = vsub.f32 %v9888_v47, %v4884_v38  ;;  %v4886_v7 = vpop.permute.xlu1 %4885  ;;  %v9897_v47 = vmov 5  }
 0xd60   :  { %v4895_v22 = vsub.f32 %v9889_v29, %v4886_v7 }
 0xd61   :  { %4904 = vperm.xlu0 %8146, %v4894_v1   ;;  %8147 = vset.pattern.permute.xlu1 %v9896_v24 }
 0xd62   :  { %4861 = vperm.xlu1 %8147, %v9218_v43  }
 0xd65   :  { %4909 = vperm.xlu0 %8146, %v4895_v22  }
 0xd66   :  { %4866 = vperm.xlu1 %8147, %v9224_v46   ;;  %v4888_v33 = vpop.permute.xlu1 %4887 }
 0xd67   :  { %v4896_v3 = vsub.f32 %v9890_v58, %v4888_v33 }
 0xd6a   :  { %8148 = vset.pattern.permute.xlu1 %v9897_v47 }
 0xd6b   :  { %4914 = vperm.xlu1 %8148, %v4896_v3   ;;  %v4852_v38 = vpop.permute.xlu0 %4851 }
 0xd6c   :  { %v4869_v24 = vmul.f32 %v4852_v38, %v9190_v13 }
 0xd73   :  { %v4857_v1 = vpop.permute.xlu1 %4856 }
 0xd74   :  { %v4870_v29 = vmul.f32 %v4857_v1, %v9187_v17 }
 0xdd8   :  { %v4900_v2 = vpop.permute.xlu1 %4899 }
 0xdd9   :  { %v9481_v43 = vadd.f32 %v4900_v2, %v4869_v24 }
 0xddb   :  { %v9485_v7 = vand.u32 4294901760, %v9481_v43 }
 0xddc   :  { %v4905_v39 = vpop.permute.xlu0 %4904 }
 0xddd   :  { %v9489_v46 = vsub.f32 %v9481_v43, %v9485_v7  ;;  %v9491_v58 = vadd.f32 %v4905_v39, %v4870_v29  ;;  %7839 = vmatprep.mubr.f32.mxu1 %v9485_v7  ;;  %v4862_v52 = vpop.permute.xlu1 %4861 }
 0xdde   :  { %v4871_v13 = vmul.f32 %v4862_v52, %v9195_v50 }
 0xddf   :  { %v9496_v6 = vand.u32 4294901760, %v9491_v58  ;;  %v5020_v17 = vand.u32 4294901760, %v9489_v46 }
 0xde0   :  { %v4910_v22 = vpop.permute.xlu0 %4909 }
 0xde1   :  { %v9501_v33 = vsub.f32 %v9491_v58, %v9496_v6  ;;  %v9503_v3 = vadd.f32 %v4910_v22, %v4871_v13  ;;  %7840 = vmatmul.mubr.f32.vlgmr.msra.gmra.mxu1 %v9496_v6  ;;  %v4867_v47 = vpop.permute.xlu1 %4866  ;;  %v5021_v38 = vsub.f32 %v9489_v46, %v5020_v17 }
 0xde2   :  { %7884 = vmatpush3.msra.mxu1 %v9238_v12  ;;  %v4872_v39 = vmul.f32 %v4867_v47, %v9202_v21 }
 0xde3   :  { %v9879_v50 = vand.u32 4294901760, %v9501_v33  ;;  %v9510_v1 = vand.u32 4294901760, %v9503_v3  ;;  %7885 = vmatprep.subr.mxu1 %v9240_v26  ;;  %v5022_v24 = vand.u32 4294901760, %v5021_v38 }
 0xde4   :  { %7886 = vmatpush3.msra.mxu1 %v9240_v26 }
 0xde5   :  { %v5031_v2 = vsub.f32 %v9501_v33, %v9879_v50  ;;  %v9519_v29 = vsub.f32 %v9503_v3, %v9510_v1  ;;  %7887 = vmatprep.subr.mxu1 %v9242_v49  ;;  %7801 = vmatprep.mubr.f32.mxu0 %v5022_v24 }
 0xde6   :  { %7842 = vmatprep.mubr.f32.mxu1 %v9510_v1  ;;  %7888 = vmatpush3.msra.mxu1 %v9242_v49  ;;  %v4915_v52 = vpop.permute.xlu1 %4914 }
 0xde7   :  { %v5032_v13 = vand.u32 4294901760, %v5031_v2  ;;  %7889 = vmatprep.subr.mxu1 %v9253_v11  ;;  %v9526_v22 = vadd.f32 %v4915_v52, %v4872_v39  ;;  %v5040_v38 = vand.u32 4294901760, %v9519_v29 }
 0xde8   :  { %7890 = vmatpush3.msra.mxu1 %v9253_v11 }
 0xde9   :  { %v9531_v50 = vand.u32 4294901760, %v9526_v22  ;;  %7891 = vmatprep.subr.mxu1 %v9255_v0  ;;  %7802 = vmatmul.mubr.f32.vlgmr.msra.gmra.mxu0 %v5032_v13  ;;  %v5041_v21 = vsub.f32 %v9519_v29, %v5040_v38 }
 0xdea   :  { %7846 = vmatpush3.msra.mxu0 %v9266_v42  ;;  %7892 = vmatpush3.msra.mxu1 %v9255_v0 }
 0xdeb   :  { %v9541_v47 = vsub.f32 %v9526_v22, %v9531_v50  ;;  %7847 = vmatprep.subr.mxu0 %v9269_v40  ;;  %7893 = vmatprep.subr.mxu1 %v9257_v5  ;;  %v5042_v24 = vand.u32 4294901760, %v5041_v21 }
 0xdec   :  { %7843 = vmatmul.mubr.f32.gmra.mxu1 %v9531_v50  ;;  %7848 = vmatpush3.msra.mxu0 %v9269_v40 }
 0xded   :  { %7894 = vmatpush3.msra.mxu1 %v9257_v5  ;;  %7849 = vmatprep.subr.mxu0 %v9272_v20  ;;  %v5050_v42 = vand.u32 4294901760, %v9541_v47 }
 0xdee   :  { %7895 = vmatprep.subr.mxu1 %v9275_v55  ;;  %7915 = vmatprep.mubr.f32.mxu1 %v5020_v17 }
 0xdef   :  { %7804 = vmatprep.mubr.f32.mxu0 %v5042_v24  ;;  %7850 = vmatpush3.msra.mxu0 %v9272_v20  ;;  %v5051_v2 = vsub.f32 %v9541_v47, %v5050_v42  ;;  %v9898_v20 = vand.u32 4294901760, %v9501_v33 }
 0xdf0   :  { %7896 = vmatpush3.msra.mxu1 %v9275_v55  ;;  %7851 = vmatprep.subr.mxu0 %v9278_v25 }
 0xdf1   :  { %7897 = vmatprep.subr.mxu1 %v9287_v53  ;;  %7852 = vmatpush3.msra.mxu0 %v9278_v25  ;;  %v5052_v40 = vand.u32 4294901760, %v5051_v2 }
 0xdf2   :  { %7898 = vmatpush3.msra.mxu1 %v9287_v53  ;;  %7853 = vmatprep.subr.mxu0 %v9281_v63 }
 0xdf3   :  { %7899 = vmatprep.subr.mxu1 %v9346_v31  ;;  %7854 = vmatpush3.msra.mxu0 %v9281_v63 }
 0xdf4   :  { %7900 = vmatpush3.msra.mxu1 %v9346_v31  ;;  %7855 = vmatprep.subr.mxu0 %v9285_v19 }
 0xdf5   :  { %7901 = vmatprep.subr.mxu1 %v9348_v4  ;;  %7805 = vmatmul.mubr.f32.gmra.mxu0 %v5052_v40 }
 0xdf6   :  { %7856 = vmatpush3.msra.mxu0 %v9285_v19  ;;  %7902 = vmatpush3.msra.mxu1 %v9348_v4 }
 0xdf7   :  { %7857 = vmatprep.subr.mxu0 %v9307_v37  ;;  %7877 = vmatprep.mubr.f32.mxu0 %v9489_v46 }
 0xdf8   :  { %7903 = vmatprep.subr.mxu1 %v9350_v44  ;;  %7858 = vmatpush3.msra.mxu0 %v9307_v37 }
 0xdf9   :  { %7904 = vmatpush3.msra.mxu1 %v9350_v44  ;;  %7859 = vmatprep.subr.mxu0 %v9322_v10 }
 0xdfa   :  { %7905 = vmatprep.subr.mxu1 %v9368_v32  ;;  %7860 = vmatpush3.msra.mxu0 %v9322_v10 }
 0xdfb   :  { %7906 = vmatpush3.msra.mxu1 %v9368_v32  ;;  %7861 = vmatprep.subr.mxu0 %v9362_v9 }
 0xdfc   :  { %7907 = vmatprep.subr.mxu1 %v9380_v34  ;;  %7862 = vmatpush3.msra.mxu0 %v9362_v9 }
 0xdfd   :  { %7908 = vmatpush3.msra.mxu1 %v9380_v34  ;;  %7863 = vmatprep.subr.mxu0 %v9366_v56 }
 0xdfe   :  { %7909 = vmatprep.subr.mxu1 %v9428_v45  ;;  %7864 = vmatpush3.msra.mxu0 %v9366_v56 }
 0xdff   :  { %7910 = vmatpush3.msra.mxu1 %v9428_v45  ;;  %7865 = vmatprep.subr.mxu0 %v9378_v48 }
 0xe00   :  { %7911 = vmatprep.subr.mxu1 %v9436_v28  ;;  %7866 = vmatpush3.msra.mxu0 %v9378_v48 }
 0xe01   :  { %7912 = vmatpush3.msra.mxu1 %v9436_v28  ;;  %7867 = vmatprep.subr.mxu0 %v9390_v57 }
 0xe02   :  { %7913 = vmatprep.subr.mxu1 %v9449_v15  ;;  %7868 = vmatpush3.msra.mxu0 %v9390_v57 }
 0xe03   :  { %7914 = vmatpush3.msra.mxu1 %v9449_v15  ;;  %7869 = vmatprep.subr.mxu0 %v9400_v62 }
 0xe04   :  { %7916 = vmatmul.mubr.f32.vlgmr.msra.gmra.mxu1 %v9898_v20  ;;  %7959 = vmatprep.subr.mxu1 %v9238_v12 }
 0xe05   :  { %7870 = vmatpush3.msra.mxu0 %v9400_v62  ;;  %7918 = vmatprep.mubr.f32.mxu1 %v5040_v38 }
 0xe06   :  { %7960 = vmatpush3.msra.mxu1 %v9238_v12  ;;  %7871 = vmatprep.subr.mxu0 %v9434_v51  ;;  %v9899_v12 = vld [vmem:[#allocation7_spill] sm:$0xff] }
 0xe07   :  { %7961 = vmatprep.subr.mxu1 %v9240_v26  ;;  %7872 = vmatpush3.msra.mxu0 %v9434_v51 }
 0xe08   :  { %7962 = vmatpush3.msra.mxu1 %v9240_v26  ;;  %7873 = vmatprep.subr.mxu0 %v9447_v18  ;;  %v9900_v26 = vld [vmem:[#allocation6_spill] sm:$0xff] }
 0xe09   :  { %7919 = vmatmul.mubr.f32.gmra.mxu1 %v5050_v42  ;;  %7963 = vmatprep.subr.mxu1 %v9242_v49 }
 0xe0a   :  { %7874 = vmatpush3.msra.mxu0 %v9447_v18  ;;  %7964 = vmatpush3.msra.mxu1 %v9242_v49  ;;  %v9901_v49 = vld [vmem:[#allocation3_spill] sm:$0xff] }
 0xe0b   :  { %7991 = vmatprep.mubr.f32.mxu1 %v9485_v7  ;;  %7875 = vmatprep.subr.mxu0 %v9459_v8 }
 0xe0c   :  { %7965 = vmatprep.subr.mxu1 %v9253_v11  ;;  %7876 = vmatpush3.msra.mxu0 %v9459_v8 }
 0xe0d   :  { %7966 = vmatpush3.msra.mxu1 %v9253_v11  ;;  %7878 = vmatmul.mubr.f32.vlgmr.msra.gmra.mxu0 %v9501_v33  ;;  %v9902_v11 = vld [vmem:[#allocation4_spill] sm:$0xff] }
 0xe0e   :  { %7921 = vmatprep.subr.mxu0 %v9290_v54  ;;  %7967 = vmatprep.subr.mxu1 %v9255_v0 }
 0xe0f   :  { %7880 = vmatprep.mubr.f32.mxu0 %v9519_v29  ;;  %7922 = vmatpush3.msra.mxu0 %v9290_v54 }
 0xe10   :  { %7968 = vmatpush3.msra.mxu1 %v9255_v0  ;;  %7923 = vmatprep.subr.mxu0 %v9293_v16  ;;  %v9903_v0 = vmov 0.0  }
 0xe11   :  { %7969 = vmatprep.subr.mxu1 %v9257_v5  ;;  %7924 = vmatpush3.msra.mxu0 %v9293_v16 }
 0xe12   :  { %7970 = vmatpush3.msra.mxu1 %v9257_v5  ;;  %7881 = vmatmul.mubr.f32.gmra.mxu0 %v9541_v47  ;;  %v9904_v5 = vld [vmem:[#allocation5_spill] sm:$0xff] }
 0xe13   :  { %7925 = vmatprep.subr.mxu0 %v9296_v35  ;;  %7971 = vmatprep.subr.mxu1 %v9275_v55 }
 0xe14   :  { %7926 = vmatpush3.msra.mxu0 %v9296_v35  ;;  %7953 = vmatprep.mubr.f32.mxu0 %v9485_v7 }
 0xe15   :  { %7972 = vmatpush3.msra.mxu1 %v9275_v55  ;;  %7927 = vmatprep.subr.mxu0 %v9300_v59  ;;  %v8218_v55 = vmov 7  }
 0xe16   :  { %7973 = vmatprep.subr.mxu1 %v9287_v53  ;;  %7928 = vmatpush3.msra.mxu0 %v9300_v59 }
 0xe17   :  { %7974 = vmatpush3.msra.mxu1 %v9287_v53  ;;  %7929 = vmatprep.subr.mxu0 %v9303_v60 }
 0xe18   :  { %7975 = vmatprep.subr.mxu1 %v9346_v31  ;;  %7930 = vmatpush3.msra.mxu0 %v9303_v60 }
 0xe19   :  { %7976 = vmatpush3.msra.mxu1 %v9346_v31  ;;  %7931 = vmatprep.subr.mxu0 %v9318_v27 }
 0xe1a   :  { %7977 = vmatprep.subr.mxu1 %v9348_v4  ;;  %7932 = vmatpush3.msra.mxu0 %v9318_v27 }
 0xe1b   :  { %7978 = vmatpush3.msra.mxu1 %v9348_v4  ;;  %7933 = vmatprep.subr.mxu0 %v9339_v30 }
 0xe1c   :  { %7979 = vmatprep.subr.mxu1 %v9350_v44  ;;  %7934 = vmatpush3.msra.mxu0 %v9339_v30  ;;  %v5707_v30 = vld [vmem:[%s9850_s4] sm:$0xff] }
 0xe1d   :  { %7980 = vmatpush3.msra.mxu1 %v9350_v44  ;;  %7935 = vmatprep.subr.mxu0 %v9355_v61  ;;  %v5713_v9 = vsel %vm64_vm0, %v5707_v30, 0 }
 0xe1e   :  { %7981 = vmatprep.subr.mxu1 %v9368_v32  ;;  %7936 = vmatpush3.msra.mxu0 %v9355_v61 }
 0xe1f   :  { %7982 = vmatpush3.msra.mxu1 %v9368_v32  ;;  %7937 = vmatprep.subr.mxu0 %v9374_v14 }
 0xe20   :  { %7983 = vmatprep.subr.mxu1 %v9380_v34  ;;  %7938 = vmatpush3.msra.mxu0 %v9374_v14 }
 0xe21   :  { %7984 = vmatpush3.msra.mxu1 %v9380_v34  ;;  %7939 = vmatprep.subr.mxu0 %v9386_v23  ;;  %v9689_v34 = vand.u32 4294901760, %v5713_v9 }
 0xe22   :  { %7985 = vmatprep.subr.mxu1 %v9428_v45  ;;  %7940 = vmatpush3.msra.mxu0 %v9386_v23 }
 0xe23   :  { %7986 = vmatpush3.msra.mxu1 %v9428_v45  ;;  %7941 = vmatprep.subr.mxu0 %v9899_v12  ;;  %v9692_v7 = vsub.f32 %v5713_v9, %v9689_v34  ;;  %v8199_v9 = vld [vmem:[%s9845_s6] sm:$0xff] }
 0xe24   :  { %7987 = vmatprep.subr.mxu1 %v9436_v28  ;;  %7942 = vmatpush3.msra.mxu0 %v9899_v12 }
 0xe25   :  { %7988 = vmatpush3.msra.mxu1 %v9436_v28  ;;  %7943 = vmatprep.subr.mxu0 %v9900_v26  ;;  %v5786_v38 = vand.u32 4294901760, %v9692_v7 }
 0xe26   :  { %7989 = vmatprep.subr.mxu1 %v9449_v15  ;;  %7944 = vmatpush3.msra.mxu0 %v9900_v26 }
 0xe27   :  { %7990 = vmatpush3.msra.mxu1 %v9449_v15  ;;  %7945 = vmatprep.subr.mxu0 %v9901_v49  ;;  %v5787_v12 = vsub.f32 %v9692_v7, %v5786_v38 }
 0xe28   :  { %7992 = vmatmul.mubr.f32.vlgmr.msra.gmra.mxu1 %v9496_v6  ;;  %7946 = vmatpush3.msra.mxu0 %v9901_v49 }
 0xe29   :  { %7994 = vmatprep.mubr.f32.mxu1 %v9510_v1  ;;  %7947 = vmatprep.subr.mxu0 %v9902_v11 }
 0xe2a   :  { %7948 = vmatpush3.msra.mxu0 %v9902_v11  ;;  %8008 = vmatprep.subr.mxu1 %v9903_v0 }
 0xe2b   :  { %7949 = vmatprep.subr.mxu0 %v9904_v5  ;;  %8149 = vset.pattern.permute.xlu0 %v8218_v55 }
 0xe2c   :  { %7995 = vmatmul.mubr.f32.gmra.mxu1 %v9531_v50  ;;  %7950 = vmatpush3.msra.mxu0 %v9904_v5 }
 0xe2d   :  { %7951 = vmatprep.subr.mxu0 %v9466_v36  ;;  %8016 = vmatprep.mubr.msk.f32.mxu1 %vm8212_vm1, %v9903_v0 }
 0xe2e   :  { %7952 = vmatpush3.msra.mxu0 %v9466_v36  ;;  %5709 = vperm.xlu0 %8149, %v9212_v41  }
 0xe2f   :  { %7954 = vmatmul.mubr.f32.vlgmr.msra.gmra.mxu0 %v9496_v6  ;;  %7997 = vmatprep.subr.mxu0 %v9903_v0 }
 0xe30   :  { %7956 = vmatprep.mubr.f32.mxu0 %v9510_v1 }
 0xe33   :  { %7957 = vmatmul.mubr.f32.gmra.mxu0 %v9531_v50 }
 0xe34   :  { %8005 = vmatprep.mubr.msk.f32.mxu0 %vm8212_vm1, %v9903_v0 }
 0xea1   :  { %v7841_v25 = vpop.f32.mrf.mxu1 }
 0xea3   :  { %v5205_v63 = vpop.f32.mrf.mxu1 }
 0xea9   :  { %v7803_v19 = vpop.f32.mrf.mxu0 }
 0xeaa   :  { %v5212_v31 = vadd.f32 %v7841_v25, %v7803_v19 }
 0xeab   :  { %v5024_v36 = vpop.f32.mrf.mxu0 }
 0xeac   :  { %v7844_v53 = vpop.f32.mrf.mxu1  ;;  %v5206_v44 = vadd.f32 %v5205_v63, %v5024_v36  ;;  %v5788_v63 = vand.u32 4294901760, %v5787_v12 }
 0xeae   :  { %v5217_v54 = vpop.f32.mrf.mxu1 }
 0xeb5   :  { %v7806_v16 = vpop.f32.mrf.mxu0 }
 0xeb6   :  { %v5224_v32 = vadd.f32 %v7844_v53, %v7806_v16 }
 0xeb7   :  { %v5044_v59 = vpop.f32.mrf.mxu0 }
 0xeb8   :  { %v5218_v23 = vadd.f32 %v5217_v54, %v5044_v59 }
 0xec4   :  { %v7917_v35 = vpop.f32.mrf.mxu1 }
 0xec6   :  { %v5437_v60 = vpop.f32.mrf.mxu1 }
 0xec9   :  { %v7920_v27 = vpop.f32.mrf.mxu1 }
 0xecb   :  { %v5453_v4 = vpop.f32.mrf.mxu1 }
 0xecd   :  { %v7879_v37 = vpop.f32.mrf.mxu0 }
 0xece   :  { %v5335_v61 = vadd.f32 %v7879_v37, %v5212_v31 }
 0xecf   :  { %v5327_v10 = vpop.f32.mrf.mxu0 }
 0xed0   :  { %v5328_v14 = vadd.f32 %v5327_v10, %v5206_v44  ;;  %v5446_v62 = vadd.f32 %v7917_v35, %v5335_v61  ;;  %v6201_v10 = vld [vmem:[%s9851_s5] sm:$0xff]  ;;  %v8219_v61 = vmov 6  }
 0xed1   :  { %v6222_v30 = vsel %vm2410_vm7, %v6201_v10, 0  ;;  %8150 = vset.pattern.permute.xlu1 %v8219_v61  ;;  %8151 = vset.pattern.permute.xlu0 %v8219_v61 }
 0xed2   :  { %v7882_v41 = vpop.f32.mrf.mxu0  ;;  %v5438_v15 = vadd.f32 %v5437_v60, %v5328_v14  ;;  %v9762_v31 = vand.u32 4294901760, %v6222_v30  ;;  %6206 = vperm.xlu1 %8150, %v8199_v9   ;;  %v9905_v14 = vmov 0  }
 0xed3   :  { %v5349_v57 = vadd.f32 %v7882_v41, %v5224_v32  ;;  %v8201_v32 = vld [vmem:[%s9845_s6 + $0x8] sm:$0xff] }
 0xed4   :  { %v5341_v48 = vpop.f32.mrf.mxu0 }
 0xed5   :  { %v5342_v28 = vadd.f32 %v5341_v48, %v5218_v23  ;;  %v5462_v17 = vadd.f32 %v7920_v27, %v5349_v57  ;;  %v8202_v48 = vld [vmem:[%s9845_s6 + $0x18] sm:$0xff] }
 0xed6   :  { %6210 = vperm.xlu1 %8150, %v8201_v32  }
 0xed7   :  { %v5454_v52 = vadd.f32 %v5453_v4, %v5342_v28  ;;  %v9765_v4 = vsub.f32 %v6222_v30, %v9762_v31 }
 0xed9   :  { %v6301_v41 = vand.u32 4294901760, %v9765_v4 }
 0xeda   :  { %6218 = vperm.xlu1 %8150, %v8202_v48  }
 0xee8   :  { %v7993_v56 = vpop.f32.mrf.mxu1 }
 0xeea   :  { %v5685_v45 = vpop.f32.mrf.mxu1 }
 0xeec   :  { %v7996_v33 = vpop.f32.mrf.mxu1 }
 0xeee   :  { %v5697_v42 = vpop.f32.mrf.mxu1 }
 0xeef   :  { %v7955_v51 = vpop.f32.mrf.mxu0 }
 0xef0   :  { %v5587_v18 = vadd.f32 %v7955_v51, %v5446_v62  ;;  %v5710_v62 = vpop.permute.xlu0 %5709  ;;  %v6202_v51 = vld [vmem:[%s9851_s5 + $0x8] sm:$0xff] }
 0xef1   :  { %v5580_v8 = vpop.f32.mrf.mxu0 }
 0xef2   :  { %v5692_v46 = vadd.f32 %v7993_v56, %v5587_v18  ;;  %v5581_v6 = vadd.f32 %v5580_v8, %v5438_v15  ;;  %v8200_v56 = vld [vmem:[%s9845_s6 + $0x10] sm:$0xff] }
 0xef3   :  { %v7958_v50 = vpop.f32.mrf.mxu0  ;;  %6214 = vperm.xlu0 %8151, %v8200_v56   ;;  %v6203_v18 = vld [vmem:[%s9851_s5 + $0x10] sm:$0xff] }
 0xef4   :  { %v9694_v1 = vand.u32 4294901760, %v5692_v46  ;;  %v5686_v29 = vadd.f32 %v5685_v45, %v5581_v6  ;;  %v5599_v39 = vadd.f32 %v7958_v50, %v5462_v17  ;;  %v6228_v6 = vsel %vm2410_vm7, %v6203_v18, 0  ;;  %v6204_v17 = vld [vmem:[%s9851_s5 + $0x18] sm:$0xff] }
 0xef5   :  { %v5592_v13 = vpop.f32.mrf.mxu0 }
 0xef6   :  { %v9697_v21 = vand.u32 4294901760, %v5686_v29  ;;  %v5704_v47 = vadd.f32 %v7996_v33, %v5599_v39  ;;  %v5593_v24 = vadd.f32 %v5592_v13, %v5454_v52  ;;  %v5834_v2 = vsub.f32 %v5692_v46, %v9694_v1 }
 0xef7   :  { %8152 = vset.pattern.permute.xlu0 %v9905_v14  ;;  %v6225_v46 = vsel %vm2410_vm7, %v6202_v51, 0 }
 0xef8   :  { %v9700_v40 = vand.u32 4294901760, %v5704_v47  ;;  %v5698_v20 = vadd.f32 %v5697_v42, %v5593_v24  ;;  %v5841_v26 = vsub.f32 %v5686_v29, %v9697_v21  ;;  %v5835_v5 = vand.u32 4294901760, %v5834_v2 }
 0xef9   :  { %v6309_v50 = vand.u32 4294901760, %v6225_v46  ;;  %v6231_v29 = vsel %vm2410_vm7, %v6204_v17, 0 }
 0xefa   :  { %v5820_v49 = vsub.f32 %v5704_v47, %v9700_v40  ;;  %v9707_v11 = vand.u32 4294901760, %v5698_v20  ;;  %7998 = vmatpush3.msra.mxu0 %v9700_v40  ;;  %v5842_v19 = vand.u32 4294901760, %v5841_v26  ;;  %v5836_v35 = vsub.f32 %v5834_v2, %v5835_v5 }
 0xefb   :  { %7999 = vmatprep.subr.mxu0 %v9903_v0  ;;  %v6310_v13 = vsub.f32 %v6225_v46, %v6309_v50 }
 0xefc   :  { %v5821_v55 = vand.u32 4294901760, %v5820_v49  ;;  %v5827_v25 = vsub.f32 %v5698_v20, %v9707_v11  ;;  %8000 = vmatpush3.msra.mxu0 %v9707_v11  ;;  %v5843_v60 = vsub.f32 %v5841_v26, %v5842_v19  ;;  %v5837_v37 = vand.u32 4294901760, %v5836_v35 }
 0xefd   :  { %8001 = vmatprep.subr.mxu0 %v9903_v0 }
 0xefe   :  { %v5828_v53 = vand.u32 4294901760, %v5827_v25  ;;  %8002 = vmatpush3.msra.mxu0 %v9694_v1  ;;  %v5822_v36 = vsub.f32 %v5820_v49, %v5821_v55  ;;  %v5844_v27 = vand.u32 4294901760, %v5843_v60 }
 0xeff   :  { %8003 = vmatprep.subr.mxu0 %v9903_v0 }
 0xf00   :  { %8004 = vmatpush3.msra.mxu0 %v9697_v21  ;;  %v5823_v54 = vand.u32 4294901760, %v5822_v36  ;;  %v5829_v16 = vsub.f32 %v5827_v25, %v5828_v53 }
 0xf01   :  { %8019 = vmatprep.subr.mxu0 %v9903_v0  ;;  %8006 = vmatmul.mubr.f32.vlgmr.msra.gmra.mxu0 %v5788_v63 }
 0xf02   :  { %8009 = vmatpush3.msra.mxu1 %v5823_v54  ;;  %8020 = vmatpush3.msra.mxu0 %v5820_v49  ;;  %v5830_v59 = vand.u32 4294901760, %v5829_v16 }
 0xf03   :  { %8010 = vmatprep.subr.mxu1 %v9903_v0  ;;  %8021 = vmatprep.subr.mxu0 %v9903_v0 }
 0xf04   :  { %8011 = vmatpush3.msra.mxu1 %v5830_v59  ;;  %8022 = vmatpush3.msra.mxu0 %v5827_v25 }
 0xf05   :  { %8012 = vmatprep.subr.mxu1 %v9903_v0  ;;  %8023 = vmatprep.subr.mxu0 %v9903_v0 }
 0xf06   :  { %8013 = vmatpush3.msra.mxu1 %v5837_v37  ;;  %8024 = vmatpush3.msra.mxu0 %v5834_v2 }
 0xf07   :  { %8014 = vmatprep.subr.mxu1 %v9903_v0  ;;  %8025 = vmatprep.subr.mxu0 %v9903_v0 }
 0xf08   :  { %8015 = vmatpush3.msra.mxu1 %v5844_v27  ;;  %8026 = vmatpush3.msra.mxu0 %v5841_v26 }
 0xf09   :  { %8027 = vmatprep.mubr.msk.f32.mxu0 %vm8212_vm1, %v9903_v0  ;;  %8030 = vmatprep.subr.mxu1 %v9903_v0 }
 0xf0a   :  { %8041 = vmatprep.subr.mxu0 %v9903_v0  ;;  %8017 = vmatmul.mubr.f32.vlgmr.msra.gmra.mxu1 %v9689_v34 }
 0xf0b   :  { %8028 = vmatmul.mubr.f32.vlgmr.msra.gmra.mxu0 %v9692_v7  ;;  %8031 = vmatpush3.msra.mxu1 %v9700_v40 }
 0xf0c   :  { %8042 = vmatpush3.msra.mxu0 %v5821_v55  ;;  %8032 = vmatprep.subr.mxu1 %v9903_v0 }
 0xf0d   :  { %8043 = vmatprep.subr.mxu0 %v9903_v0  ;;  %8033 = vmatpush3.msra.mxu1 %v9707_v11 }
 0xf0e   :  { %8044 = vmatpush3.msra.mxu0 %v5828_v53  ;;  %8034 = vmatprep.subr.mxu1 %v9903_v0 }
 0xf0f   :  { %8045 = vmatprep.subr.mxu0 %v9903_v0  ;;  %8035 = vmatpush3.msra.mxu1 %v9694_v1 }
 0xf10   :  { %8046 = vmatpush3.msra.mxu0 %v5835_v5  ;;  %8036 = vmatprep.subr.mxu1 %v9903_v0 }
 0xf11   :  { %8047 = vmatprep.subr.mxu0 %v9903_v0  ;;  %8037 = vmatpush3.msra.mxu1 %v9697_v21 }
 0xf12   :  { %8048 = vmatpush3.msra.mxu0 %v5842_v19  ;;  %8038 = vmatprep.mubr.msk.f32.mxu1 %vm8212_vm1, %v9903_v0 }
 0xf13   :  { %8052 = vmatprep.subr.mxu1 %v9903_v0  ;;  %8039 = vmatmul.mubr.f32.vlgmr.msra.gmra.mxu1 %v5786_v38  ;;  %v6329_v38 = vand.u32 4294901760, %v6231_v29 }
 0xf14   :  { %8053 = vmatpush3.msra.mxu1 %v9700_v40  ;;  %8049 = vmatprep.mubr.msk.f32.mxu0 %vm8212_vm1, %v9903_v0  ;;  %v6311_v40 = vand.u32 4294901760, %v6310_v13 }
 0xf15   :  { %8054 = vmatprep.subr.mxu1 %v9903_v0  ;;  %8050 = vmatmul.mubr.f32.vlgmr.msra.gmra.mxu0 %v9689_v34  ;;  %v6330_v20 = vsub.f32 %v6231_v29, %v6329_v38 }
 0xf16   :  { %8055 = vmatpush3.msra.mxu1 %v9707_v11  ;;  %8060 = vmatprep.mubr.msk.f32.mxu1 %vm8212_vm1, %v9903_v0  ;;  %v6312_v5 = vsub.f32 %v6310_v13, %v6311_v40 }
 0xf17   :  { %8056 = vmatprep.subr.mxu1 %v9903_v0  ;;  %v6331_v55 = vand.u32 4294901760, %v6330_v20 }
 0xf18   :  { %8057 = vmatpush3.msra.mxu1 %v9694_v1  ;;  %v6319_v1 = vand.u32 4294901760, %v6228_v6  ;;  %v6313_v36 = vand.u32 4294901760, %v6312_v5 }
 0xf19   :  { %8058 = vmatprep.subr.mxu1 %v9903_v0  ;;  %v6302_v0 = vsub.f32 %v9765_v4, %v6301_v41  ;;  %v6332_v54 = vsub.f32 %v6330_v20, %v6331_v55 }
 0xf1a   :  { %8059 = vmatpush3.msra.mxu1 %v9697_v21  ;;  %v6320_v24 = vsub.f32 %v6228_v6, %v6319_v1 }
 0xf1b   :  { %8061 = vmatmul.mubr.f32.vlgmr.msra.gmra.mxu1 %v9689_v34  ;;  %v6303_v44 = vand.u32 4294901760, %v6302_v0  ;;  %v9906_v34 = vmov 1   ;;  %v6333_v60 = vand.u32 4294901760, %v6332_v54 }
 0xf1c   :  { %8073 = vmatprep.mubr.f32.mxu1 %v9762_v31  ;;  %8153 = vset.pattern.permute.xlu1 %v9906_v34  ;;  %v6321_v12 = vand.u32 4294901760, %v6320_v24 }
 0xf1d   :  { %8065 = vmatprep.mubr.f32.mxu0 %v6303_v44 }
 0xf1e   :  { %v6322_v63 = vsub.f32 %v6320_v24, %v6321_v12 }
 0xf20   :  { %v6323_v16 = vand.u32 4294901760, %v6322_v63 }
 0xf4d   :  { %v6207_v10 = vpop.permute.xlu1 %6206 }
 0xf51   :  { %v6211_v44 = vpop.permute.xlu1 %6210 }
 0xf55   :  { %v6219_v32 = vpop.permute.xlu1 %6218 }
 0xfc1   :  { %v5790_v23 = vpop.f32.mrf.mxu0 }
 0xfc2   :  { %v5791_v15 = vadd.f32 %v5790_v23, %v5710_v62 }
 0xfc3   :  { %v8007_v57 = vpop.f32.mrf.mxu0 }
 0xfca   :  { %v5881_v45 = vpop.f32.mrf.mxu1 }
 0xfcb   :  { %v5961_v28 = vpop.f32.mrf.mxu0  ;;  %v5882_v33 = vadd.f32 %v5881_v45, %v5791_v15 }
 0xfcc   :  { %v8018_v8 = vpop.f32.mrf.mxu1 }
 0xfcd   :  { %v8029_v7 = vpop.f32.mrf.mxu0  ;;  %v5962_v52 = vadd.f32 %v5961_v28, %v5882_v33 }
 0xfd3   :  { %v6038_v39 = vpop.f32.mrf.mxu1 }
 0xfd4   :  { %v6039_v42 = vadd.f32 %v6038_v39, %v5962_v52 }
 0xfd5   :  { %v6121_v21 = vpop.f32.mrf.mxu0  ;;  %v8040_v47 = vpop.f32.mrf.mxu1 }
 0xfd6   :  { %v6122_v26 = vadd.f32 %v6121_v21, %v6039_v42 }
 0xfd7   :  { %v8051_v2 = vpop.f32.mrf.mxu0 }
 0xfdb   :  { %v6196_v49 = vpop.f32.mrf.mxu1 }
 0xfdc   :  { %v6197_v11 = vadd.f32 %v6196_v49, %v6122_v26 }
 0xfdd   :  { %v8062_v25 = vpop.f32.mrf.mxu1 }
 0xfde   :  { %v6200_v19 = vmax.f32 %v6197_v11, 0.0 }
 0xfe0   :  { %v6264_v53 = vand.u32 4294901760, %v6200_v19 }
 0xfe2   :  { %v6371_v35 = vsub.f32 %v6200_v19, %v6264_v53  ;;  %8063 = vmatprep.subr.mxu0 %v6264_v53 }
 0xfe3   :  { %8064 = vmatpush3.msra.mxu0 %v6264_v53 }
 0xfe4   :  { %8066 = vmatmul.mubr.f32.vlgmr.msra.gmra.mxu0 %v6313_v36  ;;  %8079 = vmatprep.subr.mxu0 %v6371_v35  ;;  %v6372_v59 = vand.u32 4294901760, %v6371_v35 }
 0xfe5   :  { %8080 = vmatpush3.msra.mxu0 %v6371_v35  ;;  %8068 = vmatprep.mubr.f32.mxu0 %v6323_v16 }
 0xfe6   :  { %8095 = vmatprep.subr.mxu0 %v6372_v59  ;;  %v6373_v37 = vsub.f32 %v6371_v35, %v6372_v59 }
 0xfe8   :  { %8069 = vmatmul.mubr.f32.gmra.mxu0 %v6333_v60  ;;  %v6374_v27 = vand.u32 4294901760, %v6373_v37 }
 0xfe9   :  { %8081 = vmatprep.mubr.f32.mxu0 %v9765_v4 }
 0xfea   :  { %8071 = vmatprep.subr.mxu1 %v6374_v27 }
 0xfeb   :  { %8072 = vmatpush3.msra.mxu1 %v6374_v27 }
 0xfec   :  { %8074 = vmatmul.mubr.f32.vlgmr.msra.gmra.mxu1 %v6309_v50  ;;  %8082 = vmatmul.mubr.f32.vlgmr.msra.gmra.mxu0 %v6310_v13 }
 0xfed   :  { %8087 = vmatprep.subr.mxu1 %v6264_v53  ;;  %8096 = vmatpush3.msra.mxu0 %v6372_v59 }
 0xfee   :  { %8088 = vmatpush3.msra.mxu1 %v6264_v53  ;;  %8076 = vmatprep.mubr.f32.mxu1 %v6319_v1 }
 0xfef   :  { %8103 = vmatprep.subr.mxu1 %v6264_v53  ;;  %8084 = vmatprep.mubr.f32.mxu0 %v6320_v24 }
 0xff0   :  { %8077 = vmatmul.mubr.f32.gmra.mxu1 %v6329_v38  ;;  %8085 = vmatmul.mubr.f32.gmra.mxu0 %v6330_v20 }
 0xff1   :  { %8089 = vmatprep.mubr.f32.mxu1 %v6301_v41  ;;  %8097 = vmatprep.mubr.f32.mxu0 %v9762_v31 }
 0xff4   :  { %8090 = vmatmul.mubr.f32.vlgmr.msra.gmra.mxu1 %v6311_v40  ;;  %8098 = vmatmul.mubr.f32.vlgmr.msra.gmra.mxu0 %v6309_v50 }
 0xff5   :  { %8104 = vmatpush3.msra.mxu1 %v6264_v53  ;;  %8092 = vmatprep.mubr.f32.mxu1 %v6321_v12 }
 0xff6   :  { %8100 = vmatprep.mubr.f32.mxu0 %v6319_v1 }
 0xff8   :  { %8093 = vmatmul.mubr.f32.gmra.mxu1 %v6331_v55  ;;  %8101 = vmatmul.mubr.f32.gmra.mxu0 %v6329_v38 }
 0xff9   :  { %8105 = vmatprep.mubr.f32.mxu1 %v9762_v31  ;;  %v6215_v31 = vpop.permute.xlu0 %6214 }
 0xffc   :  { %8106 = vmatmul.mubr.f32.vlgmr.msra.gmra.mxu1 %v6309_v50 }
 0xffd   :  { %8108 = vmatprep.mubr.f32.mxu1 %v6319_v1 }
0x1000   :  { %8109 = vmatmul.mubr.f32.gmra.mxu1 %v6329_v38 }
0x10a4   :  { %v8067_v30 = vpop.f32.mrf.mxu0 }
0x10a5   :  { %v6316_v56 = vadd.f32 %v8067_v30, %v6211_v44 }
0x10a6   :  { %v6305_v0 = vpop.f32.mrf.mxu0 }
0x10a7   :  { %v6306_v45 = vadd.f32 %v6305_v0, %v6207_v10 }
0x10a8   :  { %v8070_v4 = vpop.f32.mrf.mxu0 }
0x10a9   :  { %v6336_v28 = vadd.f32 %v8070_v4, %v6219_v32 }
0x10aa   :  { %v6325_v41 = vpop.f32.mrf.mxu0 }
0x10ab   :  { %v6326_v17 = vadd.f32 %v6325_v41, %v6215_v31 }
0x10ac   :  { %v8075_v61 = vpop.f32.mrf.mxu1  ;;  %v8083_v9 = vpop.f32.mrf.mxu0 }
0x10ad   :  { %v6418_v51 = vadd.f32 %v8075_v61, %v6316_v56 }
0x10ae   :  { %v6411_v48 = vpop.f32.mrf.mxu1  ;;  %v6503_v23 = vpop.f32.mrf.mxu0 }
0x10af   :  { %v6412_v8 = vadd.f32 %v6411_v48, %v6306_v45  ;;  %v6511_v6 = vadd.f32 %v8083_v9, %v6418_v51  ;;  %v9907_v48 = vld [vmem:[#allocation2_spill] sm:$0xff]  ;;  %v8203_v45 = vld [vmem:[%s9843_s0 + $0x8] sm:$0xff] }
0x10b0   :  { %v8078_v57 = vpop.f32.mrf.mxu1  ;;  %v8086_v62 = vpop.f32.mrf.mxu0  ;;  %vm6852_vm8 = vcmp.ge.s32.totalorder %v9907_v48, 64 }
0x10b1   :  { %v6430_v33 = vadd.f32 %v8078_v57, %v6336_v28  ;;  %v6504_v29 = vadd.f32 %v6503_v23, %v6412_v8 }
0x10b2   :  { %v6423_v18 = vpop.f32.mrf.mxu1  ;;  %v6517_v15 = vpop.f32.mrf.mxu0 }
0x10b3   :  { %v6424_v52 = vadd.f32 %v6423_v18, %v6326_v17  ;;  %v6525_v21 = vadd.f32 %v8086_v62, %v6430_v33 }
0x10b4   :  { %v8091_v7 = vpop.f32.mrf.mxu1  ;;  %v8099_v46 = vpop.f32.mrf.mxu0 }
0x10b5   :  { %v6607_v39 = vadd.f32 %v8091_v7, %v6511_v6  ;;  %v6518_v42 = vadd.f32 %v6517_v15, %v6424_v52 }
0x10b6   :  { %v6598_v50 = vpop.f32.mrf.mxu1  ;;  %v6696_v1 = vpop.f32.mrf.mxu0 }
0x10b7   :  { %v6599_v38 = vadd.f32 %v6598_v50, %v6504_v29  ;;  %v6703_v2 = vadd.f32 %v8099_v46, %v6607_v39 }
0x10b8   :  { %v8094_v13 = vpop.f32.mrf.mxu1  ;;  %v8102_v24 = vpop.f32.mrf.mxu0 }
0x10b9   :  { %v6623_v40 = vadd.f32 %v8094_v13, %v6525_v21  ;;  %v6697_v12 = vadd.f32 %v6696_v1, %v6599_v38 }
0x10ba   :  { %v6614_v47 = vpop.f32.mrf.mxu1  ;;  %v6708_v11 = vpop.f32.mrf.mxu0 }
0x10bb   :  { %v6615_v26 = vadd.f32 %v6614_v47, %v6518_v42  ;;  %v6715_v55 = vadd.f32 %v8102_v24, %v6623_v40 }
0x10bc   :  { %v8107_v20 = vpop.f32.mrf.mxu1 }
0x10bd   :  { %v6793_v49 = vadd.f32 %v8107_v20, %v6703_v2  ;;  %v6709_v53 = vadd.f32 %v6708_v11, %v6615_v26 }
0x10be   :  { %v6786_v5 = vpop.f32.mrf.mxu1 }
0x10bf   :  { %v6908_v25 = vmul.f32 -1.442695, %v6793_v49  ;;  %v6787_v63 = vadd.f32 %v6786_v5, %v6697_v12 }
0x10c0   :  { %v8110_v19 = vpop.f32.mrf.mxu1 }
0x10c1   :  { %8179 = vpow2.f32 %v6908_v25  ;;  %v6907_v36 = vmul.f32 -1.442695, %v6787_v63  ;;  %v6805_v54 = vadd.f32 %v8110_v19, %v6715_v55 }
0x10c2   :  { %v6798_v16 = vpop.f32.mrf.mxu1 }
0x10c3   :  { %8181 = vpow2.f32 %v6907_v36  ;;  %v6910_v35 = vmul.f32 -1.442695, %v6805_v54  ;;  %v6799_v59 = vadd.f32 %v6798_v16, %v6709_v53 }
0x10c5   :  { %8183 = vpow2.f32 %v6910_v35  ;;  %v6909_v60 = vmul.f32 -1.442695, %v6799_v59 }
0x10c7   :  { %8185 = vpow2.f32 %v6909_v60 }
0x10ce   :  { %v8180_v37 = vpop.eup %8179 }
0x10cf   :  { %v6821_v27 = vadd.f32 1.0, %v8180_v37 }
0x10d0   :  { %v8182_v10 = vpop.eup %8181 }
0x10d1   :  { %8187 = vrcp.f32 %v6821_v27  ;;  %v6820_v30 = vadd.f32 1.0, %v8182_v10 }
0x10d2   :  { %v8184_v0 = vpop.eup %8183 }
0x10d3   :  { %8189 = vrcp.f32 %v6820_v30  ;;  %v6823_v44 = vadd.f32 1.0, %v8184_v0 }
0x10d4   :  { %v8186_v4 = vpop.eup %8185 }
0x10d5   :  { %8191 = vrcp.f32 %v6823_v44  ;;  %v6822_v41 = vadd.f32 1.0, %v8186_v4 }
0x10d7   :  { %8193 = vrcp.f32 %v6822_v41 }
0x10de   :  { %v8188_v61 = vpop.eup %8187 }
0x10df   :  { %6860 = vperm.xlu1 %8153, %v8188_v61   ;;  %6839 = vperm.xlu0 %8152, %v8188_v61  }
0x10e0   :  { %v8190_v9 = vpop.eup %8189 }
0x10e2   :  { %v8192_v56 = vpop.eup %8191 }
0x10e3   :  { %8154 = vset.pattern.permute.xlu1 %v9905_v14  ;;  %8155 = vset.pattern.permute.xlu0 %v9906_v34 }
0x10e4   :  { %6834 = vperm.xlu1 %8154, %v8190_v9   ;;  %6856 = vperm.xlu0 %8155, %v8190_v9   ;;  %v8194_v32 = vpop.eup %8193 }
0x10e8   :  { %6868 = vperm.xlu0 %8155, %v8192_v56   ;;  %6849 = vperm.xlu1 %8154, %v8192_v56  }
0x10ec   :  { %6844 = vperm.xlu1 %8154, %v8194_v32  }
0x10f0   :  { %8156 = vset.pattern.permute.xlu1 %v9906_v34 }
0x10f1   :  { %6864 = vperm.xlu1 %8156, %v8194_v32  }
0x115a   :  { %v6840_v23 = vpop.permute.xlu0 %6839  ;;  %v6861_v57 = vpop.permute.xlu1 %6860 }
0x115b   :  { %v6872_v62 = vsel %vm6852_vm8, %v6861_v57, %v6840_v23 }
0x115c   :  { %v6876_v14 = vmul.f32 %v6872_v62, %v9491_v58  ;;  %v8204_v58 = vld [vmem:[%s9843_s0] sm:$0xff] }
0x115e   :  { %v6880_v51 = vadd.f32 %v8203_v45, %v6876_v14 }
0x115f   :  { %v6857_v31 = vpop.permute.xlu0 %6856  ;;  %v6835_v28 = vpop.permute.xlu1 %6834 }
0x1160   :  { %6884 = vst [vmem:[%s9852_s9 + $0x8] sm:$0xff] %v6880_v51  ;;  %v6871_v34 = vsel %vm6852_vm8, %v6857_v31, %v6835_v28 }
0x1161   :  { %v6875_v18 = vmul.f32 %v6871_v34, %v9481_v43  ;;  %v8205_v43 = vld [vmem:[%s9843_s0 + $0x18] sm:$0xff] }
0x1163   :  { %v6879_v15 = vadd.f32 %v8204_v58, %v6875_v18  ;;  %v6869_v8 = vpop.permute.xlu0 %6868  ;;  %v6850_v7 = vpop.permute.xlu1 %6849 }
0x1164   :  { %v6874_v46 = vsel %vm6852_vm8, %v6869_v8, %v6850_v7 }
0x1165   :  { %6883 = vst [vmem:[%s9852_s9] sm:$0xff] %v6879_v15  ;;  %v6878_v6 = vmul.f32 %v6874_v46, %v9526_v22  ;;  %v8206_v22 = vld [vmem:[%s9843_s0 + $0x10] sm:$0xff] }
0x1167   :  { %v6882_v17 = vadd.f32 %v8205_v43, %v6878_v6  ;;  %v6845_v33 = vpop.permute.xlu1 %6844 }
0x1169   :  { %6886 = vst [vmem:[%s9852_s9 + $0x18] sm:$0xff] %v6882_v17 }
0x116c   :  { %v6865_v50 = vpop.permute.xlu1 %6864 }
0x116d   :  { %v6873_v1 = vsel %vm6852_vm8, %v6865_v50, %v6845_v33 }
0x116e   :  { %v6877_v29 = vmul.f32 %v6873_v1, %v9503_v3 }
0x1170   :  { %v6881_v39 = vadd.f32 %v8206_v22, %v6877_v29 }
0x1172   :  { %6885 = vst [vmem:[%s9852_s9 + $0x10] sm:$0xff] %v6881_v39 }

</bundles_post_ra>
